<compile_context>
chip_gen: v5e
topology: v5e:2x2
jax: 0.10.0
libtpu: 0.0.40
codegen_flags: <defaults>
</compile_context>

<pallas_src>
import jax
import jax.numpy as jnp
from jax import lax
from jax.experimental import pallas as pl
from jax.experimental.pallas import tpu as pltpu


def _u_dot_v_kernel(nft_ref, src_ref, dst_ref, o_ref):
    # nft_ref : (D, N) transposed node features, VMEM-resident across the grid
    # src_ref : (1, T) int32 source-node indices for this edge tile
    # dst_ref : (1, T) int32 destination-node indices for this edge tile
    # o_ref   : (1, T) per-edge dot products (lane-dense output block)
    nft = nft_ref[...].astype(jnp.float32)          # (D, N)
    src = src_ref[...]                              # (1, T)
    dst = dst_ref[...]                              # (1, T)
    n_nodes = nft.shape[1]
    t = src.shape[-1]

    # One-hot selection matrices, oriented (N, T) so the edge axis stays on
    # lanes.  (1, T) indices broadcast across sublanes against the iota.
    node_ids = lax.broadcasted_iota(jnp.int32, (n_nodes, t), 0)   # (N, T)
    oh_s = (node_ids == src).astype(jnp.float32)                  # (N, T)
    oh_d = (node_ids == dst).astype(jnp.float32)                  # (N, T)

    # Gather via MXU: (D, N) @ (N, T) -> (D, T) == x[src].T / x[dst].T
    u_t = jnp.dot(nft, oh_s, precision=lax.Precision.HIGHEST,
                  preferred_element_type=jnp.float32)
    v_t = jnp.dot(nft, oh_d, precision=lax.Precision.HIGHEST,
                  preferred_element_type=jnp.float32)

    # Per-edge dot product: elementwise multiply (VPU) + feature-axis
    # (sublane) reduction (XLU).  Output stays lane-dense: (1, T).
    o_ref[...] = jnp.sum(u_t * v_t, axis=0, keepdims=True).astype(o_ref.dtype)


def label_agree_pred(node_feat, src, dst, *, tile_e=512):
    """Pallas equivalent of Label_Agree_Pred.forward (dgl u_dot_v).

    node_feat : [N, D] float32 node features (g.ndata[n_key])
    src, dst  : [E]    integer edge endpoint indices
    returns   : [E, 1] float32 edge feature 'agree_e'
    """
    E = int(src.shape[0])
    N, D = node_feat.shape

    # Keep the edge tile lane-dense (multiple of 128).
    tile_e = max(128, ((int(tile_e) + 127) // 128) * 128)
    num_tiles = pl.cdiv(E, tile_e)
    e_pad = num_tiles * tile_e

    src = jnp.asarray(src, jnp.int32)
    dst = jnp.asarray(dst, jnp.int32)
    pad = e_pad - E
    if pad:
        # Pad with node index 0 (valid); the padded results are sliced away.
        src = jnp.pad(src, (0, pad))
        dst = jnp.pad(dst, (0, pad))

    # Lane-dense tiling of the edge axis: (num_tiles, 1, tile_e).
    src_t = src.reshape(num_tiles, 1, tile_e)
    dst_t = dst.reshape(num_tiles, 1, tile_e)

    # One-time cheap transpose so the in-kernel matmuls use the standard
    # (D, N) @ (N, T) contraction.
    nft = jnp.transpose(node_feat).astype(jnp.float32)            # (D, N)

    grid_spec = pl.GridSpec(
        grid=(num_tiles,),
        in_specs=[
            # Whole node table, same block every step -> fetched once.
            pl.BlockSpec((D, N), lambda i: (0, 0)),
            pl.BlockSpec((None, 1, tile_e), lambda i: (i, 0, 0)),
            pl.BlockSpec((None, 1, tile_e), lambda i: (i, 0, 0)),
        ],
        out_specs=pl.BlockSpec((None, 1, tile_e), lambda i: (i, 0, 0)),
    )

    out = pl.pallas_call(
        _u_dot_v_kernel,
        out_shape=jax.ShapeDtypeStruct((num_tiles, 1, tile_e), jnp.float32),
        grid_spec=grid_spec,
        compiler_params=pltpu.CompilerParams(
            dimension_semantics=("parallel",),
            vmem_limit_bytes=32 * 1024 * 1024,
        ),
    )(nft, src_t, dst_t)

    # Layout plumbing back to the module's [E, 1] contract.
    return out.reshape(e_pad, 1)[:E]


def label_agree_pred_ref(node_feat, src, dst):
    """Pure-JAX reference of dgl u_dot_v."""
    return jnp.sum(node_feat[src] * node_feat[dst], axis=-1, keepdims=True)


if __name__ == "__main__":
    key = jax.random.PRNGKey(0)
    k1, k2, k3 = jax.random.split(key, 3)

    # Small graph: 64 nodes, 128-dim features, 1200 edges (not a multiple of
    # the tile size, so the padding path is exercised).
    N, D, E = 64, 128, 1200

    node_feat = jax.random.normal(k1, (N, D), dtype=jnp.float32)
    src = jax.random.randint(k2, (E,), 0, N, dtype=jnp.int32)
    dst = jax.random.randint(k3, (E,), 0, N, dtype=jnp.int32)

    out = jax.block_until_ready(label_agree_pred(node_feat, src, dst))

    ref = label_agree_pred_ref(node_feat, src, dst)
    assert out.shape == (E, 1)
    assert jnp.allclose(out, ref, atol=1e-4, rtol=1e-4), float(
        jnp.max(jnp.abs(out - ref)))

    print("KERNEL_OK")
</pallas_src>

<mosaic_0001>
module attributes {stable_mosaic.version = 11 : i64} {
  func.func @_u_dot_v_kernel(%arg0: i32, %arg1: memref<128x64xf32, #tpu.memory_space<vmem>>, %arg2: memref<1x1x512xi32, #tpu.memory_space<vmem>>, %arg3: memref<1x1x512xi32, #tpu.memory_space<vmem>>, %arg4: memref<1x1x512xf32, #tpu.memory_space<vmem>>) attributes {dimension_semantics = [#tpu.dimension_semantics<parallel>], iteration_bounds = array<i64: 3>, scalar_prefetch = 0 : i64, scratch_operands = 0 : i64, tpu.core_type = #tpu.core_type<tc>, window_params = [{pipeline_mode = #tpu.pipeline_mode<synchronous>, transform_indices = @transform_0, window_bounds = array<i64: 128, 64>}, {transform_indices = @transform_1, window_bounds = array<i64: 1, 1, 512>}, {transform_indices = @transform_2, window_bounds = array<i64: 1, 1, 512>}, {transform_indices = @transform_3, window_bounds = array<i64: 1, 1, 512>}]} {
    %c0 = arith.constant 0 : index
    %c0_0 = arith.constant 0 : index
    %0 = vector.load %arg1[%c0, %c0_0] : memref<128x64xf32, #tpu.memory_space<vmem>>, vector<128x64xf32>
    %c0_1 = arith.constant 0 : index
    %c0_2 = arith.constant 0 : index
    %c0_3 = arith.constant 0 : index
    %1 = vector.load %arg2[%c0_1, %c0_2, %c0_3] : memref<1x1x512xi32, #tpu.memory_space<vmem>>, vector<1x1x512xi32>
    %2 = vector.shape_cast %1 : vector<1x1x512xi32> to vector<1x512xi32>
    %c0_4 = arith.constant 0 : index
    %c0_5 = arith.constant 0 : index
    %c0_6 = arith.constant 0 : index
    %3 = vector.load %arg3[%c0_4, %c0_5, %c0_6] : memref<1x1x512xi32, #tpu.memory_space<vmem>>, vector<1x1x512xi32>
    %4 = vector.shape_cast %3 : vector<1x1x512xi32> to vector<1x512xi32>
    %5 = tpu.iota {dimensions = array<i32: 0>} : vector<64x512xi32>
    %6 = vector.broadcast %2 : vector<1x512xi32> to vector<64x512xi32>
    %7 = arith.cmpi eq, %5, %6 : vector<64x512xi32>
    %8 = arith.extui %7 : vector<64x512xi1> to vector<64x512xi32>
    %9 = arith.sitofp %8 : vector<64x512xi32> to vector<64x512xf32>
    %10 = vector.broadcast %4 : vector<1x512xi32> to vector<64x512xi32>
    %11 = arith.cmpi eq, %5, %10 : vector<64x512xi32>
    %12 = arith.extui %11 : vector<64x512xi1> to vector<64x512xi32>
    %13 = arith.sitofp %12 : vector<64x512xi32> to vector<64x512xf32>
    %cst = arith.constant dense<0.000000e+00> : vector<128x512xf32>
    %14 = tpu.matmul %0, %9, %cst {dimension_numbers = #tpu.dot_dimension_numbers<[1], [0], [0], [1], [0, 0, 1, 1], [], []>, precision = #tpu.contract_precision<fp32>} : vector<128x64xf32>, vector<64x512xf32>, vector<128x512xf32> -> vector<128x512xf32>
    %cst_7 = arith.constant dense<0.000000e+00> : vector<128x512xf32>
    %15 = tpu.matmul %0, %13, %cst_7 {dimension_numbers = #tpu.dot_dimension_numbers<[1], [0], [0], [1], [0, 0, 1, 1], [], []>, precision = #tpu.contract_precision<fp32>} : vector<128x64xf32>, vector<64x512xf32>, vector<128x512xf32> -> vector<128x512xf32>
    %16 = arith.mulf %14, %15 : vector<128x512xf32>
    %cst_8 = arith.constant dense<0.000000e+00> : vector<512xf32>
    %17 = vector.multi_reduction <add>, %16, %cst_8 [0] : vector<128x512xf32> to vector<512xf32>
    %18 = vector.shape_cast %17 : vector<512xf32> to vector<1x512xf32>
    %c0_9 = arith.constant 0 : index
    %c0_10 = arith.constant 0 : index
    %c0_11 = arith.constant 0 : index
    %19 = vector.load %arg4[%c0_9, %c0_10, %c0_11] : memref<1x1x512xf32, #tpu.memory_space<vmem>>, vector<1x1x512xf32>
    %20 = vector.shape_cast %19 : vector<1x1x512xf32> to vector<1x512xf32>
    %21 = vector.shape_cast %18 : vector<1x512xf32> to vector<1x1x512xf32>
    tpu.vector_store %arg4[%c0_9, %c0_10, %c0_11], %21 {strides = array<i32>} : memref<1x1x512xf32, #tpu.memory_space<vmem>>, vector<1x1x512xf32>,
    return
  }
  func.func @transform_0(%arg0: i32) -> (i32, i32) {
    %c0_i32 = arith.constant 0 : i32
    %c0_i32_0 = arith.constant 0 : i32
    %c0_i32_1 = arith.constant 0 : i32
    return %c0_i32, %c0_i32_0 : i32, i32
  }
  func.func @transform_1(%arg0: i32) -> (i32, i32, i32) {
    %c0_i32 = arith.constant 0 : i32
    %c0_i32_0 = arith.constant 0 : i32
    %c0_i32_1 = arith.constant 0 : i32
    return %arg0, %c0_i32, %c0_i32_0 : i32, i32, i32
  }
  func.func @transform_2(%arg0: i32) -> (i32, i32, i32) {
    %c0_i32 = arith.constant 0 : i32
    %c0_i32_0 = arith.constant 0 : i32
    %c0_i32_1 = arith.constant 0 : i32
    return %arg0, %c0_i32, %c0_i32_0 : i32, i32, i32
  }
  func.func @transform_3(%arg0: i32) -> (i32, i32, i32) {
    %c0_i32 = arith.constant 0 : i32
    %c0_i32_0 = arith.constant 0 : i32
    %c0_i32_1 = arith.constant 0 : i32
    return %arg0, %c0_i32, %c0_i32_0 : i32, i32, i32
  }
}

</mosaic_0001>

<bundles_post_ra>
// kernel: tpu_custom_call.1
= control target key start
LH: loop header
LB: loop body
LE: loop exit
PB: predicated region body
PF: predicated region fallthrough
CT: control target
= control target key end

     0   :  { %8 = vsyncpa [#allocation3], 0  ;;  %s10254_s0 = inlined_call_operand.vmem [shape: f32[128,64], index: 0, kind: input, shape index: {}]   ;;  %s10255_s1 = inlined_call_operand.vmem [shape: s32[3,1,512], index: 1, kind: input, shape index: {}]   ;;  %s10256_s2 = inlined_call_operand.vmem [shape: s32[3,1,512], index: 2, kind: input, shape index: {}]   ;;  %s10257_s3 = inlined_call_operand.hbm [shape: f32[3,1,512], index: 3, kind: output, shape index: {}]  }
   0x1   :  { %10 = vsyncpa [#allocation3 + $0x1], 0  ;;  %s6725_s12 = smov 0   ;;  %s6727_s13 = smov 0  }
   0x2   :  { %s6729_s14 = smov 0   ;;  %s6731_s15 = smov 0  }
   0x3 LB: > { %s6746_s16 = sadd.s32 4294967295, %s6701_s15   ;;  %s6329_s17 = sadd.s32 4294967294, %s6701_s15   ;;  %s6701_s15 = sphi %s6731_s15, %s11153_s15   ;;  %s6697_s14 = sphi %s6729_s14, %s11152_s14   ;;  %s6693_s13 = sphi %s6727_s13, %s11151_s13   ;;  %s6689_s12 = sphi %s6725_s12, %s11150_s12  }
   0x4   : > { %s6750_s18 = sadd.s32 1, %s6701_s15   ;;  %s96_s19 = sadd.s32 1, %s6697_s14 }
   0x5   : > { %s93_s20 = ssub.s32 %s6701_s15, %s6750_s18  ;;  %p106_p0 = scmp.ne.s32.totalorder %s6697_s14, %s6693_s13 }
   0x6   : > { %p94_p1 = scmp.eq.s32.totalorder %s93_s20, 0  ;;  %p107_p2 = scmp.eq.s32.totalorder %s6746_s16, 2 }
   0x7   : > { %p112_p3 = scmp.ne.s32.totalorder %s6693_s13, %s6689_s12  ;;  %p113_p4 = scmp.eq.s32.totalorder %s6329_s17, 2 }
   0x8   : > { %s6761_s21 = scalar_select %p94_p1, %s6697_s14, %s96_s19  }
   0x9   : > { %p6763_p5 = por %p107_p2, %p106_p0  ;;  %p6767_p6 = por %p113_p4, %p112_p3 }
   0xa   : > { %p6332_p7 = scmp.ge.s32.totalorder %s6701_s15, 1  ;;  %p148_p8 = scmp.lt.s32.totalorder %s6701_s15, 4 }
   0xc   : > { %p149_p9 = pnand %p6332_p7, %p148_p8 }
   0xe   : > { %152 = sbr.rel (%p149_p9) target bundleno = 1736 (0x6c8), region = 32 }
  0x13   : > { %p175_p10 = scmp.lt.s32.totalorder %s6746_s16, 2  ;;  %v10258_v0 = vlaneseq  ;;  %v183_v1 = vld [vmem:[%s10254_s0] sm:$0xff]  ;;  %vm410_vm0 = vcmask 523264   ;;  %v184_v2 = vld [vmem:[%s10254_s0 + $0x8] sm:$0xff]  ;;  %v10267_v20 = vmov 1.0   ;;  %v10265_v21 = vmov 0.0  }
  0x14   : > { %v412_v3 = vsel %vm410_vm0, %v183_v1, 0  ;;  %v415_v4 = vsel %vm410_vm0, %v184_v2, 0  ;;  %v185_v38 = vld [vmem:[%s10254_s0 + $0x10] sm:$0xff]  ;;  %v186_v2 = vld [vmem:[%s10254_s0 + $0x18] sm:$0xff]  ;;  %s6593_s6 = sshll.u32 %s6746_s16, 2  ;;  %s6659_s26 = scalar_lea.hbm %s10257_s3, 12 }
  0x15   : > { %s6783_s28 = scalar_select %p175_p10, %s6746_s16, 2  ;;  %v6786_v5 = vshrl.u32 %v10258_v0, 7  ;;  %v6788_v6 = vand.u32 4294901760, %v412_v3  ;;  %v6794_v8 = vand.u32 4294901760, %v415_v4  ;;  %v418_v50 = vsel %vm410_vm0, %v185_v38, 0 }
  0x16   : > { %v6996_v61 = vand.u32 4294901760, %v418_v50  ;;  %s6253_s9 = scalar_lea.hbm %s10257_s3, %s6593_s6 }
  0x17   : > { %10501 = vst [vmem:[#allocation5_spill] sm:$0xff] %v6788_v6  ;;  %s6334_s29 = sshll.u32 %s6783_s28, 2  ;;  %v6792_v7 = vadd.s32 56, %v6786_v5  ;;  %v6804_v9 = vadd.s32 48, %v6786_v5  ;;  %v6807_v10 = vadd.s32 40, %v6786_v5  ;;  %v6810_v11 = vadd.s32 32, %v6786_v5 }
  0x18   : > { %10502 = vst [vmem:[#allocation6_spill] sm:$0xff] %v6794_v8  ;;  %s6801_s5 = scalar_lea.vmem %s10255_s1, %s6334_s29  ;;  %v6813_v12 = vsub.f32 %v412_v3, %v6788_v6  ;;  %v6819_v14 = vadd.s32 24, %v6786_v5  ;;  %v6825_v16 = vadd.s32 16, %v6786_v5  ;;  %v6828_v17 = vadd.s32 8, %v6786_v5  ;;  %s8423_s4 = scalar_lea.vmem %s10256_s2, %s6334_s29 }
  0x19   : > { %v6816_v13 = vld [vmem:[%s6801_s5] sm:$0xf]  ;;  %v6834_v19 = vsub.f32 %v415_v4, %v6794_v8  ;;  %10508 = vst [vmem:[#allocation12_spill] sm:$0xff] %v6996_v61  ;;  %s172_s28 = sand.u32 1, %s6693_s13   ;;  %s6257_s17 = sshll.u32 %s6253_s9, 4  ;;  %s6258_s17 = int_to_ptr.hbm [resolvable:$true] %s6257_s17 }
  0x1a   : > { %10503 = vst [vmem:[#allocation7_spill] sm:$0xff] %v6813_v12  ;;  %v6822_v15 = vperm.slane %v6816_v13, 0  ;;  %v6831_v18 = vand.u32 4294901760, %v6813_v12  ;;  %v6893_v30 = vperm.slane %v6816_v13, 1  ;;  %s6333_s29 = sshll.u32 %s172_s28, 2  ;;  %s6243_s16 = scalar_lea.sflag [#allocation3], %s172_s28 }
  0x1b   : > { %10505 = vst [vmem:[#allocation9_spill] sm:$0xff] %v6834_v19  ;;  %v6994_v60 = vand.u32 4294901760, %v6834_v19  ;;  %s174_s10 = scalar_lea.vmem [#allocation2], %s6333_s29  ;;  %s6653_s19 = sshra.s32 %s6258_s17, 4  ;;  %s6654_s19 = int_to_ptr.hbm [resolvable:$true] %s6653_s19 }
  0x1c   : > { %10504 = vst [vmem:[#allocation8_spill] sm:$0xff] %v6831_v18  ;;  %vm242_vm1 = vcmp.eq.s32.totalorder %v6792_v7, %v6822_v15  ;;  %vm238_vm2 = vcmp.eq.s32.totalorder %v6804_v9, %v6822_v15  ;;  %vm234_vm3 = vcmp.eq.s32.totalorder %v6807_v10, %v6822_v15  ;;  %vm230_vm4 = vcmp.eq.s32.totalorder %v6810_v11, %v6822_v15  ;;  %s6255_s11 = sshll.u32 %s174_s10, 4  ;;  %s6655_s20 = scalar_lea.hbm %s6654_s19, 4  ;;  %s6256_s11 = int_to_ptr.vmem [resolvable:$true] %s6255_s11 }
  0x1d   : > { %6400 = vmatpush.msk.msra.mxu0 %vm242_vm1, %v10267_v20  ;;  %v6364_v22 = vsel %vm242_vm1, 1.0, %v10265_v21  ;;  %6408 = vmatpush.msk.msra.mxu3 %vm242_vm1, %v10267_v20  ;;  %v6360_v23 = vsel %vm238_vm2, 1.0, %v10265_v21  ;;  %vm226_vm5 = vcmp.eq.s32.totalorder %v6819_v14, %v6822_v15  ;;  %v6356_v24 = vsel %vm234_vm3, 1.0, %v10265_v21  ;;  %10507 = vst [vmem:[#allocation11_spill] sm:$0xff] %v6994_v60  ;;  %p6656_p11 = scmp.ne.s32.totalorder %s6654_s19, %s6655_s20  ;;  %p6660_p0 = scmp.lt.s32.totalorder %s6654_s19, %s10257_s3 }
  0x1e   : > { %v6866_v25 = vsub.f32 %v6364_v22, %v6364_v22  ;;  %v6868_v26 = vsub.f32 %v6360_v23, %v6360_v23  ;;  %v6870_v27 = vsub.f32 %v6356_v24, %v6356_v24  ;;  %vm222_vm6 = vcmp.eq.s32.totalorder %v6825_v16, %v6822_v15  ;;  %p6661_p1 = scmp.lt.s32.totalorder %s6659_s26, %s6655_s20 }
  0x1f   : > { %6401 = vmatpush.msk.msra.mxu0 %vm238_vm2, %v10267_v20  ;;  %6409 = vmatpush.msk.msra.mxu3 %vm238_vm2, %v10267_v20  ;;  %v6352_v28 = vsel %vm230_vm4, 1.0, %v10265_v21  ;;  %vm218_vm7 = vcmp.eq.s32.totalorder %v6828_v17, %v6822_v15  ;;  %v6348_v29 = vsel %vm226_vm5, 1.0, %v10265_v21  ;;  %vm214_vm8 = vcmp.eq.s32.totalorder %v6786_v5, %v6822_v15  ;;  %p6657_p12 = pnand %p6656_p11, %p6763_p5 }
  0x20   : > { %743 = vmatpush.msra.mxu2 %v6866_v25  ;;  %v622_v31 = vand.u32 4294901760, %v6866_v25  ;;  %v628_v32 = vand.u32 4294901760, %v6868_v26  ;;  %v6898_v33 = vsub.f32 %v6352_v28, %v6352_v28  ;;  %v634_v34 = vand.u32 4294901760, %v6870_v27  ;;  %p6662_p2 = por %p6661_p1, %p6660_p0 }
  0x21   : > { %6402 = vmatpush.msk.msra.mxu0 %vm234_vm3, %v10267_v20  ;;  %6410 = vmatpush.msk.msra.mxu3 %vm234_vm3, %v10267_v20  ;;  %v6909_v35 = vsub.f32 %v6348_v29, %v6348_v29  ;;  %v6344_v36 = vsel %vm222_vm6, 1.0, %v10265_v21  ;;  %v6340_v37 = vsel %vm218_vm7, 1.0, %v10265_v21  ;;  %v486_v43 = vsub.f32 %v6813_v12, %v6831_v18  ;;  %p6658_p13 = pneg %p6657_p12 }
  0x22   : > { %746 = vmatpush.msra.mxu2 %v6868_v26  ;;  %v623_v39 = vsub.f32 %v6866_v25, %v622_v31  ;;  %v629_v40 = vsub.f32 %v6868_v26, %v628_v32  ;;  %v635_v41 = vsub.f32 %v6870_v27, %v634_v34  ;;  %v640_v42 = vand.u32 4294901760, %v6898_v33 }
  0x23   : > { %6403 = vmatpush.msk.msra.mxu0 %vm230_vm4, %v10267_v20  ;;  %6411 = vmatpush.msk.msra.mxu3 %vm230_vm4, %v10267_v20  ;;  %v6945_v44 = vsub.f32 %v6344_v36, %v6344_v36  ;;  %v646_v45 = vand.u32 4294901760, %v6909_v35  ;;  %v6948_v46 = vsub.f32 %v6340_v37, %v6340_v37  ;;  %v6336_v53 = vsel %vm214_vm8, 1.0, %v10265_v21  ;;  %p6663_p3 = pnand %p6662_p2, %p6658_p13 }
  0x24   : > { %v624_v47 = vand.u32 4294901760, %v623_v39  ;;  %749 = vmatpush.msra.mxu2 %v6870_v27  ;;  %v630_v48 = vand.u32 4294901760, %v629_v40  ;;  %v641_v49 = vsub.f32 %v6898_v33, %v640_v42  ;;  %v636_v51 = vand.u32 4294901760, %v635_v41 }
  0x25   : > { %6404 = vmatpush.msk.msra.mxu0 %vm226_vm5, %v10267_v20  ;;  %6412 = vmatpush.msk.msra.mxu3 %vm226_vm5, %v10267_v20  ;;  %v652_v52 = vand.u32 4294901760, %v6945_v44  ;;  %vm243_vm9 = vcmp.eq.s32.totalorder %v6792_v7, %v6893_v30  ;;  %v647_v54 = vsub.f32 %v6909_v35, %v646_v45  ;;  %v6974_v55 = vsub.f32 %v6336_v53, %v6336_v53  ;;  %v187_v53 = vld [vmem:[%s10254_s0 + $0x20] sm:$0xff] }
  0x26   : > { %625 = vmatpush.msra.mxu1 %v624_v47  ;;  %752 = vmatpush.msra.mxu2 %v6898_v33  ;;  %v658_v56 = vand.u32 4294901760, %v6948_v46  ;;  %v6365_v57 = vsel %vm243_vm9, 1.0, %v10265_v21  ;;  %v6985_v58 = vand.u32 4294901760, %v486_v43  ;;  %v642_v62 = vand.u32 4294901760, %v641_v49  ;;  %v188_v33 = vld [vmem:[%s10254_s0 + $0x28] sm:$0xff] }
  0x27   : > { %6405 = vmatpush.msk.msra.mxu0 %vm222_vm6, %v10267_v20  ;;  %6413 = vmatpush.msk.msra.mxu3 %vm222_vm6, %v10267_v20  ;;  %v6991_v59 = vsub.f32 %v6365_v57, %v6365_v57  ;;  %v653_v63 = vsub.f32 %v6945_v44, %v652_v52  ;;  %v664_v1 = vand.u32 4294901760, %v6974_v55  ;;  %vm239_vm10 = vcmp.eq.s32.totalorder %v6804_v9, %v6893_v30 }
  0x28   : > { %10506 = vst [vmem:[#allocation10_spill] sm:$0xff] %v6985_v58  ;;  %631 = vmatpush.msra.mxu1 %v630_v48  ;;  %755 = vmatpush.msra.mxu2 %v6909_v35  ;;  %v6361_v4 = vsel %vm239_vm10, 1.0, %v10265_v21  ;;  %v648_v22 = vand.u32 4294901760, %v647_v54  ;;  %v659_v23 = vsub.f32 %v6948_v46, %v658_v56  ;;  %v7039_v29 = vsub.f32 %v418_v50, %v6996_v61 }
  0x29   : > { %6406 = vmatpush.msk.msra.mxu0 %vm218_vm7, %v10267_v20  ;;  %6414 = vmatpush.msk.msra.mxu3 %vm218_vm7, %v10267_v20  ;;  %v10263_v3 = vand.u32 4294901760, %v6991_v59  ;;  %v7025_v24 = vsub.f32 %v6361_v4, %v6361_v4  ;;  %v421_v36 = vsel %vm410_vm0, %v186_v2, 0  ;;  %v654_v37 = vand.u32 4294901760, %v653_v63 }
  0x2a   : > { %637 = vmatpush.msra.mxu1 %v636_v51  ;;  %758 = vmatpush.msra.mxu2 %v6945_v44  ;;  %10509 = vst [vmem:[#allocation13_spill] sm:$0xff] %v7039_v29  ;;  %v494_v38 = vsub.f32 %v6834_v19, %v6994_v60  ;;  %v665_v39 = vsub.f32 %v6974_v55, %v664_v1  ;;  %v660_v43 = vand.u32 4294901760, %v659_v23  ;;  %v7058_v48 = vand.u32 4294901760, %v7039_v29 }
  0x2b   : > { %6407 = vmatpush.msk.msra.mxu0 %vm214_vm8, %v10267_v20  ;;  %6415 = vmatpush.msk.msra.mxu3 %vm214_vm8, %v10267_v20  ;;  %v1325_v28 = vsub.f32 %v6991_v59, %v10263_v3  ;;  %v10262_v40 = vand.u32 4294901760, %v7025_v24  ;;  %v7060_v49 = vand.u32 4294901760, %v421_v36  ;;  %vm235_vm11 = vcmp.eq.s32.totalorder %v6807_v10, %v6893_v30 }
  0x2c   : > { %488 = vmatmul.f32.vlgmr.msra.gmra.mxu0 %v6985_v58  ;;  %643 = vmatpush.msra.mxu1 %v642_v62  ;;  %10510 = vst [vmem:[#allocation14_spill] sm:$0xff] %v7058_v48  ;;  %v7063_v50 = vand.u32 4294901760, %v494_v38  ;;  %v666_v51 = vand.u32 4294901760, %v665_v39  ;;  %v502_v26 = vsub.f32 %v7039_v29, %v7058_v48  ;;  %v424_v62 = vsel %vm410_vm0, %v187_v53, 0 }
  0x2d   : > { %761 = vmatpush.msra.mxu2 %v6948_v46  ;;  %873 = vmatmul.f32.vlgmr.msra.gmra.mxu3 %v6831_v18  ;;  %v1326_v41 = vand.u32 4294901760, %v1325_v28  ;;  %v1331_v47 = vsub.f32 %v7025_v24, %v10262_v40  ;;  %10511 = vst [vmem:[#allocation15_spill] sm:$0xff] %v7060_v49  ;;  %v7121_v2 = vand.u32 4294901760, %v424_v62  ;;  %v427_v44 = vsel %vm410_vm0, %v188_v33, 0 }
  0x2e   : > { %649 = vmatpush.msra.mxu1 %v648_v22  ;;  %978 = vmatpush.msrb.mxu0 %v622_v31  ;;  %10512 = vst [vmem:[#allocation16_spill] sm:$0xff] %v7063_v50  ;;  %v6357_v31 = vsel %vm235_vm11, 1.0, %v10265_v21  ;;  %v7159_v22 = vand.u32 4294901760, %v427_v44  ;;  %vm231_vm12 = vcmp.eq.s32.totalorder %v6810_v11, %v6893_v30  ;;  %vm227_vm13 = vcmp.eq.s32.totalorder %v6819_v14, %v6893_v30 }
  0x2f   : > { %764 = vmatpush.msra.mxu2 %v6974_v55  ;;  %1327 = vmatpush.msrb.mxu3 %v1326_v41  ;;  %v1332_v25 = vand.u32 4294901760, %v1331_v47  ;;  %v7080_v54 = vsub.f32 %v6357_v31, %v6357_v31  ;;  %10516 = vst [vmem:[#allocation20_spill] sm:$0xff] %v7121_v2  ;;  %v7138_v35 = vsub.f32 %v424_v62, %v7121_v2  ;;  %v6353_v46 = vsel %vm231_vm12, 1.0, %v10265_v21 }
  0x30   : > { %655 = vmatpush.msra.mxu1 %v654_v37  ;;  %767 = vmatmul.f32.vlgmr.msra.gmra.mxu2 %v6813_v12  ;;  %10520 = vst [vmem:[#allocation24_spill] sm:$0xff] %v7159_v22  ;;  %v7180_v23 = vsub.f32 %v6353_v46, %v6353_v46  ;;  %v7191_v55 = vsub.f32 %v427_v44, %v7159_v22  ;;  %v6349_v62 = vsel %vm227_vm13, 1.0, %v10265_v21 }
  0x31   : > { %6424 = vmatpush.msk.msrb.mxu2 %vm243_vm9, %v10267_v20  ;;  %982 = vmatpush.msrb.mxu0 %v628_v32  ;;  %v7092_v32 = vsub.f32 %v421_v36, %v7060_v49  ;;  %v10261_v57 = vand.u32 4294901760, %v7080_v54  ;;  %10517 = vst [vmem:[#allocation21_spill] sm:$0xff] %v7138_v35  ;;  %vm223_vm14 = vcmp.eq.s32.totalorder %v6825_v16, %v6893_v30 }
  0x32   : > { %661 = vmatpush.msra.mxu1 %v660_v43  ;;  %1333 = vmatpush.msrb.mxu3 %v1332_v25  ;;  %10521 = vst [vmem:[#allocation25_spill] sm:$0xff] %v7191_v55  ;;  %v7213_v38 = vand.u32 4294901760, %v7191_v55  ;;  %v190_v43 = vld [vmem:[%s10254_s0 + $0x38] sm:$0xff]  ;;  %vm219_vm15 = vcmp.eq.s32.totalorder %v6828_v17, %v6893_v30 }
  0x33   : > { %6425 = vmatpush.msk.msrb.mxu2 %vm239_vm10, %v10267_v20  ;;  %986 = vmatpush.msrb.mxu0 %v634_v34  ;;  %10513 = vst [vmem:[#allocation17_spill] sm:$0xff] %v7092_v32  ;;  %v1337_v27 = vsub.f32 %v7080_v54, %v10261_v57  ;;  %v7112_v34 = vand.u32 4294901760, %v502_v26  ;;  %v7115_v63 = vand.u32 4294901760, %v7092_v32  ;;  %v433_v25 = vsel %vm410_vm0, %v190_v43, 0  ;;  %v192_v43 = vld [vmem:[%s10254_s0 + $0x48] sm:$0xff] }
  0x34   : > { %496 = vmatmul.f32.gmra.mxu0 %v7063_v50  ;;  %667 = vmatpush.msra.mxu1 %v666_v51  ;;  %10523 = vst [vmem:[#allocation27_spill] sm:$0xff] %v7213_v38  ;;  %v526_v47 = vsub.f32 %v7191_v55, %v7213_v38  ;;  %v7249_v26 = vand.u32 4294901760, %v433_v25 }
  0x35   : > { %669 = vmatmul.f32.vlgmr.msra.gmra.mxu1 %v6788_v6  ;;  %879 = vmatmul.f32.gmra.mxu3 %v6994_v60  ;;  %10514 = vst [vmem:[#allocation18_spill] sm:$0xff] %v7112_v34  ;;  %v1338_v4 = vand.u32 4294901760, %v1337_v27  ;;  %v191_v27 = vld [vmem:[%s10254_s0 + $0x40] sm:$0xff]  ;;  %v10557_v60 = vand.u32 4294901760, %v7180_v23 }
  0x36   : > { %6416 = vmatpush.msk.msrb.mxu1 %vm242_vm1, %v10267_v20  ;;  %6426 = vmatpush.msk.msrb.mxu2 %vm235_vm11, %v10267_v20  ;;  %10515 = vst [vmem:[#allocation19_spill] sm:$0xff] %v7115_v63  ;;  %v7244_v31 = vand.u32 4294901760, %v526_v47  ;;  %v436_v46 = vsel %vm410_vm0, %v191_v27, 0  ;;  %vm215_vm1 = vcmp.eq.s32.totalorder %v6786_v5, %v6893_v30 }
  0x37   : > { %990 = vmatpush.msrb.mxu0 %v640_v42  ;;  %1339 = vmatpush.msrb.mxu3 %v1338_v4  ;;  %v510_v42 = vsub.f32 %v7092_v32, %v7115_v63  ;;  %10528 = vst [vmem:[#allocation32_spill] sm:$0xff] %v7249_v26  ;;  %v7268_v4 = vsub.f32 %v6349_v62, %v6349_v62  ;;  %v439_v62 = vsel %vm410_vm0, %v192_v43, 0 }
  0x38   : > { %772 = vmatmul.f32.gmra.mxu2 %v6834_v19  ;;  %6417 = vmatpush.msk.msrb.mxu1 %vm238_vm2, %v10267_v20  ;;  %10526 = vst [vmem:[#allocation30_spill] sm:$0xff] %v7244_v31 }
  0x39   : > { %994 = vmatpush.msrb.mxu0 %v646_v45  ;;  %v7154_v45 = vand.u32 4294901760, %v510_v42  ;;  %6427 = vmatpush.msk.msrb.mxu2 %vm231_vm12, %v10267_v20  ;;  %v7274_v42 = vsub.f32 %v433_v25, %v7249_v26  ;;  %v10259_v44 = vand.u32 4294901760, %v7268_v4 }
  0x3a   : > { %6418 = vmatpush.msk.msrb.mxu1 %vm234_vm3, %v10267_v20 }
  0x3b   : > { %998 = vmatpush.msrb.mxu0 %v652_v52  ;;  %10518 = vst [vmem:[#allocation22_spill] sm:$0xff] %v7154_v45  ;;  %v7157_v52 = vand.u32 4294901760, %v7138_v35  ;;  %6428 = vmatpush.msk.msrb.mxu2 %vm227_vm13, %v10267_v20 }
  0x3c   : > { %504 = vmatmul.f32.gmra.mxu0 %v7112_v34  ;;  %6419 = vmatpush.msk.msrb.mxu1 %vm230_vm4, %v10267_v20  ;;  %10529 = vst [vmem:[#allocation33_spill] sm:$0xff] %v7274_v42 }
  0x3d   : > { %673 = vmatmul.f32.gmra.mxu1 %v6794_v8  ;;  %885 = vmatmul.f32.gmra.mxu3 %v7058_v48  ;;  %10519 = vst [vmem:[#allocation23_spill] sm:$0xff] %v7157_v52  ;;  %v518_v28 = vsub.f32 %v7138_v35, %v7157_v52  ;;  %v10552_v48 = vand.u32 4294901760, %v7025_v24 }
  0x3e   : > { %6420 = vmatpush.msk.msrb.mxu1 %vm226_vm5, %v10267_v20  ;;  %1002 = vmatpush.msrb.mxu0 %v658_v56  ;;  %v189_v56 = vld [vmem:[%s10254_s0 + $0x30] sm:$0xff] }
  0x3f   : > { %v430_v36 = vsel %vm410_vm0, %v189_v56, 0  ;;  %v7210_v15 = vand.u32 4294901760, %v518_v28  ;;  %v1349_v56 = vsub.f32 %v7268_v4, %v10259_v44  ;;  %6429 = vmatpush.msk.msrb.mxu2 %vm223_vm14, %v10267_v20 }
  0x40   : > { %777 = vmatmul.f32.gmra.mxu2 %v7039_v29  ;;  %6421 = vmatpush.msk.msrb.mxu1 %vm222_vm6, %v10267_v20  ;;  %v7215_v39 = vand.u32 4294901760, %v430_v36 }
  0x41   : > { %1006 = vmatpush.msrb.mxu0 %v664_v1  ;;  %v10260_v1 = vand.u32 4294901760, %v7180_v23  ;;  %10522 = vst [vmem:[#allocation26_spill] sm:$0xff] %v7210_v15 }
  0x42   : > { %6422 = vmatpush.msk.msrb.mxu1 %vm218_vm7, %v10267_v20  ;;  %10524 = vst [vmem:[#allocation28_spill] sm:$0xff] %v7215_v39  ;;  %v7234_v51 = vsub.f32 %v430_v36, %v7215_v39  ;;  %v7288_v36 = vand.u32 4294901760, %v7274_v42 }
  0x43   : > { %1445 = vmatpush.msra.mxu0 %v6991_v59  ;;  %v1343_v37 = vsub.f32 %v7180_v23, %v10260_v1 }
  0x44   : > { %512 = vmatmul.f32.gmra.mxu0 %v7154_v45  ;;  %6423 = vmatpush.msk.msrb.mxu1 %vm214_vm8, %v10267_v20  ;;  %10525 = vst [vmem:[#allocation29_spill] sm:$0xff] %v7234_v51  ;;  %v7247_v53 = vand.u32 4294901760, %v7234_v51  ;;  %v542_v47 = vsub.f32 %v7274_v42, %v7288_v36 }
  0x45   : > { %677 = vmatmul.f32.gmra.mxu1 %v6996_v61  ;;  %891 = vmatmul.f32.gmra.mxu3 %v7115_v63  ;;  %v1344_v41 = vand.u32 4294901760, %v1343_v37  ;;  %10531 = vst [vmem:[#allocation35_spill] sm:$0xff] %v7288_v36  ;;  %v7290_v37 = vand.u32 4294901760, %v436_v46 }
  0x46   : > { %6432 = vmatpush.msk.msra.mxu1 %vm243_vm9, %v10267_v20  ;;  %1448 = vmatpush.msra.mxu0 %v7025_v24  ;;  %10527 = vst [vmem:[#allocation31_spill] sm:$0xff] %v7247_v53  ;;  %v534_v33 = vsub.f32 %v7234_v51, %v7247_v53  ;;  %v7305_v27 = vand.u32 4294901760, %v542_v47 }
  0x47   : > { %1345 = vmatpush.msrb.mxu3 %v1344_v41  ;;  %10532 = vst [vmem:[#allocation36_spill] sm:$0xff] %v7290_v37  ;;  %v1350_v41 = vand.u32 4294901760, %v1349_v56  ;;  %v7299_v25 = vsub.f32 %v436_v46, %v7290_v37  ;;  %v7310_v56 = vand.u32 4294901760, %v439_v62  ;;  %v6345_v46 = vsel %vm223_vm14, 1.0, %v10265_v21 }
  0x48   : > { %782 = vmatmul.f32.gmra.mxu2 %v7092_v32  ;;  %6433 = vmatpush.msk.msra.mxu1 %vm239_vm10, %v10267_v20  ;;  %v7285_v28 = vand.u32 4294901760, %v534_v33  ;;  %10534 = vst [vmem:[#allocation38_spill] sm:$0xff] %v7305_v27  ;;  %v7329_v43 = vsub.f32 %v6345_v46, %v6345_v46 }
  0x49   : > { %1451 = vmatpush.msra.mxu0 %v7080_v54  ;;  %1351 = vmatpush.msrb.mxu3 %v1350_v41  ;;  %10533 = vst [vmem:[#allocation37_spill] sm:$0xff] %v7299_v25  ;;  %v7308_v33 = vand.u32 4294901760, %v7299_v25  ;;  %v193_v41 = vld [vmem:[%s10254_s0 + $0x50] sm:$0xff]  ;;  %v7335_v0 = vsub.f32 %v439_v62, %v7310_v56 }
  0x4a   : > { %6434 = vmatpush.msk.msra.mxu1 %vm235_vm11, %v10267_v20  ;;  %10530 = vst [vmem:[#allocation34_spill] sm:$0xff] %v7285_v28  ;;  %v10264_v44 = vand.u32 4294901760, %v7329_v43  ;;  %v442_v1 = vsel %vm410_vm0, %v193_v41, 0  ;;  %v194_v41 = vld [vmem:[%s10254_s0 + $0x58] sm:$0xff] }
  0x4b   : > { %1454 = vmatpush.msra.mxu0 %v7180_v23  ;;  %10535 = vst [vmem:[#allocation39_spill] sm:$0xff] %v7308_v33  ;;  %v550_v47 = vsub.f32 %v7299_v25, %v7308_v33  ;;  %v7349_v62 = vand.u32 4294901760, %v7335_v0  ;;  %v7351_v40 = vand.u32 4294901760, %v442_v1 }
  0x4c   : > { %520 = vmatmul.f32.gmra.mxu0 %v7210_v15  ;;  %6435 = vmatpush.msk.msra.mxu1 %vm231_vm12, %v10267_v20  ;;  %10536 = vst [vmem:[#allocation40_spill] sm:$0xff] %v7310_v56  ;;  %v1355_v46 = vsub.f32 %v7329_v43, %v10264_v44 }
  0x4d   : > { %681 = vmatmul.f32.gmra.mxu1 %v7060_v49  ;;  %897 = vmatmul.f32.gmra.mxu3 %v7157_v52  ;;  %10537 = vst [vmem:[#allocation41_spill] sm:$0xff] %v7335_v0  ;;  %v7346_v57 = vand.u32 4294901760, %v550_v47  ;;  %v558_v44 = vsub.f32 %v7335_v0, %v7349_v62  ;;  %v7360_v21 = vsub.f32 %v442_v1, %v7351_v40  ;;  %v445_v47 = vsel %vm410_vm0, %v194_v41, 0 }
  0x4e   : > { %6436 = vmatpush.msk.msra.mxu1 %vm227_vm13, %v10267_v20  ;;  %1457 = vmatpush.msra.mxu0 %v7268_v4  ;;  %10539 = vst [vmem:[#allocation43_spill] sm:$0xff] %v7349_v62  ;;  %v1356_v3 = vand.u32 4294901760, %v1355_v46  ;;  %v10545_v1 = vmov 1.0  }
  0x4f   : > { %10538 = vst [vmem:[#allocation42_spill] sm:$0xff] %v7346_v57  ;;  %v7369_v46 = vand.u32 4294901760, %v7360_v21  ;;  %6430 = vmatpush.msk.msrb.mxu2 %vm219_vm15, %v10545_v1 }
  0x50   : > { %787 = vmatmul.f32.gmra.mxu2 %v7138_v35  ;;  %6437 = vmatpush.msk.msra.mxu1 %vm223_vm14, %v10267_v20  ;;  %10540 = vst [vmem:[#allocation44_spill] sm:$0xff] %v7351_v40  ;;  %v7371_v20 = vand.u32 4294901760, %v445_v47 }
  0x51   : > { %1460 = vmatpush.msra.mxu0 %v7329_v43  ;;  %1357 = vmatpush.msrb.mxu3 %v1356_v3  ;;  %10541 = vst [vmem:[#allocation45_spill] sm:$0xff] %v7360_v21  ;;  %v7366_v3 = vand.u32 4294901760, %v558_v44  ;;  %v195_v44 = vld [vmem:[%s10254_s0 + $0x60] sm:$0xff] }
  0x52   : > { %10543 = vst [vmem:[#allocation47_spill] sm:$0xff] %v7369_v46  ;;  %6438 = vmatpush.msk.msra.mxu1 %vm219_vm15, %v10545_v1  ;;  %6431 = vmatpush.msk.msrb.mxu2 %vm215_vm1, %v10545_v1 }
  0x53   : > { %10542 = vst [vmem:[#allocation46_spill] sm:$0xff] %v7366_v3 }
  0x54   : > { %528 = vmatmul.f32.gmra.mxu0 %v7244_v31  ;;  %10544 = vst [vmem:[#allocation48_spill] sm:$0xff] %v7371_v20  ;;  %6439 = vmatpush.msk.msra.mxu1 %vm215_vm1, %v10545_v1 }
  0x55   : > { %685 = vmatmul.f32.gmra.mxu1 %v7121_v2  ;;  %903 = vmatmul.f32.gmra.mxu3 %v7213_v38  ;;  %v448_v38 = vsel %vm410_vm0, %v195_v44, 0  ;;  %v196_v44 = vld [vmem:[%s10254_s0 + $0x68] sm:$0xff] }
  0x56   : > { %v7412_v52 = vand.u32 4294901760, %v448_v38 }
  0x58   : > { %792 = vmatmul.f32.gmra.mxu2 %v7191_v55 }
  0x5c   : > { %536 = vmatmul.f32.gmra.mxu0 %v7285_v28 }
  0x5d   : > { %689 = vmatmul.f32.gmra.mxu1 %v7159_v22  ;;  %909 = vmatmul.f32.gmra.mxu3 %v7247_v53  ;;  %v7396_v53 = vsub.f32 %v445_v47, %v7371_v20 }
  0x5f   : > { %10547 = vst [vmem:[#allocation49_spill] sm:$0xff] %v7396_v53  ;;  %v7410_v47 = vand.u32 4294901760, %v7396_v53 }
  0x60   : > { %797 = vmatmul.f32.gmra.mxu2 %v7234_v51 }
  0x61   : > { %10549 = vst [vmem:[#allocation51_spill] sm:$0xff] %v7410_v47 }
  0x64   : > { %544 = vmatmul.f32.gmra.mxu0 %v7305_v27 }
  0x65   : > { %693 = vmatmul.f32.gmra.mxu1 %v7215_v39  ;;  %915 = vmatmul.f32.gmra.mxu3 %v7288_v36 }
  0x68   : > { %802 = vmatmul.f32.gmra.mxu2 %v7274_v42 }
  0x6c   : > { %552 = vmatmul.f32.gmra.mxu0 %v7346_v57 }
  0x6d   : > { %697 = vmatmul.f32.gmra.mxu1 %v7249_v26  ;;  %921 = vmatmul.f32.gmra.mxu3 %v7308_v33  ;;  %v10546_v33 = vmov 0.0  }
  0x6e   : > { %v6341_v41 = vsel %vm219_vm15, 1.0, %v10546_v33 }
  0x6f   : > { %v7390_v36 = vsub.f32 %v6341_v41, %v6341_v41 }
  0x70   : > { %807 = vmatmul.f32.gmra.mxu2 %v7299_v25  ;;  %v566_v25 = vsub.f32 %v7360_v21, %v7369_v46 }
  0x71   : > { %v10287_v42 = vand.u32 4294901760, %v7390_v36  ;;  %1463 = vmatpush.msra.mxu0 %v7390_v36 }
  0x72   : > { %v7407_v51 = vand.u32 4294901760, %v566_v25  ;;  %v451_v25 = vsel %vm410_vm0, %v196_v44, 0 }
  0x73   : > { %v1361_v41 = vsub.f32 %v7390_v36, %v10287_v42  ;;  %v574_v42 = vsub.f32 %v7396_v53, %v7410_v47 }
  0x74   : > { %560 = vmatmul.f32.gmra.mxu0 %v7366_v3  ;;  %10548 = vst [vmem:[#allocation50_spill] sm:$0xff] %v7407_v51 }
  0x75   : > { %701 = vmatmul.f32.gmra.mxu1 %v7290_v37  ;;  %927 = vmatmul.f32.gmra.mxu3 %v7349_v62  ;;  %v1362_v55 = vand.u32 4294901760, %v1361_v41  ;;  %v7421_v62 = vsub.f32 %v448_v38, %v7412_v52  ;;  %v6337_v38 = vsel %vm215_vm1, 1.0, %v10546_v33 }
  0x76   : > { %v1365_v44 = vsub.f32 %v6337_v38, %v6337_v38 }
  0x77   : > { %1363 = vmatpush.msrb.mxu3 %v1362_v55  ;;  %v7427_v55 = vand.u32 4294901760, %v574_v42  ;;  %v7430_v41 = vand.u32 4294901760, %v7421_v62  ;;  %v197_v42 = vld [vmem:[%s10254_s0 + $0x70] sm:$0xff] }
  0x78   : > { %812 = vmatmul.f32.gmra.mxu2 %v7335_v0  ;;  %v7432_v0 = vand.u32 4294901760, %v451_v25  ;;  %v1366_v35 = vand.u32 4294901760, %v1365_v44  ;;  %v454_v38 = vsel %vm410_vm0, %v197_v42, 0  ;;  %1466 = vmatpush.msra.mxu0 %v1365_v44 }
  0x79   : > { %10550 = vst [vmem:[#allocation52_spill] sm:$0xff] %v7427_v55  ;;  %v7472_v24 = vand.u32 4294901760, %v454_v38 }
  0x7a   : > { %v7457_v63 = vsub.f32 %v451_v25, %v7432_v0 }
  0x7b   : > { %10556 = vst [vmem:[#allocation55_spill] sm:$0xff] %v7472_v24 }
  0x7c   : > { %568 = vmatmul.f32.gmra.mxu0 %v7407_v51  ;;  %v7470_v25 = vand.u32 4294901760, %v7457_v63 }
  0x7d   : > { %705 = vmatmul.f32.gmra.mxu1 %v7310_v56  ;;  %933 = vmatmul.f32.gmra.mxu3 %v7369_v46  ;;  %v10551_v46 = vand.u32 4294901760, %v6991_v59  ;;  %v1367_v59 = vsub.f32 %v1365_v44, %v1366_v35 }
  0x7e   : > { %10555 = vst [vmem:[#allocation54_spill] sm:$0xff] %v7470_v25  ;;  %v590_v42 = vsub.f32 %v7457_v63, %v7470_v25 }
  0x7f   : > { %1680 = vmatpush.msra.mxu2 %v10551_v46  ;;  %v10553_v46 = vand.u32 4294901760, %v7080_v54  ;;  %v198_v54 = vld [vmem:[%s10254_s0 + $0x78] sm:$0xff] }
  0x80   : > { %817 = vmatmul.f32.gmra.mxu2 %v7360_v21  ;;  %v582_v21 = vsub.f32 %v7421_v62, %v7430_v41  ;;  %v457_v23 = vsel %vm410_vm0, %v198_v54, 0  ;;  %v7501_v44 = vand.u32 4294901760, %v590_v42 }
  0x81   : > { %1684 = vmatpush.msra.mxu2 %v10552_v48  ;;  %v1368_v48 = vand.u32 4294901760, %v1367_v59  ;;  %v7506_v59 = vand.u32 4294901760, %v457_v23 }
  0x82   : > { %v7467_v32 = vand.u32 4294901760, %v582_v21  ;;  %v10558_v21 = vand.u32 4294901760, %v7268_v4  ;;  %v10560_v4 = vand.u32 4294901760, %v7329_v43  ;;  %10561 = vst [vmem:[#allocation57_spill] sm:$0xff] %v7501_v44 }
  0x83   : > { %1688 = vmatpush.msra.mxu2 %v10553_v46  ;;  %1369 = vmatpush.msrb.mxu3 %v1368_v48  ;;  %10563 = vst [vmem:[#allocation59_spill] sm:$0xff] %v7506_v59  ;;  %v10564_v46 = vand.u32 4294901760, %v7390_v36  ;;  %v7522_v48 = vsub.f32 %v457_v23, %v7506_v59 }
  0x84   : > { %576 = vmatmul.f32.gmra.mxu0 %v7427_v55  ;;  %10554 = vst [vmem:[#allocation53_spill] sm:$0xff] %v7467_v32 }
  0x85   : > { %709 = vmatmul.f32.gmra.mxu1 %v7351_v40  ;;  %939 = vmatmul.f32.gmra.mxu3 %v7410_v47  ;;  %10565 = vst [vmem:[#allocation60_spill] sm:$0xff] %v7522_v48  ;;  %v7538_v36 = vand.u32 4294901760, %v7522_v48 }
  0x86   : > { %1692 = vmatpush.msra.mxu2 %v10557_v60  ;;  %6440 = vmatpush.msk.msra.mxu3 %vm243_vm9, %v10545_v1  ;;  %v7489_v60 = vsub.f32 %v454_v38, %v7472_v24 }
  0x87   : > { %10567 = vst [vmem:[#allocation62_spill] sm:$0xff] %v7538_v36  ;;  %v606_v54 = vsub.f32 %v7522_v48, %v7538_v36 }
  0x88   : > { %822 = vmatmul.f32.gmra.mxu2 %v7396_v53  ;;  %10559 = vst [vmem:[#allocation56_spill] sm:$0xff] %v7489_v60  ;;  %6441 = vmatpush.msk.msra.mxu3 %vm239_vm10, %v10545_v1  ;;  %v7504_v38 = vand.u32 4294901760, %v7489_v60 }
  0x89   : > { %1696 = vmatpush.msra.mxu2 %v10558_v21  ;;  %v7554_v21 = vand.u32 4294901760, %v606_v54 }
  0x8a   : > { %10562 = vst [vmem:[#allocation58_spill] sm:$0xff] %v7504_v38  ;;  %6442 = vmatpush.msk.msra.mxu3 %vm235_vm11, %v10545_v1  ;;  %v598_v43 = vsub.f32 %v7489_v60, %v7504_v38 }
  0x8b   : > { %1700 = vmatpush.msra.mxu2 %v10560_v4  ;;  %10568 = vst [vmem:[#allocation63_spill] sm:$0xff] %v7554_v21 }
  0x8c   : > { %584 = vmatmul.f32.gmra.mxu0 %v7467_v32  ;;  %6443 = vmatpush.msk.msra.mxu3 %vm231_vm12, %v10545_v1 }
  0x8d   : > { %713 = vmatmul.f32.gmra.mxu1 %v7371_v20  ;;  %945 = vmatmul.f32.gmra.mxu3 %v7430_v41 }
  0x8e   : > { %1704 = vmatpush.msra.mxu2 %v10564_v46  ;;  %6444 = vmatpush.msk.msra.mxu3 %vm227_vm13, %v10545_v1 }
  0x90   : > { %827 = vmatmul.f32.gmra.mxu2 %v7421_v62  ;;  %6445 = vmatpush.msk.msra.mxu3 %vm223_vm14, %v10545_v1 }
  0x91   : > { %1708 = vmatpush.msra.mxu2 %v1366_v35  ;;  %v7535_v35 = vand.u32 4294901760, %v598_v43 }
  0x92   : > { %6446 = vmatpush.msk.msra.mxu3 %vm219_vm15, %v10545_v1 }
  0x93   : > { %10566 = vst [vmem:[#allocation61_spill] sm:$0xff] %v7535_v35 }
  0x94   : > { %592 = vmatmul.f32.gmra.mxu0 %v7501_v44  ;;  %6447 = vmatpush.msk.msra.mxu3 %vm215_vm1, %v10545_v1 }
  0x95   : > { %717 = vmatmul.f32.gmra.mxu1 %v7412_v52  ;;  %951 = vmatmul.f32.gmra.mxu3 %v7470_v25 }
  0x98   : > { %832 = vmatmul.f32.gmra.mxu2 %v7457_v63 }
  0x9c   : > { %600 = vmatmul.f32.gmra.mxu0 %v7535_v35 }
  0x9d   : > { %721 = vmatmul.f32.gmra.mxu1 %v7432_v0  ;;  %957 = vmatmul.f32.gmra.mxu3 %v7504_v38 }
  0xa0   : > { %837 = vmatmul.f32.gmra.mxu2 %v7489_v60 }
  0xa4   : > { %608 = vmatmul.f32.gmra.mxu0 %v7554_v21 }
  0xa5   : > { %725 = vmatmul.f32.gmra.mxu1 %v7472_v24  ;;  %963 = vmatmul.f32.gmra.mxu3 %v7538_v36 }
  0xa8   : > { %842 = vmatmul.f32.gmra.mxu2 %v7522_v48 }
  0xa9   : > { %v489_v30 = vpop.f32.mrf.mxu0 }
  0xac   : > { %1008 = vmatmul.f32.vlgmr.msrb.gmra.mxu0 %v6788_v6 }
  0xad   : > { %729 = vmatmul.f32.gmra.mxu1 %v7506_v59  ;;  %1371 = vmatmul.f32.vlgmr.msrb.gmra.mxu3 %v6788_v6 }
  0xb0   : > { %1190 = vmatmul.f32.vlgmr.msrb.gmra.mxu2 %v6985_v58  ;;  %v874_v42 = vpop.f32.mrf.mxu3 }
  0xb1   : > { %v497_v23 = vpop.f32.mrf.mxu0 }
  0xb2   : > { %v670_v4 = vpop.f32.mrf.mxu1 }
  0xb3   : > { %v671_v46 = vadd.f32 %v670_v4, %v489_v30  ;;  %v768_v43 = vpop.f32.mrf.mxu2 }
  0xb4   : > { %1012 = vmatmul.f32.gmra.mxu0 %v6794_v8 }
  0xb5   : > { %v769_v54 = vadd.f32 %v768_v43, %v671_v46  ;;  %1097 = vmatmul.f32.vlgmr.msrb.gmra.mxu1 %v6788_v6  ;;  %1375 = vmatmul.f32.gmra.mxu3 %v6794_v8 }
  0xb7   : > { %v7567_v36 = vadd.f32 %v874_v42, %v769_v54 }
  0xb8   : > { %1198 = vmatmul.f32.gmra.mxu2 %v7063_v50  ;;  %v880_v38 = vpop.f32.mrf.mxu3 }
  0xb9   : > { %10569 = vst [vmem:[#allocation64_spill] sm:$0xff] %v7567_v36  ;;  %v505_v48 = vpop.f32.mrf.mxu0 }
  0xba   : > { %v674_v25 = vpop.f32.mrf.mxu1 }
  0xbb   : > { %v675_v58 = vadd.f32 %v674_v25, %v497_v23  ;;  %v773_v60 = vpop.f32.mrf.mxu2 }
  0xbc   : > { %1016 = vmatmul.f32.gmra.mxu0 %v6996_v61 }
  0xbd   : > { %v774_v30 = vadd.f32 %v773_v60, %v675_v58  ;;  %1101 = vmatmul.f32.gmra.mxu1 %v6794_v8  ;;  %1379 = vmatmul.f32.gmra.mxu3 %v6996_v61 }
  0xbf   : > { %v7573_v4 = vadd.f32 %v880_v38, %v774_v30 }
  0xc0   : > { %1206 = vmatmul.f32.gmra.mxu2 %v7112_v34  ;;  %v886_v42 = vpop.f32.mrf.mxu3 }
  0xc1   : > { %10570 = vst [vmem:[#allocation65_spill] sm:$0xff] %v7573_v4  ;;  %v513_v46 = vpop.f32.mrf.mxu0 }
  0xc2   : > { %v678_v43 = vpop.f32.mrf.mxu1 }
  0xc3   : > { %v679_v54 = vadd.f32 %v678_v43, %v505_v48  ;;  %v778_v36 = vpop.f32.mrf.mxu2 }
  0xc4   : > { %1020 = vmatmul.f32.gmra.mxu0 %v7060_v49 }
  0xc5   : > { %v779_v25 = vadd.f32 %v778_v36, %v679_v54  ;;  %1105 = vmatmul.f32.gmra.mxu1 %v6996_v61  ;;  %1383 = vmatmul.f32.gmra.mxu3 %v7060_v49 }
  0xc7   : > { %v7579_v58 = vadd.f32 %v886_v42, %v779_v25 }
  0xc8   : > { %1214 = vmatmul.f32.gmra.mxu2 %v7154_v45  ;;  %v892_v60 = vpop.f32.mrf.mxu3 }
  0xc9   : > { %10571 = vst [vmem:[#allocation66_spill] sm:$0xff] %v7579_v58  ;;  %v521_v38 = vpop.f32.mrf.mxu0 }
  0xca   : > { %v682_v23 = vpop.f32.mrf.mxu1 }
  0xcb   : > { %v683_v30 = vadd.f32 %v682_v23, %v513_v46  ;;  %v783_v4 = vpop.f32.mrf.mxu2 }
  0xcc   : > { %1024 = vmatmul.f32.gmra.mxu0 %v7121_v2 }
  0xcd   : > { %v784_v48 = vadd.f32 %v783_v4, %v683_v30  ;;  %1109 = vmatmul.f32.gmra.mxu1 %v7060_v49  ;;  %1387 = vmatmul.f32.gmra.mxu3 %v7121_v2 }
  0xcf   : > { %v7585_v36 = vadd.f32 %v892_v60, %v784_v48 }
  0xd0   : > { %1222 = vmatmul.f32.gmra.mxu2 %v7210_v15  ;;  %v898_v42 = vpop.f32.mrf.mxu3 }
  0xd1   : > { %10572 = vst [vmem:[#allocation67_spill] sm:$0xff] %v7585_v36  ;;  %v529_v43 = vpop.f32.mrf.mxu0 }
  0xd2   : > { %v686_v54 = vpop.f32.mrf.mxu1 }
  0xd3   : > { %v687_v25 = vadd.f32 %v686_v54, %v521_v38  ;;  %v788_v58 = vpop.f32.mrf.mxu2 }
  0xd4   : > { %1028 = vmatmul.f32.gmra.mxu0 %v7159_v22 }
  0xd5   : > { %v789_v46 = vadd.f32 %v788_v58, %v687_v25  ;;  %1113 = vmatmul.f32.gmra.mxu1 %v7121_v2  ;;  %1391 = vmatmul.f32.gmra.mxu3 %v7159_v22 }
  0xd7   : > { %v7591_v4 = vadd.f32 %v898_v42, %v789_v46 }
  0xd8   : > { %1230 = vmatmul.f32.gmra.mxu2 %v7244_v31  ;;  %v904_v60 = vpop.f32.mrf.mxu3  ;;  %v10607_v31 = vld [vmem:[#allocation29_spill] sm:$0xff] }
  0xd9   : > { %10573 = vst [vmem:[#allocation68_spill] sm:$0xff] %v7591_v4  ;;  %v537_v23 = vpop.f32.mrf.mxu0 }
  0xda   : > { %v690_v30 = vpop.f32.mrf.mxu1 }
  0xdb   : > { %v691_v48 = vadd.f32 %v690_v30, %v529_v43  ;;  %v793_v36 = vpop.f32.mrf.mxu2 }
  0xdc   : > { %1032 = vmatmul.f32.gmra.mxu0 %v7215_v39 }
  0xdd   : > { %v794_v38 = vadd.f32 %v793_v36, %v691_v48  ;;  %1117 = vmatmul.f32.gmra.mxu1 %v7159_v22  ;;  %1395 = vmatmul.f32.gmra.mxu3 %v7215_v39 }
  0xdf   : > { %v7597_v58 = vadd.f32 %v904_v60, %v794_v38 }
  0xe0   : > { %1238 = vmatmul.f32.gmra.mxu2 %v7285_v28  ;;  %v910_v42 = vpop.f32.mrf.mxu3 }
  0xe1   : > { %10574 = vst [vmem:[#allocation69_spill] sm:$0xff] %v7597_v58  ;;  %v545_v54 = vpop.f32.mrf.mxu0 }
  0xe2   : > { %v694_v25 = vpop.f32.mrf.mxu1 }
  0xe3   : > { %v695_v46 = vadd.f32 %v694_v25, %v537_v23  ;;  %v798_v4 = vpop.f32.mrf.mxu2 }
  0xe4   : > { %1036 = vmatmul.f32.gmra.mxu0 %v7249_v26 }
  0xe5   : > { %v799_v43 = vadd.f32 %v798_v4, %v695_v46  ;;  %1121 = vmatmul.f32.gmra.mxu1 %v7215_v39  ;;  %1399 = vmatmul.f32.gmra.mxu3 %v7249_v26 }
  0xe7   : > { %v7603_v36 = vadd.f32 %v910_v42, %v799_v43 }
  0xe8   : > { %1246 = vmatmul.f32.gmra.mxu2 %v7305_v27  ;;  %v916_v60 = vpop.f32.mrf.mxu3 }
  0xe9   : > { %10575 = vst [vmem:[#allocation70_spill] sm:$0xff] %v7603_v36  ;;  %v553_v30 = vpop.f32.mrf.mxu0 }
  0xea   : > { %v698_v48 = vpop.f32.mrf.mxu1 }
  0xeb   : > { %v699_v38 = vadd.f32 %v698_v48, %v545_v54  ;;  %v803_v58 = vpop.f32.mrf.mxu2 }
  0xec   : > { %1040 = vmatmul.f32.gmra.mxu0 %v7290_v37 }
  0xed   : > { %v804_v23 = vadd.f32 %v803_v58, %v699_v38  ;;  %1125 = vmatmul.f32.gmra.mxu1 %v7249_v26  ;;  %1403 = vmatmul.f32.gmra.mxu3 %v7290_v37 }
  0xef   : > { %v7609_v4 = vadd.f32 %v916_v60, %v804_v23 }
  0xf0   : > { %1254 = vmatmul.f32.gmra.mxu2 %v7346_v57  ;;  %v922_v42 = vpop.f32.mrf.mxu3 }
  0xf1   : > { %10576 = vst [vmem:[#allocation71_spill] sm:$0xff] %v7609_v4  ;;  %v561_v25 = vpop.f32.mrf.mxu0 }
  0xf2   : > { %v702_v46 = vpop.f32.mrf.mxu1 }
  0xf3   : > { %v703_v43 = vadd.f32 %v702_v46, %v553_v30  ;;  %v808_v36 = vpop.f32.mrf.mxu2 }
  0xf4   : > { %1044 = vmatmul.f32.gmra.mxu0 %v7310_v56 }
  0xf5   : > { %v809_v54 = vadd.f32 %v808_v36, %v703_v43  ;;  %1129 = vmatmul.f32.gmra.mxu1 %v7290_v37  ;;  %1407 = vmatmul.f32.gmra.mxu3 %v7310_v56 }
  0xf7   : > { %v7615_v58 = vadd.f32 %v922_v42, %v809_v54 }
  0xf8   : > { %1262 = vmatmul.f32.gmra.mxu2 %v7366_v3  ;;  %v928_v60 = vpop.f32.mrf.mxu3  ;;  %v10598_v3 = vld [vmem:[#allocation19_spill] sm:$0xff] }
  0xf9   : > { %10577 = vst [vmem:[#allocation72_spill] sm:$0xff] %v7615_v58  ;;  %v569_v48 = vpop.f32.mrf.mxu0 }
  0xfa   : > { %v706_v38 = vpop.f32.mrf.mxu1 }
  0xfb   : > { %v707_v23 = vadd.f32 %v706_v38, %v561_v25  ;;  %v813_v4 = vpop.f32.mrf.mxu2 }
  0xfc   : > { %1048 = vmatmul.f32.gmra.mxu0 %v7351_v40 }
  0xfd   : > { %v814_v30 = vadd.f32 %v813_v4, %v707_v23  ;;  %1133 = vmatmul.f32.gmra.mxu1 %v7310_v56  ;;  %1411 = vmatmul.f32.gmra.mxu3 %v7351_v40 }
  0xff   : > { %v7621_v36 = vadd.f32 %v928_v60, %v814_v30 }
 0x100   : > { %1270 = vmatmul.f32.gmra.mxu2 %v7407_v51  ;;  %v934_v42 = vpop.f32.mrf.mxu3  ;;  %v10597_v51 = vld [vmem:[#allocation21_spill] sm:$0xff] }
 0x101   : > { %10578 = vst [vmem:[#allocation73_spill] sm:$0xff] %v7621_v36  ;;  %v577_v46 = vpop.f32.mrf.mxu0 }
 0x102   : > { %v710_v43 = vpop.f32.mrf.mxu1 }
 0x103   : > { %v711_v54 = vadd.f32 %v710_v43, %v569_v48  ;;  %v818_v58 = vpop.f32.mrf.mxu2 }
 0x104   : > { %1052 = vmatmul.f32.gmra.mxu0 %v7371_v20 }
 0x105   : > { %v819_v25 = vadd.f32 %v818_v58, %v711_v54  ;;  %1137 = vmatmul.f32.gmra.mxu1 %v7351_v40  ;;  %1415 = vmatmul.f32.gmra.mxu3 %v7371_v20  ;;  %v7634_v58 = vperm.slane %v6816_v13, 2 }
 0x107   : > { %v7627_v4 = vadd.f32 %v934_v42, %v819_v25  ;;  %vm244_vm0 = vcmp.eq.s32.totalorder %v6792_v7, %v7634_v58  ;;  %vm240_vm2 = vcmp.eq.s32.totalorder %v6804_v9, %v7634_v58  ;;  %vm236_vm3 = vcmp.eq.s32.totalorder %v6807_v10, %v7634_v58 }
 0x108   : > { %1278 = vmatmul.f32.gmra.mxu2 %v7427_v55  ;;  %v940_v60 = vpop.f32.mrf.mxu3  ;;  %6448 = vmatpush.msk.msrb.mxu0 %vm244_vm0, %v10545_v1  ;;  %vm232_vm4 = vcmp.eq.s32.totalorder %v6810_v11, %v7634_v58  ;;  %vm228_vm5 = vcmp.eq.s32.totalorder %v6819_v14, %v7634_v58  ;;  %vm224_vm6 = vcmp.eq.s32.totalorder %v6825_v16, %v7634_v58 }
 0x109   : > { %10579 = vst [vmem:[#allocation74_spill] sm:$0xff] %v7627_v4  ;;  %v585_v38 = vpop.f32.mrf.mxu0  ;;  %6456 = vmatpush.msk.msrb.mxu3 %vm244_vm0, %v10545_v1  ;;  %vm220_vm7 = vcmp.eq.s32.totalorder %v6828_v17, %v7634_v58  ;;  %vm216_vm8 = vcmp.eq.s32.totalorder %v6786_v5, %v7634_v58 }
 0x10a   : > { %v714_v23 = vpop.f32.mrf.mxu1  ;;  %6449 = vmatpush.msk.msrb.mxu0 %vm240_vm2, %v10545_v1 }
 0x10b   : > { %v715_v30 = vadd.f32 %v714_v23, %v577_v46  ;;  %v823_v36 = vpop.f32.mrf.mxu2  ;;  %6457 = vmatpush.msk.msrb.mxu3 %vm240_vm2, %v10545_v1 }
 0x10c   : > { %1056 = vmatmul.f32.gmra.mxu0 %v7412_v52 }
 0x10d   : > { %v824_v48 = vadd.f32 %v823_v36, %v715_v30  ;;  %1141 = vmatmul.f32.gmra.mxu1 %v7371_v20  ;;  %1419 = vmatmul.f32.gmra.mxu3 %v7412_v52  ;;  %v6366_v36 = vsel %vm244_vm0, 1.0, %v10546_v33 }
 0x10e   : > { %v7654_v13 = vsub.f32 %v6366_v36, %v6366_v36  ;;  %6450 = vmatpush.msk.msrb.mxu0 %vm236_vm3, %v10545_v1  ;;  %6458 = vmatpush.msk.msrb.mxu3 %vm236_vm3, %v10545_v1 }
 0x10f   : > { %v7636_v43 = vadd.f32 %v940_v60, %v824_v48 }
 0x110   : > { %1286 = vmatmul.f32.gmra.mxu2 %v7467_v32  ;;  %v946_v42 = vpop.f32.mrf.mxu3  ;;  %6451 = vmatpush.msk.msrb.mxu0 %vm232_vm4, %v10545_v1 }
 0x111   : > { %10580 = vst [vmem:[#allocation75_spill] sm:$0xff] %v7636_v43  ;;  %v593_v54 = vpop.f32.mrf.mxu0  ;;  %2147 = vmatpush.msrb.mxu2 %v7654_v13  ;;  %6459 = vmatpush.msk.msrb.mxu3 %vm232_vm4, %v10545_v1 }
 0x112   : > { %v718_v25 = vpop.f32.mrf.mxu1  ;;  %6452 = vmatpush.msk.msrb.mxu0 %vm228_vm5, %v10545_v1 }
 0x113   : > { %v719_v46 = vadd.f32 %v718_v25, %v585_v38  ;;  %v828_v23 = vpop.f32.mrf.mxu2  ;;  %v10320_v38 = vand.u32 4294901760, %v7654_v13  ;;  %6460 = vmatpush.msk.msrb.mxu3 %vm228_vm5, %v10545_v1 }
 0x114   : > { %1060 = vmatmul.f32.gmra.mxu0 %v7432_v0 }
 0x115   : > { %v829_v60 = vadd.f32 %v828_v23, %v719_v46  ;;  %1145 = vmatmul.f32.gmra.mxu1 %v7412_v52  ;;  %1423 = vmatmul.f32.gmra.mxu3 %v7432_v0  ;;  %v2027_v25 = vsub.f32 %v7654_v13, %v10320_v38 }
 0x116   : > { %6453 = vmatpush.msk.msrb.mxu0 %vm224_vm6, %v10545_v1  ;;  %6461 = vmatpush.msk.msrb.mxu3 %vm224_vm6, %v10545_v1 }
 0x117   : > { %v7660_v30 = vadd.f32 %v946_v42, %v829_v60  ;;  %v2028_v46 = vand.u32 4294901760, %v2027_v25 }
 0x118   : > { %1294 = vmatmul.f32.gmra.mxu2 %v7501_v44  ;;  %v952_v48 = vpop.f32.mrf.mxu3  ;;  %6454 = vmatpush.msk.msrb.mxu0 %vm220_vm7, %v10545_v1 }
 0x119   : > { %10581 = vst [vmem:[#allocation76_spill] sm:$0xff] %v7660_v30  ;;  %v601_v36 = vpop.f32.mrf.mxu0  ;;  %2029 = vmatpush.msrb.mxu1 %v2028_v46  ;;  %6462 = vmatpush.msk.msrb.mxu3 %vm220_vm7, %v10545_v1 }
 0x11a   : > { %v722_v43 = vpop.f32.mrf.mxu1  ;;  %6455 = vmatpush.msk.msrb.mxu0 %vm216_vm8, %v10545_v1 }
 0x11b   : > { %v723_v23 = vadd.f32 %v722_v43, %v593_v54  ;;  %v833_v4 = vpop.f32.mrf.mxu2  ;;  %6463 = vmatpush.msk.msrb.mxu3 %vm216_vm8, %v10545_v1 }
 0x11c   : > { %1064 = vmatmul.f32.gmra.mxu0 %v7472_v24 }
 0x11d   : > { %v834_v32 = vadd.f32 %v833_v4, %v723_v23  ;;  %1149 = vmatmul.f32.gmra.mxu1 %v7432_v0  ;;  %1427 = vmatmul.f32.gmra.mxu3 %v7472_v24  ;;  %v6362_v4 = vsel %vm240_vm2, 1.0, %v10546_v33 }
 0x11f   : > { %v7669_v42 = vadd.f32 %v952_v48, %v834_v32  ;;  %v7687_v32 = vsub.f32 %v6362_v4, %v6362_v4 }
 0x120   : > { %1302 = vmatmul.f32.gmra.mxu2 %v7535_v35  ;;  %v958_v60 = vpop.f32.mrf.mxu3 }
 0x121   : > { %10582 = vst [vmem:[#allocation77_spill] sm:$0xff] %v7669_v42  ;;  %v609_v30 = vpop.f32.mrf.mxu0  ;;  %2150 = vmatpush.msrb.mxu2 %v7687_v32  ;;  %v10323_v48 = vand.u32 4294901760, %v7687_v32 }
 0x122   : > { %v726_v38 = vpop.f32.mrf.mxu1 }
 0x123   : > { %v727_v43 = vadd.f32 %v726_v38, %v601_v36  ;;  %v838_v54 = vpop.f32.mrf.mxu2  ;;  %v2033_v46 = vsub.f32 %v7687_v32, %v10323_v48 }
 0x124   : > { %1068 = vmatmul.f32.gmra.mxu0 %v7506_v59 }
 0x125   : > { %v839_v38 = vadd.f32 %v838_v54, %v727_v43  ;;  %1153 = vmatmul.f32.gmra.mxu1 %v7472_v24  ;;  %1431 = vmatmul.f32.gmra.mxu3 %v7506_v59  ;;  %v2034_v54 = vand.u32 4294901760, %v2033_v46 }
 0x127   : > { %v7693_v25 = vadd.f32 %v958_v60, %v839_v38  ;;  %2035 = vmatpush.msrb.mxu1 %v2034_v54 }
 0x128   : > { %1310 = vmatmul.f32.gmra.mxu2 %v7554_v21  ;;  %v964_v36 = vpop.f32.mrf.mxu3 }
 0x129   : > { %10583 = vst [vmem:[#allocation78_spill] sm:$0xff] %v7693_v25  ;;  %v7699_v23 = vpop.f32.mrf.mxu0 }
 0x12a   : > { %10584 = vst [vmem:[#allocation79_spill] sm:$0xff] %v7699_v23  ;;  %v730_v43 = vpop.f32.mrf.mxu1 }
 0x12b   : > { %v731_v4 = vadd.f32 %v730_v43, %v609_v30  ;;  %v843_v42 = vpop.f32.mrf.mxu2 }
 0x12c   : > { %1469 = vmatmul.f32.vlgmr.msra.gmra.mxu0 %v6813_v12 }
 0x12d   : > { %v844_v35 = vadd.f32 %v843_v42, %v731_v4  ;;  %1157 = vmatmul.f32.gmra.mxu1 %v7506_v59  ;;  %1799 = vmatmul.f32.vlgmr.msra.gmra.mxu3 %v6788_v6  ;;  %v6358_v42 = vsel %vm236_vm3, 1.0, %v10546_v33 }
 0x12f   : > { %v7704_v60 = vadd.f32 %v964_v36, %v844_v35  ;;  %v7728_v36 = vsub.f32 %v6358_v42, %v6358_v42 }
 0x130   : > { %1710 = vmatmul.f32.vlgmr.msra.gmra.mxu2 %v6788_v6  ;;  %v1372_v38 = vpop.f32.mrf.mxu3 }
 0x131   : > { %10585 = vst [vmem:[#allocation80_spill] sm:$0xff] %v7704_v60  ;;  %v7707_v48 = vpop.f32.mrf.mxu0  ;;  %2153 = vmatpush.msrb.mxu2 %v7728_v36  ;;  %v10324_v46 = vand.u32 4294901760, %v7728_v36 }
 0x132   : > { %10586 = vst [vmem:[#allocation81_spill] sm:$0xff] %v7707_v48  ;;  %v7709_v25 = vpop.f32.mrf.mxu1  ;;  %v10590_v48 = vld [vmem:[#allocation11_spill] sm:$0xff] }
 0x133   : > { %10587 = vst [vmem:[#allocation82_spill] sm:$0xff] %v7709_v25  ;;  %v1191_v30 = vpop.f32.mrf.mxu2  ;;  %v2039_v54 = vsub.f32 %v7728_v36, %v10324_v46 }
 0x134   : > { %v7725_v35 = vadd.f32 %v1372_v38, %v1191_v30  ;;  %1474 = vmatmul.f32.gmra.mxu0 %v6834_v19 }
 0x135   : > { %1575 = vmatmul.f32.vlgmr.msra.gmra.mxu1 %v6831_v18  ;;  %1803 = vmatmul.f32.gmra.mxu3 %v6794_v8  ;;  %v2040_v30 = vand.u32 4294901760, %v2039_v54 }
 0x137   : > { %2041 = vmatpush.msrb.mxu1 %v2040_v30 }
 0x138   : > { %1714 = vmatmul.f32.gmra.mxu2 %v6794_v8  ;;  %v1376_v43 = vpop.f32.mrf.mxu3 }
 0x139   : > { %v7738_v4 = vpop.f32.mrf.mxu0 }
 0x13a   : > { %10588 = vst [vmem:[#allocation83_spill] sm:$0xff] %v7738_v4  ;;  %v7740_v38 = vpop.f32.mrf.mxu1 }
 0x13b   : > { %10589 = vst [vmem:[#allocation84_spill] sm:$0xff] %v7740_v38  ;;  %v1199_v42 = vpop.f32.mrf.mxu2 }
 0x13c   : > { %v7742_v60 = vadd.f32 %v1376_v43, %v1199_v42  ;;  %1479 = vmatmul.f32.gmra.mxu0 %v7039_v29  ;;  %v6354_v43 = vsel %vm232_vm4, 1.0, %v10546_v33  ;;  %v10593_v42 = vld [vmem:[#allocation17_spill] sm:$0xff] }
 0x13d   : > { %1581 = vmatmul.f32.gmra.mxu1 %v10590_v48  ;;  %1807 = vmatmul.f32.gmra.mxu3 %v6996_v61 }
 0x140   : > { %1718 = vmatmul.f32.gmra.mxu2 %v6996_v61  ;;  %v1380_v25 = vpop.f32.mrf.mxu3 }
 0x141   : > { %v7748_v23 = vpop.f32.mrf.mxu0 }
 0x142   : > { %10591 = vst [vmem:[#allocation85_spill] sm:$0xff] %v7748_v23  ;;  %v7750_v46 = vpop.f32.mrf.mxu1  ;;  %v7769_v23 = vsub.f32 %v6354_v43, %v6354_v43 }
 0x143   : > { %10592 = vst [vmem:[#allocation86_spill] sm:$0xff] %v7750_v46  ;;  %v1207_v54 = vpop.f32.mrf.mxu2  ;;  %v10594_v46 = vld [vmem:[#allocation14_spill] sm:$0xff] }
 0x144   : > { %v7766_v30 = vadd.f32 %v1380_v25, %v1207_v54  ;;  %1484 = vmatmul.f32.gmra.mxu0 %v10593_v42  ;;  %2156 = vmatpush.msrb.mxu2 %v7769_v23  ;;  %v10339_v4 = vand.u32 4294901760, %v7769_v23 }
 0x145   : > { %1587 = vmatmul.f32.gmra.mxu1 %v10594_v46  ;;  %1811 = vmatmul.f32.gmra.mxu3 %v7060_v49 }
 0x146   : > { %v2045_v25 = vsub.f32 %v7769_v23, %v10339_v4 }
 0x148   : > { %1722 = vmatmul.f32.gmra.mxu2 %v7060_v49  ;;  %v1384_v38 = vpop.f32.mrf.mxu3  ;;  %v2046_v43 = vand.u32 4294901760, %v2045_v25 }
 0x149   : > { %v7779_v54 = vpop.f32.mrf.mxu0 }
 0x14a   : > { %10595 = vst [vmem:[#allocation87_spill] sm:$0xff] %v7779_v54  ;;  %v7781_v21 = vpop.f32.mrf.mxu1  ;;  %2047 = vmatpush.msrb.mxu1 %v2046_v43  ;;  %v10602_v43 = vld [vmem:[#allocation25_spill] sm:$0xff] }
 0x14b   : > { %10596 = vst [vmem:[#allocation88_spill] sm:$0xff] %v7781_v21  ;;  %v1215_v44 = vpop.f32.mrf.mxu2 }
 0x14c   : > { %v7783_v55 = vadd.f32 %v1384_v38, %v1215_v44  ;;  %1489 = vmatmul.f32.gmra.mxu0 %v10597_v51  ;;  %v6350_v44 = vsel %vm228_vm5, 1.0, %v10546_v33 }
 0x14d   : > { %1593 = vmatmul.f32.gmra.mxu1 %v10598_v3  ;;  %1815 = vmatmul.f32.gmra.mxu3 %v7121_v2 }
 0x150   : > { %1726 = vmatmul.f32.gmra.mxu2 %v7121_v2  ;;  %v1388_v57 = vpop.f32.mrf.mxu3 }
 0x151   : > { %v7789_v27 = vpop.f32.mrf.mxu0 }
 0x152   : > { %10599 = vst [vmem:[#allocation89_spill] sm:$0xff] %v7789_v27  ;;  %v7791_v4 = vpop.f32.mrf.mxu1  ;;  %v7810_v27 = vsub.f32 %v6350_v44, %v6350_v44 }
 0x153   : > { %10600 = vst [vmem:[#allocation90_spill] sm:$0xff] %v7791_v4  ;;  %v1223_v25 = vpop.f32.mrf.mxu2  ;;  %v10603_v4 = vld [vmem:[#allocation23_spill] sm:$0xff] }
 0x154   : > { %v7807_v38 = vadd.f32 %v1388_v57, %v1223_v25  ;;  %1494 = vmatmul.f32.gmra.mxu0 %v10602_v43  ;;  %2159 = vmatpush.msrb.mxu2 %v7810_v27  ;;  %v10348_v54 = vand.u32 4294901760, %v7810_v27 }
 0x155   : > { %1599 = vmatmul.f32.gmra.mxu1 %v10603_v4  ;;  %1819 = vmatmul.f32.gmra.mxu3 %v7159_v22 }
 0x156   : > { %10601 = vst [vmem:[#allocation91_spill] sm:$0xff] %v7807_v38  ;;  %v2051_v57 = vsub.f32 %v7810_v27, %v10348_v54  ;;  %v10608_v38 = vld [vmem:[#allocation27_spill] sm:$0xff] }
 0x158   : > { %1730 = vmatmul.f32.gmra.mxu2 %v7159_v22  ;;  %v1392_v21 = vpop.f32.mrf.mxu3  ;;  %v2052_v44 = vand.u32 4294901760, %v2051_v57 }
 0x159   : > { %v7820_v25 = vpop.f32.mrf.mxu0 }
 0x15a   : > { %10604 = vst [vmem:[#allocation92_spill] sm:$0xff] %v7820_v25  ;;  %v7822_v28 = vpop.f32.mrf.mxu1  ;;  %2053 = vmatpush.msrb.mxu1 %v2052_v44  ;;  %v10612_v44 = vld [vmem:[#allocation33_spill] sm:$0xff] }
 0x15b   : > { %10605 = vst [vmem:[#allocation93_spill] sm:$0xff] %v7822_v28  ;;  %v1231_v43 = vpop.f32.mrf.mxu2 }
 0x15c   : > { %v7824_v2 = vadd.f32 %v1392_v21, %v1231_v43  ;;  %1499 = vmatmul.f32.gmra.mxu0 %v10607_v31  ;;  %v6346_v21 = vsel %vm224_vm6, 1.0, %v10546_v33  ;;  %v10617_v31 = vld [vmem:[#allocation37_spill] sm:$0xff] }
 0x15d   : > { %1605 = vmatmul.f32.gmra.mxu1 %v10608_v38  ;;  %1823 = vmatmul.f32.gmra.mxu3 %v7215_v39 }
 0x15e   : > { %10606 = vst [vmem:[#allocation94_spill] sm:$0xff] %v7824_v2 }
 0x160   : > { %1734 = vmatmul.f32.gmra.mxu2 %v7215_v39  ;;  %v1396_v22 = vpop.f32.mrf.mxu3 }
 0x161   : > { %v7830_v51 = vpop.f32.mrf.mxu0 }
 0x162   : > { %10609 = vst [vmem:[#allocation95_spill] sm:$0xff] %v7830_v51  ;;  %v7832_v54 = vpop.f32.mrf.mxu1  ;;  %v7851_v51 = vsub.f32 %v6346_v21, %v6346_v21 }
 0x163   : > { %10610 = vst [vmem:[#allocation96_spill] sm:$0xff] %v7832_v54  ;;  %v1239_v57 = vpop.f32.mrf.mxu2  ;;  %v10613_v54 = vld [vmem:[#allocation31_spill] sm:$0xff] }
 0x164   : > { %v7848_v43 = vadd.f32 %v1396_v22, %v1239_v57  ;;  %1504 = vmatmul.f32.gmra.mxu0 %v10612_v44  ;;  %2162 = vmatpush.msrb.mxu2 %v7851_v51  ;;  %v10353_v25 = vand.u32 4294901760, %v7851_v51 }
 0x165   : > { %1611 = vmatmul.f32.gmra.mxu1 %v10613_v54  ;;  %1827 = vmatmul.f32.gmra.mxu3 %v7249_v26  ;;  %v10618_v54 = vld [vmem:[#allocation35_spill] sm:$0xff] }
 0x166   : > { %10611 = vst [vmem:[#allocation97_spill] sm:$0xff] %v7848_v43  ;;  %v2057_v22 = vsub.f32 %v7851_v51, %v10353_v25 }
 0x168   : > { %1738 = vmatmul.f32.gmra.mxu2 %v7249_v26  ;;  %v1400_v28 = vpop.f32.mrf.mxu3  ;;  %v2058_v21 = vand.u32 4294901760, %v2057_v22 }
 0x169   : > { %v7861_v57 = vpop.f32.mrf.mxu0 }
 0x16a   : > { %10614 = vst [vmem:[#allocation98_spill] sm:$0xff] %v7861_v57  ;;  %v7863_v44 = vpop.f32.mrf.mxu1  ;;  %2059 = vmatpush.msrb.mxu1 %v2058_v21  ;;  %v10622_v21 = vld [vmem:[#allocation41_spill] sm:$0xff] }
 0x16b   : > { %10615 = vst [vmem:[#allocation99_spill] sm:$0xff] %v7863_v44  ;;  %v1247_v39 = vpop.f32.mrf.mxu2 }
 0x16c   : > { %v7865_v43 = vadd.f32 %v1400_v28, %v1247_v39  ;;  %1509 = vmatmul.f32.gmra.mxu0 %v10617_v31  ;;  %v6342_v39 = vsel %vm220_vm7, 1.0, %v10546_v33  ;;  %v10626_v31 = vld [vmem:[#allocation45_spill] sm:$0xff] }
 0x16d   : > { %1617 = vmatmul.f32.gmra.mxu1 %v10618_v54  ;;  %1831 = vmatmul.f32.gmra.mxu3 %v7290_v37 }
 0x16e   : > { %10616 = vst [vmem:[#allocation100_spill] sm:$0xff] %v7865_v43 }
 0x170   : > { %1742 = vmatmul.f32.gmra.mxu2 %v7290_v37  ;;  %v1404_v26 = vpop.f32.mrf.mxu3 }
 0x171   : > { %v7871_v2 = vpop.f32.mrf.mxu0 }
 0x172   : > { %10619 = vst [vmem:[#allocation101_spill] sm:$0xff] %v7871_v2  ;;  %v7873_v25 = vpop.f32.mrf.mxu1  ;;  %v7892_v2 = vsub.f32 %v6342_v39, %v6342_v39 }
 0x173   : > { %10620 = vst [vmem:[#allocation102_spill] sm:$0xff] %v7873_v25  ;;  %v1255_v22 = vpop.f32.mrf.mxu2  ;;  %v10623_v25 = vld [vmem:[#allocation39_spill] sm:$0xff] }
 0x174   : > { %v7889_v28 = vadd.f32 %v1404_v26, %v1255_v22  ;;  %1514 = vmatmul.f32.gmra.mxu0 %v10622_v21  ;;  %2165 = vmatpush.msrb.mxu2 %v7892_v2  ;;  %v10358_v57 = vand.u32 4294901760, %v7892_v2 }
 0x175   : > { %1623 = vmatmul.f32.gmra.mxu1 %v10623_v25  ;;  %1835 = vmatmul.f32.gmra.mxu3 %v7310_v56  ;;  %v10627_v25 = vld [vmem:[#allocation43_spill] sm:$0xff] }
 0x176   : > { %10621 = vst [vmem:[#allocation103_spill] sm:$0xff] %v7889_v28  ;;  %v2063_v26 = vsub.f32 %v7892_v2, %v10358_v57 }
 0x178   : > { %1746 = vmatmul.f32.gmra.mxu2 %v7310_v56  ;;  %v1408_v44 = vpop.f32.mrf.mxu3  ;;  %v2064_v39 = vand.u32 4294901760, %v2063_v26 }
 0x179   : > { %v7902_v22 = vpop.f32.mrf.mxu0 }
 0x17a   : > { %10624 = vst [vmem:[#allocation104_spill] sm:$0xff] %v7902_v22  ;;  %v7904_v21 = vpop.f32.mrf.mxu1  ;;  %2065 = vmatpush.msrb.mxu1 %v2064_v39  ;;  %v10632_v22 = vand.u32 4294901760, %v7654_v13  ;;  %v10639_v13 = vand.u32 4294901760, %v7810_v27 }
 0x17b   : > { %10625 = vst [vmem:[#allocation105_spill] sm:$0xff] %v7904_v21  ;;  %v1263_v37 = vpop.f32.mrf.mxu2 }
 0x17c   : > { %v7906_v28 = vadd.f32 %v1408_v44, %v1263_v37  ;;  %1519 = vmatmul.f32.gmra.mxu0 %v10626_v31  ;;  %v6338_v37 = vsel %vm216_vm8, 1.0, %v10546_v33  ;;  %v10633_v31 = vand.u32 4294901760, %v7687_v32 }
 0x17d   : > { %1629 = vmatmul.f32.gmra.mxu1 %v10627_v25  ;;  %1839 = vmatmul.f32.gmra.mxu3 %v7351_v40  ;;  %v2067_v39 = vsub.f32 %v6338_v37, %v6338_v37 }
 0x17e   : > { %2382 = vmatpush.msra.mxu0 %v10632_v22  ;;  %v10641_v22 = vand.u32 4294901760, %v7851_v51 }
 0x17f   : > { %2168 = vmatpush.msrb.mxu2 %v2067_v39 }
 0x180   : > { %1750 = vmatmul.f32.gmra.mxu2 %v7351_v40  ;;  %v1412_v56 = vpop.f32.mrf.mxu3  ;;  %2386 = vmatpush.msra.mxu0 %v10633_v31 }
 0x181   : > { %v7912_v43 = vpop.f32.mrf.mxu0 }
 0x182   : > { %10628 = vst [vmem:[#allocation106_spill] sm:$0xff] %v7912_v43  ;;  %v7914_v57 = vpop.f32.mrf.mxu1  ;;  %v10631_v43 = vld [vmem:[#allocation47_spill] sm:$0xff] }
 0x183   : > { %10629 = vst [vmem:[#allocation107_spill] sm:$0xff] %v7914_v57  ;;  %v1271_v26 = vpop.f32.mrf.mxu2  ;;  %v2068_v57 = vand.u32 4294901760, %v2067_v39 }
 0x184   : > { %v7930_v44 = vadd.f32 %v1412_v56, %v1271_v26  ;;  %1524 = vmatmul.f32.gmra.mxu0 %v7396_v53  ;;  %v10636_v53 = vand.u32 4294901760, %v7728_v36  ;;  %v6637_v36 = vld [vmem:[%s6801_s5] sm:$0xf] }
 0x185   : > { %1635 = vmatmul.f32.gmra.mxu1 %v10631_v43  ;;  %1843 = vmatmul.f32.gmra.mxu3 %v7371_v20  ;;  %v2069_v40 = vsub.f32 %v2067_v39, %v2068_v57  ;;  %v10642_v39 = vand.u32 4294901760, %v7892_v2 }
 0x186   : > { %10630 = vst [vmem:[#allocation108_spill] sm:$0xff] %v7930_v44  ;;  %2390 = vmatpush.msra.mxu0 %v10636_v53 }
 0x187   : > { %v2070_v37 = vand.u32 4294901760, %v2069_v40  ;;  %v10637_v40 = vand.u32 4294901760, %v7769_v23 }
 0x188   : > { %1754 = vmatmul.f32.gmra.mxu2 %v7371_v20  ;;  %v1416_v21 = vpop.f32.mrf.mxu3 }
 0x189   : > { %v7940_v56 = vpop.f32.mrf.mxu0  ;;  %2071 = vmatpush.msrb.mxu1 %v2070_v37  ;;  %2394 = vmatpush.msra.mxu0 %v10637_v40 }
 0x18a   : > { %10634 = vst [vmem:[#allocation109_spill] sm:$0xff] %v7940_v56  ;;  %v7942_v26 = vpop.f32.mrf.mxu1 }
 0x18b   : > { %10635 = vst [vmem:[#allocation110_spill] sm:$0xff] %v7942_v26  ;;  %v1279_v44 = vpop.f32.mrf.mxu2  ;;  %6464 = vmatpush.msk.msra.mxu1 %vm244_vm0, %v10545_v1  ;;  %2398 = vmatpush.msra.mxu0 %v10639_v13  ;;  %v10652_v26 = vld [vmem:[#allocation10_spill] sm:$0xff] }
 0x18c   : > { %v7946_v43 = vadd.f32 %v1416_v21, %v1279_v44  ;;  %1529 = vmatmul.f32.gmra.mxu0 %v7421_v62  ;;  %v7969_v21 = vperm.slane %v6637_v36, 3 }
 0x18d   : > { %1641 = vmatmul.f32.gmra.mxu1 %v7410_v47  ;;  %1847 = vmatmul.f32.gmra.mxu3 %v7412_v52 }
 0x18e   : > { %6465 = vmatpush.msk.msra.mxu1 %vm240_vm2, %v10545_v1  ;;  %2402 = vmatpush.msra.mxu0 %v10641_v22  ;;  %vm245_vm9 = vcmp.eq.s32.totalorder %v6792_v7, %v7969_v21  ;;  %v10645_v22 = vld [vmem:[#allocation56_spill] sm:$0xff]  ;;  %vm241_vm10 = vcmp.eq.s32.totalorder %v6804_v9, %v7969_v21  ;;  %vm237_vm11 = vcmp.eq.s32.totalorder %v6807_v10, %v7969_v21 }
 0x18f   : > { %v6367_v51 = vsel %vm245_vm9, 1.0, %v10546_v33  ;;  %6472 = vmatpush.msk.msra.mxu2 %vm245_vm9, %v10545_v1  ;;  %v6363_v58 = vsel %vm241_vm10, 1.0, %v10546_v33  ;;  %vm233_vm12 = vcmp.eq.s32.totalorder %v6810_v11, %v7969_v21  ;;  %vm229_vm13 = vcmp.eq.s32.totalorder %v6819_v14, %v7969_v21 }
 0x190   : > { %1758 = vmatmul.f32.gmra.mxu2 %v7412_v52  ;;  %v1420_v31 = vpop.f32.mrf.mxu3  ;;  %6466 = vmatpush.msk.msra.mxu1 %vm236_vm3, %v10545_v1  ;;  %v7996_v27 = vsub.f32 %v6367_v51, %v6367_v51  ;;  %vm225_vm14 = vcmp.eq.s32.totalorder %v6825_v16, %v7969_v21  ;;  %vm221_vm15 = vcmp.eq.s32.totalorder %v6828_v17, %v7969_v21 }
 0x191   : > { %v7962_v53 = vpop.f32.mrf.mxu0  ;;  %2406 = vmatpush.msra.mxu0 %v10642_v39  ;;  %6473 = vmatpush.msk.msra.mxu2 %vm241_vm10, %v10545_v1  ;;  %vm217_vm1 = vcmp.eq.s32.totalorder %v6786_v5, %v7969_v21 }
 0x192   : > { %10638 = vst [vmem:[#allocation111_spill] sm:$0xff] %v7962_v53  ;;  %v7966_v32 = vpop.f32.mrf.mxu1  ;;  %6467 = vmatpush.msk.msra.mxu1 %vm232_vm4, %v10545_v1  ;;  %v10363_v40 = vand.u32 4294901760, %v7996_v27 }
 0x193   : > { %10640 = vst [vmem:[#allocation112_spill] sm:$0xff] %v7966_v32  ;;  %v1287_v23 = vpop.f32.mrf.mxu2  ;;  %2410 = vmatpush.msra.mxu0 %v2068_v57  ;;  %v10646_v57 = vld [vmem:[#allocation54_spill] sm:$0xff]  ;;  %6474 = vmatpush.msk.msra.mxu2 %vm237_vm11, %v10545_v1 }
 0x194   : > { %v7977_v44 = vadd.f32 %v1420_v31, %v1287_v23  ;;  %1534 = vmatmul.f32.gmra.mxu0 %v7457_v63  ;;  %6468 = vmatpush.msk.msra.mxu1 %vm228_vm5, %v10545_v1  ;;  %v2729_v2 = vsub.f32 %v7996_v27, %v10363_v40 }
 0x195   : > { %1647 = vmatmul.f32.gmra.mxu1 %v7430_v41  ;;  %1851 = vmatmul.f32.gmra.mxu3 %v7432_v0 }
 0x196   : > { %6469 = vmatpush.msk.msra.mxu1 %vm224_vm6, %v10545_v1  ;;  %v2730_v51 = vand.u32 4294901760, %v2729_v2  ;;  %6475 = vmatpush.msk.msra.mxu2 %vm233_vm12, %v10545_v1 }
 0x198   : > { %1762 = vmatmul.f32.gmra.mxu2 %v7432_v0  ;;  %v1424_v37 = vpop.f32.mrf.mxu3  ;;  %6470 = vmatpush.msk.msra.mxu1 %vm220_vm7, %v10545_v1 }
 0x199   : > { %v8010_v31 = vpop.f32.mrf.mxu0  ;;  %2731 = vmatpush.msra.mxu3 %v2730_v51  ;;  %v10649_v51 = vld [vmem:[#allocation60_spill] sm:$0xff]  ;;  %6476 = vmatpush.msk.msra.mxu2 %vm229_vm13, %v10545_v1 }
 0x19a   : > { %10643 = vst [vmem:[#allocation113_spill] sm:$0xff] %v8010_v31  ;;  %v8012_v13 = vpop.f32.mrf.mxu1  ;;  %6471 = vmatpush.msk.msra.mxu1 %vm216_vm8, %v10545_v1 }
 0x19b   : > { %10644 = vst [vmem:[#allocation114_spill] sm:$0xff] %v8012_v13  ;;  %v1295_v36 = vpop.f32.mrf.mxu2  ;;  %6477 = vmatpush.msk.msra.mxu2 %vm225_vm14, %v10545_v1 }
 0x19c   : > { %v8021_v23 = vadd.f32 %v1424_v37, %v1295_v36  ;;  %1539 = vmatmul.f32.gmra.mxu0 %v10645_v22 }
 0x19d   : > { %1653 = vmatmul.f32.gmra.mxu1 %v10646_v57  ;;  %1855 = vmatmul.f32.gmra.mxu3 %v7472_v24 }
 0x19e   : > { %6478 = vmatpush.msk.msra.mxu2 %vm221_vm15, %v10545_v1 }
 0x1a0   : > { %1766 = vmatmul.f32.gmra.mxu2 %v7472_v24  ;;  %v1428_v39 = vpop.f32.mrf.mxu3 }
 0x1a1   : > { %v8031_v40 = vpop.f32.mrf.mxu0  ;;  %6479 = vmatpush.msk.msra.mxu2 %vm217_vm1, %v10545_v1 }
 0x1a2   : > { %10647 = vst [vmem:[#allocation115_spill] sm:$0xff] %v8031_v40  ;;  %v8033_v37 = vpop.f32.mrf.mxu1  ;;  %v8048_v40 = vsub.f32 %v6363_v58, %v6363_v58 }
 0x1a3   : > { %10648 = vst [vmem:[#allocation116_spill] sm:$0xff] %v8033_v37  ;;  %v1303_v2 = vpop.f32.mrf.mxu2  ;;  %v10650_v37 = vld [vmem:[#allocation58_spill] sm:$0xff] }
 0x1a4   : > { %v8045_v36 = vadd.f32 %v1428_v39, %v1303_v2  ;;  %1544 = vmatmul.f32.gmra.mxu0 %v10649_v51  ;;  %v10366_v31 = vand.u32 4294901760, %v8048_v40  ;;  %v10653_v51 = vld [vmem:[#allocation62_spill] sm:$0xff] }
 0x1a5   : > { %1659 = vmatmul.f32.gmra.mxu1 %v10650_v37  ;;  %1859 = vmatmul.f32.gmra.mxu3 %v7506_v59 }
 0x1a6   : > { %v2735_v53 = vsub.f32 %v8048_v40, %v10366_v31 }
 0x1a8   : > { %1770 = vmatmul.f32.gmra.mxu2 %v7506_v59  ;;  %v1432_v13 = vpop.f32.mrf.mxu3  ;;  %v2736_v2 = vand.u32 4294901760, %v2735_v53 }
 0x1a9   : > { %v1470_v32 = vpop.f32.mrf.mxu0 }
 0x1aa   : > { %v8057_v39 = vpop.f32.mrf.mxu1  ;;  %2737 = vmatpush.msra.mxu3 %v2736_v2  ;;  %v1471_v31 = vadd.f32 %v1470_v32, %v7725_v35  ;;  %v6359_v2 = vsel %vm237_vm11, 1.0, %v10546_v33 }
 0x1ab   : > { %10651 = vst [vmem:[#allocation117_spill] sm:$0xff] %v8057_v39  ;;  %v1311_v56 = vpop.f32.mrf.mxu2  ;;  %v8079_v35 = vsub.f32 %v6359_v2, %v6359_v2 }
 0x1ac   : > { %v8059_v58 = vadd.f32 %v1432_v13, %v1311_v56  ;;  %1892 = vmatmul.f32.vlgmr.msrb.gmra.mxu0 %v10652_v26 }
 0x1ad   : > { %1665 = vmatmul.f32.gmra.mxu1 %v10653_v51  ;;  %2277 = vmatmul.f32.vlgmr.msrb.gmra.mxu3 %v6831_v18 }
 0x1ae   : > { %2849 = vmatpush.msrb.mxu0 %v7996_v27 }
 0x1b0   : > { %2171 = vmatmul.f32.vlgmr.msrb.gmra.mxu2 %v6813_v12  ;;  %v1800_v59 = vpop.f32.mrf.mxu3  ;;  %2852 = vmatpush.msrb.mxu0 %v8048_v40 }
 0x1b1   : > { %v1475_v53 = vpop.f32.mrf.mxu0 }
 0x1b2   : > { %v1576_v39 = vpop.f32.mrf.mxu1  ;;  %2855 = vmatpush.msrb.mxu0 %v8079_v35 }
 0x1b3   : > { %v1577_v56 = vadd.f32 %v1576_v39, %v1471_v31  ;;  %v1711_v13 = vpop.f32.mrf.mxu2  ;;  %v10372_v31 = vand.u32 4294901760, %v8079_v35 }
 0x1b4   : > { %1900 = vmatmul.f32.gmra.mxu0 %v7063_v50 }
 0x1b5   : > { %v1712_v32 = vadd.f32 %v1711_v13, %v1577_v56  ;;  %2073 = vmatmul.f32.vlgmr.msrb.gmra.mxu1 %v6788_v6  ;;  %2283 = vmatmul.f32.gmra.mxu3 %v10590_v48  ;;  %v2741_v56 = vsub.f32 %v8079_v35, %v10372_v31  ;;  %v1476_v13 = vadd.f32 %v1475_v53, %v7742_v60 }
 0x1b6   : > { %6480 = vmatpush.msk.msrb.mxu1 %vm245_vm9, %v10545_v1 }
 0x1b7   : > { %v8089_v39 = vadd.f32 %v1800_v59, %v1712_v32  ;;  %v2742_v12 = vand.u32 4294901760, %v2741_v56 }
 0x1b8   : > { %2176 = vmatmul.f32.gmra.mxu2 %v6834_v19  ;;  %v1804_v2 = vpop.f32.mrf.mxu3  ;;  %6481 = vmatpush.msk.msrb.mxu1 %vm241_vm10, %v10545_v1 }
 0x1b9   : > { %10654 = vst [vmem:[#allocation118_spill] sm:$0xff] %v8089_v39  ;;  %v1480_v48 = vpop.f32.mrf.mxu0  ;;  %2743 = vmatpush.msra.mxu3 %v2742_v12  ;;  %v6355_v12 = vsel %vm233_vm12, 1.0, %v10546_v33 }
 0x1ba   : > { %v1582_v18 = vpop.f32.mrf.mxu1  ;;  %6482 = vmatpush.msk.msrb.mxu1 %vm237_vm11, %v10545_v1  ;;  %v1481_v53 = vadd.f32 %v1480_v48, %v7766_v30  ;;  %v8126_v48 = vsub.f32 %v6355_v12, %v6355_v12 }
 0x1bb   : > { %v1583_v59 = vadd.f32 %v1582_v18, %v1476_v13  ;;  %v1715_v32 = vpop.f32.mrf.mxu2 }
 0x1bc   : > { %1908 = vmatmul.f32.gmra.mxu0 %v7112_v34  ;;  %6483 = vmatpush.msk.msrb.mxu1 %vm233_vm12, %v10545_v1  ;;  %v10376_v30 = vand.u32 4294901760, %v8126_v48 }
 0x1bd   : > { %v1716_v31 = vadd.f32 %v1715_v32, %v1583_v59  ;;  %2077 = vmatmul.f32.gmra.mxu1 %v6794_v8  ;;  %2289 = vmatmul.f32.gmra.mxu3 %v10594_v46 }
 0x1be   : > { %2858 = vmatpush.msrb.mxu0 %v8126_v48  ;;  %v2747_v59 = vsub.f32 %v8126_v48, %v10376_v30  ;;  %6484 = vmatpush.msk.msrb.mxu1 %vm229_vm13, %v10545_v1 }
 0x1bf   : > { %v8107_v39 = vadd.f32 %v1804_v2, %v1716_v31 }
 0x1c0   : > { %2181 = vmatmul.f32.gmra.mxu2 %v7039_v29  ;;  %v1808_v60 = vpop.f32.mrf.mxu3  ;;  %6485 = vmatpush.msk.msrb.mxu1 %vm225_vm14, %v10545_v1 }
 0x1c1   : > { %10655 = vst [vmem:[#allocation119_spill] sm:$0xff] %v8107_v39  ;;  %v1485_v56 = vpop.f32.mrf.mxu0 }
 0x1c2   : > { %v1588_v19 = vpop.f32.mrf.mxu1  ;;  %v1486_v32 = vadd.f32 %v1485_v56, %v7783_v55  ;;  %6486 = vmatpush.msk.msrb.mxu1 %vm221_vm15, %v10545_v1 }
 0x1c3   : > { %v1589_v18 = vadd.f32 %v1588_v19, %v1481_v53  ;;  %v1719_v13 = vpop.f32.mrf.mxu2 }
 0x1c4   : > { %1916 = vmatmul.f32.gmra.mxu0 %v7154_v45  ;;  %6487 = vmatpush.msk.msrb.mxu1 %vm217_vm1, %v10545_v1 }
 0x1c5   : > { %v1720_v19 = vadd.f32 %v1719_v13, %v1589_v18  ;;  %2081 = vmatmul.f32.gmra.mxu1 %v6996_v61  ;;  %2295 = vmatmul.f32.gmra.mxu3 %v10598_v3  ;;  %v2748_v13 = vand.u32 4294901760, %v2747_v59 }
 0x1c7   : > { %v8132_v31 = vadd.f32 %v1808_v60, %v1720_v19  ;;  %2749 = vmatpush.msra.mxu3 %v2748_v13  ;;  %v10658_v19 = vld [vmem:[#allocation21_spill] sm:$0xff] }
 0x1c8   : > { %2186 = vmatmul.f32.gmra.mxu2 %v10593_v42  ;;  %v1812_v2 = vpop.f32.mrf.mxu3  ;;  %v10663_v13 = vld [vmem:[#allocation25_spill] sm:$0xff]  ;;  %v10665_v42 = vld [vmem:[#allocation34_spill] sm:$0xff] }
 0x1c9   : > { %10656 = vst [vmem:[#allocation120_spill] sm:$0xff] %v8132_v31  ;;  %v1490_v53 = vpop.f32.mrf.mxu0  ;;  %v10659_v31 = vld [vmem:[#allocation91_spill] sm:$0xff] }
 0x1ca   : > { %v1594_v18 = vpop.f32.mrf.mxu1  ;;  %v1491_v55 = vadd.f32 %v1490_v53, %v10659_v31 }
 0x1cb   : > { %v1595_v12 = vadd.f32 %v1594_v18, %v1486_v32  ;;  %v1723_v39 = vpop.f32.mrf.mxu2 }
 0x1cc   : > { %1924 = vmatmul.f32.gmra.mxu0 %v7210_v15 }
 0x1cd   : > { %v1724_v3 = vadd.f32 %v1723_v39, %v1595_v12  ;;  %2085 = vmatmul.f32.gmra.mxu1 %v7060_v49  ;;  %2301 = vmatmul.f32.gmra.mxu3 %v10603_v4  ;;  %v6351_v39 = vsel %vm229_vm13, 1.0, %v10546_v33 }
 0x1ce   : > { %v8161_v31 = vsub.f32 %v6351_v39, %v6351_v39  ;;  %v10664_v39 = vld [vmem:[#allocation94_spill] sm:$0xff] }
 0x1cf   : > { %v8142_v60 = vadd.f32 %v1812_v2, %v1724_v3  ;;  %v10660_v3 = vld [vmem:[#allocation30_spill] sm:$0xff]  ;;  %v10661_v2 = vld [vmem:[#allocation20_spill] sm:$0xff] }
 0x1d0   : > { %2191 = vmatmul.f32.gmra.mxu2 %v10658_v19  ;;  %v1816_v30 = vpop.f32.mrf.mxu3  ;;  %v10383_v53 = vand.u32 4294901760, %v8161_v31  ;;  %2861 = vmatpush.msrb.mxu0 %v8161_v31 }
 0x1d1   : > { %10657 = vst [vmem:[#allocation121_spill] sm:$0xff] %v8142_v60  ;;  %v1495_v56 = vpop.f32.mrf.mxu0 }
 0x1d2   : > { %v1600_v46 = vpop.f32.mrf.mxu1  ;;  %v1496_v60 = vadd.f32 %v1495_v56, %v10664_v39 }
 0x1d3   : > { %v1601_v59 = vadd.f32 %v1600_v46, %v1491_v55  ;;  %v1727_v32 = vpop.f32.mrf.mxu2  ;;  %v2753_v55 = vsub.f32 %v8161_v31, %v10383_v53 }
 0x1d4   : > { %1932 = vmatmul.f32.gmra.mxu0 %v10660_v3  ;;  %v10670_v3 = vld [vmem:[#allocation97_spill] sm:$0xff] }
 0x1d5   : > { %v1728_v46 = vadd.f32 %v1727_v32, %v1601_v59  ;;  %2089 = vmatmul.f32.gmra.mxu1 %v10661_v2  ;;  %2307 = vmatmul.f32.gmra.mxu3 %v10608_v38  ;;  %v2754_v4 = vand.u32 4294901760, %v2753_v55 }
 0x1d7   : > { %v8167_v18 = vadd.f32 %v1816_v30, %v1728_v46  ;;  %2755 = vmatpush.msra.mxu3 %v2754_v4  ;;  %v10666_v30 = vld [vmem:[#allocation24_spill] sm:$0xff]  ;;  %v10667_v46 = vld [vmem:[#allocation31_spill] sm:$0xff]  ;;  %v6347_v4 = vsel %vm225_vm14, 1.0, %v10546_v33 }
 0x1d8   : > { %2196 = vmatmul.f32.gmra.mxu2 %v10663_v13  ;;  %v1820_v12 = vpop.f32.mrf.mxu3  ;;  %v10669_v13 = vld [vmem:[#allocation29_spill] sm:$0xff] }
 0x1d9   : > { %10662 = vst [vmem:[#allocation91_spill] sm:$0xff] %v8167_v18  ;;  %v1500_v59 = vpop.f32.mrf.mxu0 }
 0x1da   : > { %v1606_v32 = vpop.f32.mrf.mxu1  ;;  %v1501_v56 = vadd.f32 %v1500_v59, %v10670_v3  ;;  %v10674_v59 = vld [vmem:[#allocation33_spill] sm:$0xff] }
 0x1db   : > { %v1607_v19 = vadd.f32 %v1606_v32, %v1496_v60  ;;  %v1731_v38 = vpop.f32.mrf.mxu2 }
 0x1dc   : > { %1940 = vmatmul.f32.gmra.mxu0 %v10665_v42 }
 0x1dd   : > { %v1732_v29 = vadd.f32 %v1731_v38, %v1607_v19  ;;  %2093 = vmatmul.f32.gmra.mxu1 %v10666_v30  ;;  %2313 = vmatmul.f32.gmra.mxu3 %v10667_v46  ;;  %v8196_v38 = vsub.f32 %v6347_v4, %v6347_v4  ;;  %v10672_v19 = vld [vmem:[#allocation28_spill] sm:$0xff] }
 0x1de   : > { %v10675_v4 = vld [vmem:[#allocation100_spill] sm:$0xff] }
 0x1df   : > { %v8177_v18 = vadd.f32 %v1820_v12, %v1732_v29  ;;  %v10671_v29 = vld [vmem:[#allocation38_spill] sm:$0xff]  ;;  %v10387_v3 = vand.u32 4294901760, %v8196_v38  ;;  %2864 = vmatpush.msrb.mxu0 %v8196_v38 }
 0x1e0   : > { %2201 = vmatmul.f32.gmra.mxu2 %v10669_v13  ;;  %v1824_v53 = vpop.f32.mrf.mxu3 }
 0x1e1   : > { %10668 = vst [vmem:[#allocation94_spill] sm:$0xff] %v8177_v18  ;;  %v1505_v39 = vpop.f32.mrf.mxu0 }
 0x1e2   : > { %v1612_v15 = vpop.f32.mrf.mxu1  ;;  %v1506_v18 = vadd.f32 %v1505_v39, %v10675_v4 }
 0x1e3   : > { %v1613_v60 = vadd.f32 %v1612_v15, %v1501_v56  ;;  %v1735_v55 = vpop.f32.mrf.mxu2  ;;  %v2759_v56 = vsub.f32 %v8196_v38, %v10387_v3 }
 0x1e4   : > { %1948 = vmatmul.f32.gmra.mxu0 %v10671_v29  ;;  %v10676_v29 = vld [vmem:[#allocation42_spill] sm:$0xff] }
 0x1e5   : > { %v1736_v15 = vadd.f32 %v1735_v55, %v1613_v60  ;;  %2097 = vmatmul.f32.gmra.mxu1 %v10672_v19  ;;  %2319 = vmatmul.f32.gmra.mxu3 %v10618_v54  ;;  %v2760_v46 = vand.u32 4294901760, %v2759_v56  ;;  %v10681_v19 = vld [vmem:[#allocation103_spill] sm:$0xff] }
 0x1e7   : > { %v8202_v12 = vadd.f32 %v1824_v53, %v1736_v15  ;;  %2761 = vmatpush.msra.mxu3 %v2760_v46  ;;  %v10677_v53 = vld [vmem:[#allocation32_spill] sm:$0xff]  ;;  %v10678_v15 = vld [vmem:[#allocation39_spill] sm:$0xff] }
 0x1e8   : > { %2206 = vmatmul.f32.gmra.mxu2 %v10674_v59  ;;  %v1828_v32 = vpop.f32.mrf.mxu3  ;;  %v10680_v59 = vld [vmem:[#allocation37_spill] sm:$0xff]  ;;  %v10683_v46 = vld [vmem:[#allocation36_spill] sm:$0xff] }
 0x1e9   : > { %10673 = vst [vmem:[#allocation97_spill] sm:$0xff] %v8202_v12  ;;  %v1510_v60 = vpop.f32.mrf.mxu0 }
 0x1ea   : > { %v1618_v55 = vpop.f32.mrf.mxu1  ;;  %v1511_v39 = vadd.f32 %v1510_v60, %v10681_v19  ;;  %v10685_v60 = vld [vmem:[#allocation41_spill] sm:$0xff] }
 0x1eb   : > { %v1619_v13 = vadd.f32 %v1618_v55, %v1506_v18  ;;  %v1739_v54 = vpop.f32.mrf.mxu2 }
 0x1ec   : > { %1956 = vmatmul.f32.gmra.mxu0 %v10676_v29  ;;  %v10691_v29 = vld [vmem:[#allocation108_spill] sm:$0xff] }
 0x1ed   : > { %v1740_v42 = vadd.f32 %v1739_v54, %v1619_v13  ;;  %2101 = vmatmul.f32.gmra.mxu1 %v10677_v53  ;;  %2325 = vmatmul.f32.gmra.mxu3 %v10678_v15  ;;  %v6343_v54 = vsel %vm221_vm15, 1.0, %v10546_v33 }
 0x1ee   : > { %v8231_v13 = vsub.f32 %v6343_v54, %v6343_v54 }
 0x1ef   : > { %v8212_v12 = vadd.f32 %v1828_v32, %v1740_v42  ;;  %v10682_v42 = vld [vmem:[#allocation46_spill] sm:$0xff] }
 0x1f0   : > { %2211 = vmatmul.f32.gmra.mxu2 %v10680_v59  ;;  %v1832_v3 = vpop.f32.mrf.mxu3  ;;  %v10389_v19 = vand.u32 4294901760, %v8231_v13  ;;  %2867 = vmatpush.msrb.mxu0 %v8231_v13  ;;  %v10686_v59 = vld [vmem:[#allocation50_spill] sm:$0xff] }
 0x1f1   : > { %10679 = vst [vmem:[#allocation100_spill] sm:$0xff] %v8212_v12  ;;  %v1515_v4 = vpop.f32.mrf.mxu0 }
 0x1f2   : > { %v1624_v30 = vpop.f32.mrf.mxu1  ;;  %v1516_v54 = vadd.f32 %v1515_v4, %v7906_v28 }
 0x1f3   : > { %v1625_v18 = vadd.f32 %v1624_v30, %v1511_v39  ;;  %v1743_v56 = vpop.f32.mrf.mxu2  ;;  %v2765_v39 = vsub.f32 %v8231_v13, %v10389_v19 }
 0x1f4   : > { %1964 = vmatmul.f32.gmra.mxu0 %v10682_v42 }
 0x1f5   : > { %v1744_v30 = vadd.f32 %v1743_v56, %v1625_v18  ;;  %2105 = vmatmul.f32.gmra.mxu1 %v10683_v46  ;;  %2331 = vmatmul.f32.gmra.mxu3 %v10627_v25  ;;  %v2766_v12 = vand.u32 4294901760, %v2765_v39 }
 0x1f7   : > { %v8237_v32 = vadd.f32 %v1832_v3, %v1744_v30  ;;  %2767 = vmatpush.msra.mxu3 %v2766_v12  ;;  %v10687_v3 = vld [vmem:[#allocation40_spill] sm:$0xff]  ;;  %v10688_v30 = vld [vmem:[#allocation47_spill] sm:$0xff] }
 0x1f8   : > { %2216 = vmatmul.f32.gmra.mxu2 %v10685_v60  ;;  %v1836_v55 = vpop.f32.mrf.mxu3  ;;  %v10690_v60 = vld [vmem:[#allocation45_spill] sm:$0xff] }
 0x1f9   : > { %10684 = vst [vmem:[#allocation103_spill] sm:$0xff] %v8237_v32  ;;  %v1520_v18 = vpop.f32.mrf.mxu0 }
 0x1fa   : > { %v1630_v56 = vpop.f32.mrf.mxu1  ;;  %v1521_v28 = vadd.f32 %v1520_v18, %v10691_v29  ;;  %v10692_v29 = vld [vmem:[#allocation52_spill] sm:$0xff]  ;;  %v10695_v18 = vand.u32 4294901760, %v8048_v40  ;;  %v10699_v40 = vand.u32 4294901760, %v8126_v48 }
 0x1fb   : > { %v1631_v15 = vadd.f32 %v1630_v56, %v1516_v54  ;;  %v1747_v25 = vpop.f32.mrf.mxu2 }
 0x1fc   : > { %1972 = vmatmul.f32.gmra.mxu0 %v10686_v59 }
 0x1fd   : > { %v1748_v42 = vadd.f32 %v1747_v25, %v1631_v15  ;;  %2109 = vmatmul.f32.gmra.mxu1 %v10687_v3  ;;  %2337 = vmatmul.f32.gmra.mxu3 %v10688_v30  ;;  %v6339_v25 = vsel %vm217_vm1, 1.0, %v10546_v33  ;;  %v10693_v15 = vand.u32 4294901760, %v7996_v27 }
 0x1fe   : > { %v2769_v12 = vsub.f32 %v6339_v25, %v6339_v25 }
 0x1ff   : > { %v8247_v32 = vadd.f32 %v1836_v55, %v1748_v42  ;;  %3084 = vmatpush.msrb.mxu2 %v10693_v15 }
 0x200   : > { %2221 = vmatmul.f32.gmra.mxu2 %v10690_v60  ;;  %v1840_v19 = vpop.f32.mrf.mxu3  ;;  %v2770_v55 = vand.u32 4294901760, %v2769_v12  ;;  %2870 = vmatpush.msrb.mxu0 %v2769_v12 }
 0x201   : > { %10689 = vst [vmem:[#allocation122_spill] sm:$0xff] %v8247_v32  ;;  %v1525_v4 = vpop.f32.mrf.mxu0  ;;  %3088 = vmatpush.msrb.mxu2 %v10695_v18  ;;  %v10700_v18 = vld [vmem:[#allocation53_spill] sm:$0xff] }
 0x202   : > { %v1636_v46 = vpop.f32.mrf.mxu1  ;;  %v2771_v30 = vsub.f32 %v2769_v12, %v2770_v55  ;;  %v1526_v25 = vadd.f32 %v1525_v4, %v7946_v43  ;;  %v10701_v43 = vand.u32 4294901760, %v8161_v31  ;;  %v10704_v12 = vand.u32 4294901760, %v8231_v13 }
 0x203   : > { %v1637_v39 = vadd.f32 %v1636_v46, %v1521_v28  ;;  %v1751_v54 = vpop.f32.mrf.mxu2  ;;  %v10694_v46 = vld [vmem:[#allocation44_spill] sm:$0xff]  ;;  %v10697_v28 = vld [vmem:[#allocation49_spill] sm:$0xff] }
 0x204   : > { %1980 = vmatmul.f32.gmra.mxu0 %v10692_v29  ;;  %v2772_v15 = vand.u32 4294901760, %v2771_v30  ;;  %v10703_v30 = vand.u32 4294901760, %v8196_v38 }
 0x205   : > { %v1752_v42 = vadd.f32 %v1751_v54, %v1637_v39  ;;  %2113 = vmatmul.f32.gmra.mxu1 %v10694_v46  ;;  %2343 = vmatmul.f32.gmra.mxu3 %v7410_v47  ;;  %v10698_v39 = vand.u32 4294901760, %v8079_v35 }
 0x206   : > { %2773 = vmatpush.msra.mxu3 %v2772_v15  ;;  %v10707_v15 = vld [vmem:[#allocation61_spill] sm:$0xff] }
 0x207   : > { %v8272_v56 = vadd.f32 %v1840_v19, %v1752_v42  ;;  %3092 = vmatpush.msrb.mxu2 %v10698_v39  ;;  %v10705_v42 = vld [vmem:[#allocation57_spill] sm:$0xff] }
 0x208   : > { %2226 = vmatmul.f32.gmra.mxu2 %v10697_v28  ;;  %v1844_v32 = vpop.f32.mrf.mxu3  ;;  %6488 = vmatpush.msk.msrb.mxu3 %vm245_vm9, %v10545_v1 }
 0x209   : > { %10696 = vst [vmem:[#allocation108_spill] sm:$0xff] %v8272_v56  ;;  %v1530_v27 = vpop.f32.mrf.mxu0  ;;  %3096 = vmatpush.msrb.mxu2 %v10699_v40 }
 0x20a   : > { %v1642_v54 = vpop.f32.mrf.mxu1  ;;  %6489 = vmatpush.msk.msrb.mxu3 %vm241_vm10, %v10545_v1 }
 0x20b   : > { %v1643_v47 = vadd.f32 %v1642_v54, %v1526_v25  ;;  %v1755_v60 = vpop.f32.mrf.mxu2  ;;  %3100 = vmatpush.msrb.mxu2 %v10701_v43 }
 0x20c   : > { %1988 = vmatmul.f32.gmra.mxu0 %v10700_v18  ;;  %6490 = vmatpush.msk.msrb.mxu3 %vm237_vm11, %v10545_v1 }
 0x20d   : > { %v1756_v19 = vadd.f32 %v1755_v60, %v1643_v47  ;;  %2117 = vmatmul.f32.gmra.mxu1 %v7371_v20  ;;  %2349 = vmatmul.f32.gmra.mxu3 %v7430_v41  ;;  %v1531_v47 = vadd.f32 %v1530_v27, %v7977_v44 }
 0x20e   : > { %3104 = vmatpush.msrb.mxu2 %v10703_v30  ;;  %6491 = vmatpush.msk.msrb.mxu3 %vm233_vm12, %v10545_v1 }
 0x20f   : > { %v8289_v35 = vadd.f32 %v1844_v32, %v1756_v19 }
 0x210   : > { %2231 = vmatmul.f32.gmra.mxu2 %v7421_v62  ;;  %v1848_v48 = vpop.f32.mrf.mxu3  ;;  %6492 = vmatpush.msk.msrb.mxu3 %vm229_vm13, %v10545_v1 }
 0x211   : > { %10702 = vst [vmem:[#allocation123_spill] sm:$0xff] %v8289_v35  ;;  %v1535_v60 = vpop.f32.mrf.mxu0  ;;  %3108 = vmatpush.msrb.mxu2 %v10704_v12 }
 0x212   : > { %v1648_v4 = vpop.f32.mrf.mxu1  ;;  %6493 = vmatpush.msk.msrb.mxu3 %vm225_vm14, %v10545_v1  ;;  %v1536_v25 = vadd.f32 %v1535_v60, %v8021_v23 }
 0x213   : > { %v1649_v31 = vadd.f32 %v1648_v4, %v1531_v47  ;;  %v1759_v32 = vpop.f32.mrf.mxu2  ;;  %3112 = vmatpush.msrb.mxu2 %v2770_v55  ;;  %v10709_v4 = vld [vmem:[#allocation63_spill] sm:$0xff] }
 0x214   : > { %1996 = vmatmul.f32.gmra.mxu0 %v10705_v42  ;;  %6494 = vmatpush.msk.msrb.mxu3 %vm221_vm15, %v10545_v1 }
 0x215   : > { %v1760_v44 = vadd.f32 %v1759_v32, %v1649_v31  ;;  %2121 = vmatmul.f32.gmra.mxu1 %v7412_v52  ;;  %2355 = vmatmul.f32.gmra.mxu3 %v10646_v57  ;;  %v10711_v32 = vld [vmem:[#allocation60_spill] sm:$0xff] }
 0x216   : > { %6495 = vmatpush.msk.msrb.mxu3 %vm217_vm1, %v10545_v1 }
 0x217   : > { %v8316_v38 = vadd.f32 %v1848_v48, %v1760_v44 }
 0x218   : > { %2236 = vmatmul.f32.gmra.mxu2 %v7457_v63  ;;  %v1852_v13 = vpop.f32.mrf.mxu3 }
 0x219   : > { %10706 = vst [vmem:[#allocation124_spill] sm:$0xff] %v8316_v38  ;;  %v1540_v27 = vpop.f32.mrf.mxu0  ;;  %v10727_v38 = vld [vmem:[#allocation36_spill] sm:$0xff] }
 0x21a   : > { %v1654_v39 = vpop.f32.mrf.mxu1  ;;  %v1541_v43 = vadd.f32 %v1540_v27, %v8045_v36 }
 0x21b   : > { %v1655_v55 = vadd.f32 %v1654_v39, %v1536_v25  ;;  %v1763_v54 = vpop.f32.mrf.mxu2 }
 0x21c   : > { %2004 = vmatmul.f32.gmra.mxu0 %v10707_v15 }
 0x21d   : > { %v1764_v40 = vadd.f32 %v1763_v54, %v1655_v55  ;;  %2125 = vmatmul.f32.gmra.mxu1 %v7432_v0  ;;  %2361 = vmatmul.f32.gmra.mxu3 %v10650_v37  ;;  %v10712_v55 = vld [vmem:[#allocation59_spill] sm:$0xff] }
 0x21f   : > { %v8335_v23 = vadd.f32 %v1852_v13, %v1764_v40 }
 0x220   : > { %2241 = vmatmul.f32.gmra.mxu2 %v10645_v22  ;;  %v1856_v19 = vpop.f32.mrf.mxu3 }
 0x221   : > { %10708 = vst [vmem:[#allocation125_spill] sm:$0xff] %v8335_v23  ;;  %v1545_v48 = vpop.f32.mrf.mxu0 }
 0x222   : > { %v1660_v47 = vpop.f32.mrf.mxu1  ;;  %v1546_v44 = vadd.f32 %v1545_v48, %v8059_v58 }
 0x223   : > { %v1661_v60 = vadd.f32 %v1660_v47, %v1541_v43  ;;  %v1767_v30 = vpop.f32.mrf.mxu2 }
 0x224   : > { %2012 = vmatmul.f32.gmra.mxu0 %v10709_v4 }
 0x225   : > { %v1768_v21 = vadd.f32 %v1767_v30, %v1661_v60  ;;  %2129 = vmatmul.f32.gmra.mxu1 %v7472_v24  ;;  %2367 = vmatmul.f32.gmra.mxu3 %v10653_v51 }
 0x227   : > { %v8342_v31 = vadd.f32 %v1856_v19, %v1768_v21 }
 0x228   : > { %2246 = vmatmul.f32.gmra.mxu2 %v10711_v32  ;;  %v1860_v12 = vpop.f32.mrf.mxu3 }
 0x229   : > { %10710 = vst [vmem:[#allocation126_spill] sm:$0xff] %v8342_v31  ;;  %v1893_v13 = vpop.f32.mrf.mxu0 }
 0x22a   : > { %v1666_v36 = vpop.f32.mrf.mxu1 }
 0x22b   : > { %v1667_v25 = vadd.f32 %v1666_v36, %v1546_v44  ;;  %v1771_v27 = vpop.f32.mrf.mxu2 }
 0x22c   : > { %2412 = vmatmul.f32.vlgmr.msra.gmra.mxu0 %v6788_v6 }
 0x22d   : > { %v1772_v39 = vadd.f32 %v1771_v27, %v1667_v25  ;;  %2133 = vmatmul.f32.gmra.mxu1 %v10712_v55  ;;  %2775 = vmatmul.f32.vlgmr.msra.gmra.mxu3 %v6788_v6 }
 0x22f   : > { %v8349_v54 = vadd.f32 %v1860_v12, %v1772_v39 }
 0x230   : > { %2594 = vmatmul.f32.vlgmr.msra.gmra.mxu2 %v10652_v26  ;;  %v2278_v40 = vpop.f32.mrf.mxu3 }
 0x231   : > { %10713 = vst [vmem:[#allocation127_spill] sm:$0xff] %v8349_v54  ;;  %v1901_v19 = vpop.f32.mrf.mxu0  ;;  %v10722_v54 = vld [vmem:[#allocation28_spill] sm:$0xff] }
 0x232   : > { %v2074_v43 = vpop.f32.mrf.mxu1 }
 0x233   : > { %v2075_v47 = vadd.f32 %v2074_v43, %v1893_v13  ;;  %v2172_v58 = vpop.f32.mrf.mxu2 }
 0x234   : > { %2416 = vmatmul.f32.gmra.mxu0 %v6794_v8 }
 0x235   : > { %v2173_v48 = vadd.f32 %v2172_v58, %v2075_v47  ;;  %2501 = vmatmul.f32.vlgmr.msra.gmra.mxu1 %v6788_v6  ;;  %2779 = vmatmul.f32.gmra.mxu3 %v6794_v8 }
 0x237   : > { %v8355_v60 = vadd.f32 %v2278_v40, %v2173_v48 }
 0x238   : > { %2602 = vmatmul.f32.gmra.mxu2 %v7063_v50  ;;  %v2284_v30 = vpop.f32.mrf.mxu3 }
 0x239   : > { %10714 = vst [vmem:[#allocation128_spill] sm:$0xff] %v8355_v60  ;;  %v1909_v21 = vpop.f32.mrf.mxu0 }
 0x23a   : > { %v2078_v12 = vpop.f32.mrf.mxu1 }
 0x23b   : > { %v2079_v44 = vadd.f32 %v2078_v12, %v1901_v19  ;;  %v2177_v36 = vpop.f32.mrf.mxu2 }
 0x23c   : > { %2420 = vmatmul.f32.gmra.mxu0 %v6996_v61 }
 0x23d   : > { %v2178_v13 = vadd.f32 %v2177_v36, %v2079_v44  ;;  %2505 = vmatmul.f32.gmra.mxu1 %v6794_v8  ;;  %2783 = vmatmul.f32.gmra.mxu3 %v6996_v61 }
 0x23f   : > { %v8361_v25 = vadd.f32 %v2284_v30, %v2178_v13 }
 0x240   : > { %2610 = vmatmul.f32.gmra.mxu2 %v7112_v34  ;;  %v2290_v27 = vpop.f32.mrf.mxu3 }
 0x241   : > { %10715 = vst [vmem:[#allocation129_spill] sm:$0xff] %v8361_v25  ;;  %v1917_v39 = vpop.f32.mrf.mxu0  ;;  %v10719_v25 = vld [vmem:[#allocation24_spill] sm:$0xff] }
 0x242   : > { %v2082_v40 = vpop.f32.mrf.mxu1 }
 0x243   : > { %v2083_v43 = vadd.f32 %v2082_v40, %v1909_v21  ;;  %v2182_v47 = vpop.f32.mrf.mxu2  ;;  %v10718_v40 = vld [vmem:[#allocation26_spill] sm:$0xff] }
 0x244   : > { %2424 = vmatmul.f32.gmra.mxu0 %v7060_v49 }
 0x245   : > { %v2183_v19 = vadd.f32 %v2182_v47, %v2083_v43  ;;  %2509 = vmatmul.f32.gmra.mxu1 %v6996_v61  ;;  %2787 = vmatmul.f32.gmra.mxu3 %v7060_v49 }
 0x247   : > { %v8367_v58 = vadd.f32 %v2290_v27, %v2183_v19 }
 0x248   : > { %2618 = vmatmul.f32.gmra.mxu2 %v7154_v45  ;;  %v2296_v48 = vpop.f32.mrf.mxu3 }
 0x249   : > { %10716 = vst [vmem:[#allocation130_spill] sm:$0xff] %v8367_v58  ;;  %v1925_v30 = vpop.f32.mrf.mxu0 }
 0x24a   : > { %v2086_v12 = vpop.f32.mrf.mxu1 }
 0x24b   : > { %v2087_v44 = vadd.f32 %v2086_v12, %v1917_v39  ;;  %v2187_v36 = vpop.f32.mrf.mxu2 }
 0x24c   : > { %2428 = vmatmul.f32.gmra.mxu0 %v10661_v2 }
 0x24d   : > { %v2188_v21 = vadd.f32 %v2187_v36, %v2087_v44  ;;  %2513 = vmatmul.f32.gmra.mxu1 %v7060_v49  ;;  %2791 = vmatmul.f32.gmra.mxu3 %v10661_v2  ;;  %v10721_v44 = vld [vmem:[#allocation30_spill] sm:$0xff] }
 0x24f   : > { %v8373_v13 = vadd.f32 %v2296_v48, %v2188_v21 }
 0x250   : > { %2626 = vmatmul.f32.gmra.mxu2 %v10718_v40  ;;  %v2302_v27 = vpop.f32.mrf.mxu3  ;;  %v10756_v40 = vld [vmem:[#allocation21_spill] sm:$0xff] }
 0x251   : > { %10717 = vst [vmem:[#allocation131_spill] sm:$0xff] %v8373_v13  ;;  %v1933_v43 = vpop.f32.mrf.mxu0 }
 0x252   : > { %v2090_v47 = vpop.f32.mrf.mxu1 }
 0x253   : > { %v2091_v19 = vadd.f32 %v2090_v47, %v1925_v30  ;;  %v2192_v58 = vpop.f32.mrf.mxu2  ;;  %v10724_v47 = vld [vmem:[#allocation34_spill] sm:$0xff] }
 0x254   : > { %2432 = vmatmul.f32.gmra.mxu0 %v10719_v25 }
 0x255   : > { %v2193_v39 = vadd.f32 %v2192_v58, %v2091_v19  ;;  %2517 = vmatmul.f32.gmra.mxu1 %v10661_v2  ;;  %2795 = vmatmul.f32.gmra.mxu3 %v10719_v25 }
 0x257   : > { %v8379_v12 = vadd.f32 %v2302_v27, %v2193_v39 }
 0x258   : > { %2634 = vmatmul.f32.gmra.mxu2 %v10721_v44  ;;  %v2308_v48 = vpop.f32.mrf.mxu3 }
 0x259   : > { %10720 = vst [vmem:[#allocation132_spill] sm:$0xff] %v8379_v12  ;;  %v1941_v36 = vpop.f32.mrf.mxu0 }
 0x25a   : > { %v2094_v21 = vpop.f32.mrf.mxu1 }
 0x25b   : > { %v2095_v13 = vadd.f32 %v2094_v21, %v1933_v43  ;;  %v2197_v60 = vpop.f32.mrf.mxu2 }
 0x25c   : > { %2436 = vmatmul.f32.gmra.mxu0 %v10722_v54 }
 0x25d   : > { %v2198_v30 = vadd.f32 %v2197_v60, %v2095_v13  ;;  %2521 = vmatmul.f32.gmra.mxu1 %v10719_v25  ;;  %2799 = vmatmul.f32.gmra.mxu3 %v10722_v54  ;;  %v10726_v13 = vld [vmem:[#allocation38_spill] sm:$0xff] }
 0x25f   : > { %v8385_v58 = vadd.f32 %v2308_v48, %v2198_v30 }
 0x260   : > { %2642 = vmatmul.f32.gmra.mxu2 %v10724_v47  ;;  %v2314_v27 = vpop.f32.mrf.mxu3 }
 0x261   : > { %10723 = vst [vmem:[#allocation133_spill] sm:$0xff] %v8385_v58  ;;  %v1949_v19 = vpop.f32.mrf.mxu0 }
 0x262   : > { %v2098_v39 = vpop.f32.mrf.mxu1 }
 0x263   : > { %v2099_v12 = vadd.f32 %v2098_v39, %v1941_v36  ;;  %v2202_v31 = vpop.f32.mrf.mxu2 }
 0x264   : > { %2440 = vmatmul.f32.gmra.mxu0 %v10677_v53 }
 0x265   : > { %v2203_v43 = vadd.f32 %v2202_v31, %v2099_v12  ;;  %2525 = vmatmul.f32.gmra.mxu1 %v10722_v54  ;;  %2803 = vmatmul.f32.gmra.mxu3 %v10677_v53  ;;  %v10729_v12 = vld [vmem:[#allocation42_spill] sm:$0xff] }
 0x267   : > { %v8391_v60 = vadd.f32 %v2314_v27, %v2203_v43 }
 0x268   : > { %2650 = vmatmul.f32.gmra.mxu2 %v10726_v13  ;;  %v2320_v48 = vpop.f32.mrf.mxu3 }
 0x269   : > { %10725 = vst [vmem:[#allocation134_spill] sm:$0xff] %v8391_v60  ;;  %v1957_v21 = vpop.f32.mrf.mxu0 }
 0x26a   : > { %v2102_v30 = vpop.f32.mrf.mxu1 }
 0x26b   : > { %v2103_v58 = vadd.f32 %v2102_v30, %v1949_v19  ;;  %v2207_v23 = vpop.f32.mrf.mxu2 }
 0x26c   : > { %2444 = vmatmul.f32.gmra.mxu0 %v10727_v38 }
 0x26d   : > { %v2208_v36 = vadd.f32 %v2207_v23, %v2103_v58  ;;  %2529 = vmatmul.f32.gmra.mxu1 %v10677_v53  ;;  %2807 = vmatmul.f32.gmra.mxu3 %v10727_v38  ;;  %v10731_v58 = vld [vmem:[#allocation46_spill] sm:$0xff] }
 0x26f   : > { %v8397_v31 = vadd.f32 %v2320_v48, %v2208_v36 }
 0x270   : > { %2658 = vmatmul.f32.gmra.mxu2 %v10729_v12  ;;  %v2326_v27 = vpop.f32.mrf.mxu3 }
 0x271   : > { %10728 = vst [vmem:[#allocation135_spill] sm:$0xff] %v8397_v31  ;;  %v1965_v39 = vpop.f32.mrf.mxu0 }
 0x272   : > { %v2106_v43 = vpop.f32.mrf.mxu1 }
 0x273   : > { %v2107_v60 = vadd.f32 %v2106_v43, %v1957_v21  ;;  %v2212_v35 = vpop.f32.mrf.mxu2 }
 0x274   : > { %2448 = vmatmul.f32.gmra.mxu0 %v10687_v3 }
 0x275   : > { %v2213_v19 = vadd.f32 %v2212_v35, %v2107_v60  ;;  %2533 = vmatmul.f32.gmra.mxu1 %v10727_v38  ;;  %2811 = vmatmul.f32.gmra.mxu3 %v10687_v3 }
 0x277   : > { %v8403_v23 = vadd.f32 %v2326_v27, %v2213_v19 }
 0x278   : > { %2666 = vmatmul.f32.gmra.mxu2 %v10731_v58  ;;  %v2332_v48 = vpop.f32.mrf.mxu3 }
 0x279   : > { %10730 = vst [vmem:[#allocation136_spill] sm:$0xff] %v8403_v23  ;;  %v1973_v30 = vpop.f32.mrf.mxu0 }
 0x27a   : > { %v2110_v36 = vpop.f32.mrf.mxu1 }
 0x27b   : > { %v2111_v31 = vadd.f32 %v2110_v36, %v1965_v39  ;;  %v2217_v56 = vpop.f32.mrf.mxu2 }
 0x27c   : > { %2452 = vmatmul.f32.gmra.mxu0 %v10694_v46 }
 0x27d   : > { %v2218_v21 = vadd.f32 %v2217_v56, %v2111_v31  ;;  %2537 = vmatmul.f32.gmra.mxu1 %v10687_v3  ;;  %2815 = vmatmul.f32.gmra.mxu3 %v10694_v46 }
 0x27f   : > { %v8409_v35 = vadd.f32 %v2332_v48, %v2218_v21 }
 0x280   : > { %2674 = vmatmul.f32.gmra.mxu2 %v10686_v59  ;;  %v2338_v60 = vpop.f32.mrf.mxu3 }
 0x281   : > { %10732 = vst [vmem:[#allocation137_spill] sm:$0xff] %v8409_v35  ;;  %v1981_v27 = vpop.f32.mrf.mxu0 }
 0x282   : > { %v2114_v43 = vpop.f32.mrf.mxu1 }
 0x283   : > { %v2115_v19 = vadd.f32 %v2114_v43, %v1973_v30  ;;  %v2222_v23 = vpop.f32.mrf.mxu2  ;;  %v8429_v30 = vld [vmem:[%s8423_s4] sm:$0xf] }
 0x284   : > { %2456 = vmatmul.f32.gmra.mxu0 %v7371_v20 }
 0x285   : > { %v2223_v39 = vadd.f32 %v2222_v23, %v2115_v19  ;;  %2541 = vmatmul.f32.gmra.mxu1 %v10694_v46  ;;  %2819 = vmatmul.f32.gmra.mxu3 %v7371_v20 }
 0x287   : > { %v8415_v56 = vadd.f32 %v2338_v60, %v2223_v39  ;;  %v8435_v39 = vperm.slane %v8429_v30, 0 }
 0x288   : > { %2682 = vmatmul.f32.gmra.mxu2 %v10692_v29  ;;  %v2344_v31 = vpop.f32.mrf.mxu3 }
 0x289   : > { %10733 = vst [vmem:[#allocation138_spill] sm:$0xff] %v8415_v56  ;;  %v1989_v48 = vpop.f32.mrf.mxu0  ;;  %vm342_vm0 = vcmp.eq.s32.totalorder %v6792_v7, %v8435_v39  ;;  %vm338_vm2 = vcmp.eq.s32.totalorder %v6804_v9, %v8435_v39  ;;  %vm334_vm3 = vcmp.eq.s32.totalorder %v6807_v10, %v8435_v39  ;;  %vm330_vm4 = vcmp.eq.s32.totalorder %v6810_v11, %v8435_v39 }
 0x28a   : > { %v2118_v36 = vpop.f32.mrf.mxu1  ;;  %6496 = vmatpush.msk.msra.mxu0 %vm342_vm0, %v10545_v1  ;;  %6504 = vmatpush.msk.msra.mxu3 %vm342_vm0, %v10545_v1  ;;  %vm326_vm5 = vcmp.eq.s32.totalorder %v6819_v14, %v8435_v39  ;;  %vm322_vm6 = vcmp.eq.s32.totalorder %v6825_v16, %v8435_v39  ;;  %vm318_vm7 = vcmp.eq.s32.totalorder %v6828_v17, %v8435_v39 }
 0x28b   : > { %v2119_v21 = vadd.f32 %v2118_v36, %v1981_v27  ;;  %v2227_v35 = vpop.f32.mrf.mxu2  ;;  %vm314_vm8 = vcmp.eq.s32.totalorder %v6786_v5, %v8435_v39 }
 0x28c   : > { %2460 = vmatmul.f32.gmra.mxu0 %v7412_v52  ;;  %6505 = vmatpush.msk.msra.mxu3 %vm338_vm2, %v10545_v1 }
 0x28d   : > { %v2228_v23 = vadd.f32 %v2227_v35, %v2119_v21  ;;  %2545 = vmatmul.f32.gmra.mxu1 %v7371_v20  ;;  %2823 = vmatmul.f32.gmra.mxu3 %v7412_v52 }
 0x28e   : > { %6497 = vmatpush.msk.msra.mxu0 %vm338_vm2, %v10545_v1  ;;  %6506 = vmatpush.msk.msra.mxu3 %vm334_vm3, %v10545_v1 }
 0x28f   : > { %v8431_v60 = vadd.f32 %v2344_v31, %v2228_v23  ;;  %v6396_v31 = vsel %vm342_vm0, 1.0, %v10546_v33 }
 0x290   : > { %2690 = vmatmul.f32.gmra.mxu2 %v10700_v18  ;;  %v2350_v27 = vpop.f32.mrf.mxu3  ;;  %v8446_v21 = vsub.f32 %v6396_v31, %v6396_v31  ;;  %6498 = vmatpush.msk.msra.mxu0 %vm334_vm3, %v10545_v1 }
 0x291   : > { %10734 = vst [vmem:[#allocation139_spill] sm:$0xff] %v8431_v60  ;;  %v1997_v43 = vpop.f32.mrf.mxu0  ;;  %6507 = vmatpush.msk.msra.mxu3 %vm330_vm4, %v10545_v1 }
 0x292   : > { %v2122_v19 = vpop.f32.mrf.mxu1  ;;  %v10396_v23 = vand.u32 4294901760, %v8446_v21  ;;  %3551 = vmatpush.msra.mxu2 %v8446_v21  ;;  %6499 = vmatpush.msk.msra.mxu0 %vm330_vm4, %v10545_v1 }
 0x293   : > { %v2123_v36 = vadd.f32 %v2122_v19, %v1989_v48  ;;  %v2232_v56 = vpop.f32.mrf.mxu2  ;;  %6508 = vmatpush.msk.msra.mxu3 %vm326_vm5, %v10545_v1 }
 0x294   : > { %2464 = vmatmul.f32.gmra.mxu0 %v7432_v0  ;;  %v3431_v31 = vsub.f32 %v8446_v21, %v10396_v23 }
 0x295   : > { %v2233_v35 = vadd.f32 %v2232_v56, %v2123_v36  ;;  %2549 = vmatmul.f32.gmra.mxu1 %v7412_v52  ;;  %2827 = vmatmul.f32.gmra.mxu3 %v7432_v0 }
 0x296   : > { %v3432_v29 = vand.u32 4294901760, %v3431_v31  ;;  %6500 = vmatpush.msk.msra.mxu0 %vm326_vm5, %v10545_v1  ;;  %6509 = vmatpush.msk.msra.mxu3 %vm322_vm6, %v10545_v1 }
 0x297   : > { %v8456_v56 = vadd.f32 %v2350_v27, %v2233_v35 }
 0x298   : > { %2698 = vmatmul.f32.gmra.mxu2 %v10705_v42  ;;  %v2356_v48 = vpop.f32.mrf.mxu3  ;;  %3433 = vmatpush.msra.mxu1 %v3432_v29 }
 0x299   : > { %10735 = vst [vmem:[#allocation140_spill] sm:$0xff] %v8456_v56  ;;  %v2005_v19 = vpop.f32.mrf.mxu0  ;;  %6501 = vmatpush.msk.msra.mxu0 %vm322_vm6, %v10545_v1  ;;  %6510 = vmatpush.msk.msra.mxu3 %vm318_vm7, %v10545_v1 }
 0x29a   : > { %v2126_v36 = vpop.f32.mrf.mxu1 }
 0x29b   : > { %v2127_v60 = vadd.f32 %v2126_v36, %v1997_v43  ;;  %v2237_v18 = vpop.f32.mrf.mxu2  ;;  %6502 = vmatpush.msk.msra.mxu0 %vm318_vm7, %v10545_v1  ;;  %6511 = vmatpush.msk.msra.mxu3 %vm314_vm8, %v10545_v1 }
 0x29c   : > { %2468 = vmatmul.f32.gmra.mxu0 %v7472_v24 }
 0x29d   : > { %v2238_v27 = vadd.f32 %v2237_v18, %v2127_v60  ;;  %2553 = vmatmul.f32.gmra.mxu1 %v7432_v0  ;;  %2831 = vmatmul.f32.gmra.mxu3 %v7472_v24  ;;  %v6392_v18 = vsel %vm338_vm2, 1.0, %v10546_v33 }
 0x29e   : > { %v8485_v29 = vsub.f32 %v6392_v18, %v6392_v18  ;;  %6503 = vmatpush.msk.msra.mxu0 %vm314_vm8, %v10545_v1 }
 0x29f   : > { %v8467_v35 = vadd.f32 %v2356_v48, %v2238_v27 }
 0x2a0   : > { %2706 = vmatmul.f32.gmra.mxu2 %v10707_v15  ;;  %v2362_v56 = vpop.f32.mrf.mxu3  ;;  %v10398_v60 = vand.u32 4294901760, %v8485_v29 }
 0x2a1   : > { %10736 = vst [vmem:[#allocation141_spill] sm:$0xff] %v8467_v35  ;;  %v2013_v42 = vpop.f32.mrf.mxu0  ;;  %3554 = vmatpush.msra.mxu2 %v8485_v29  ;;  %v10739_v35 = vld [vmem:[#allocation7_spill] sm:$0xff] }
 0x2a2   : > { %v2130_v59 = vpop.f32.mrf.mxu1  ;;  %v3437_v31 = vsub.f32 %v8485_v29, %v10398_v60 }
 0x2a3   : > { %v2131_v43 = vadd.f32 %v2130_v59, %v2005_v19  ;;  %v2242_v36 = vpop.f32.mrf.mxu2 }
 0x2a4   : > { %2472 = vmatmul.f32.gmra.mxu0 %v10712_v55 }
 0x2a5   : > { %v2243_v59 = vadd.f32 %v2242_v36, %v2131_v43  ;;  %2557 = vmatmul.f32.gmra.mxu1 %v7472_v24  ;;  %2835 = vmatmul.f32.gmra.mxu3 %v10712_v55  ;;  %v3438_v36 = vand.u32 4294901760, %v3437_v31 }
 0x2a7   : > { %v8491_v48 = vadd.f32 %v2362_v56, %v2243_v59  ;;  %3439 = vmatpush.msra.mxu1 %v3438_v36 }
 0x2a8   : > { %2714 = vmatmul.f32.gmra.mxu2 %v10709_v4  ;;  %v2368_v19 = vpop.f32.mrf.mxu3  ;;  %v10748_v4 = vld [vmem:[#allocation11_spill] sm:$0xff] }
 0x2a9   : > { %10737 = vst [vmem:[#allocation142_spill] sm:$0xff] %v8491_v48  ;;  %v8497_v27 = vpop.f32.mrf.mxu0 }
 0x2aa   : > { %10738 = vst [vmem:[#allocation143_spill] sm:$0xff] %v8497_v27  ;;  %v2134_v43 = vpop.f32.mrf.mxu1  ;;  %v10747_v27 = vld [vmem:[#allocation13_spill] sm:$0xff] }
 0x2ab   : > { %v2135_v18 = vadd.f32 %v2134_v43, %v2013_v42  ;;  %v2247_v23 = vpop.f32.mrf.mxu2  ;;  %v10744_v43 = vld [vmem:[#allocation8_spill] sm:$0xff] }
 0x2ac   : > { %2873 = vmatmul.f32.vlgmr.msrb.gmra.mxu0 %v10739_v35 }
 0x2ad   : > { %v2248_v15 = vadd.f32 %v2247_v23, %v2135_v18  ;;  %2561 = vmatmul.f32.gmra.mxu1 %v10712_v55  ;;  %3203 = vmatmul.f32.vlgmr.msrb.gmra.mxu3 %v6788_v6  ;;  %v6388_v23 = vsel %vm334_vm3, 1.0, %v10546_v33 }
 0x2ae   : > { %v8526_v31 = vsub.f32 %v6388_v23, %v6388_v23 }
 0x2af   : > { %v8502_v56 = vadd.f32 %v2368_v19, %v2248_v15  ;;  %v10743_v19 = vld [vmem:[#allocation9_spill] sm:$0xff] }
 0x2b0   : > { %3114 = vmatmul.f32.vlgmr.msrb.gmra.mxu2 %v6788_v6  ;;  %v2776_v59 = vpop.f32.mrf.mxu3  ;;  %v10400_v36 = vand.u32 4294901760, %v8526_v31 }
 0x2b1   : > { %10740 = vst [vmem:[#allocation144_spill] sm:$0xff] %v8502_v56  ;;  %v8505_v60 = vpop.f32.mrf.mxu0  ;;  %3557 = vmatpush.msra.mxu2 %v8526_v31 }
 0x2b2   : > { %10741 = vst [vmem:[#allocation145_spill] sm:$0xff] %v8505_v60  ;;  %v8507_v48 = vpop.f32.mrf.mxu1 }
 0x2b3   : > { %10742 = vst [vmem:[#allocation146_spill] sm:$0xff] %v8507_v48  ;;  %v2595_v42 = vpop.f32.mrf.mxu2 }
 0x2b4   : > { %v8523_v15 = vadd.f32 %v2776_v59, %v2595_v42  ;;  %2878 = vmatmul.f32.gmra.mxu0 %v10743_v19  ;;  %v3443_v59 = vsub.f32 %v8526_v31, %v10400_v36 }
 0x2b5   : > { %2979 = vmatmul.f32.vlgmr.msrb.gmra.mxu1 %v10744_v43  ;;  %3207 = vmatmul.f32.gmra.mxu3 %v6794_v8 }
 0x2b6   : > { %v3444_v23 = vand.u32 4294901760, %v3443_v59 }
 0x2b8   : > { %3118 = vmatmul.f32.gmra.mxu2 %v6794_v8  ;;  %v2780_v18 = vpop.f32.mrf.mxu3  ;;  %3445 = vmatpush.msra.mxu1 %v3444_v23  ;;  %v10751_v23 = vld [vmem:[#allocation17_spill] sm:$0xff] }
 0x2b9   : > { %v8536_v42 = vpop.f32.mrf.mxu0 }
 0x2ba   : > { %10745 = vst [vmem:[#allocation147_spill] sm:$0xff] %v8536_v42  ;;  %v8538_v56 = vpop.f32.mrf.mxu1 }
 0x2bb   : > { %10746 = vst [vmem:[#allocation148_spill] sm:$0xff] %v8538_v56  ;;  %v2603_v60 = vpop.f32.mrf.mxu2 }
 0x2bc   : > { %v8540_v48 = vadd.f32 %v2780_v18, %v2603_v60  ;;  %2883 = vmatmul.f32.gmra.mxu0 %v10747_v27  ;;  %v6384_v60 = vsel %vm330_vm4, 1.0, %v10546_v33 }
 0x2bd   : > { %2985 = vmatmul.f32.gmra.mxu1 %v10748_v4  ;;  %3211 = vmatmul.f32.gmra.mxu3 %v6996_v61 }
 0x2c0   : > { %3122 = vmatmul.f32.gmra.mxu2 %v6996_v61  ;;  %v2784_v58 = vpop.f32.mrf.mxu3 }
 0x2c1   : > { %v8546_v12 = vpop.f32.mrf.mxu0 }
 0x2c2   : > { %10749 = vst [vmem:[#allocation149_spill] sm:$0xff] %v8546_v12  ;;  %v8548_v36 = vpop.f32.mrf.mxu1  ;;  %v8567_v12 = vsub.f32 %v6384_v60, %v6384_v60 }
 0x2c3   : > { %10750 = vst [vmem:[#allocation150_spill] sm:$0xff] %v8548_v36  ;;  %v2611_v59 = vpop.f32.mrf.mxu2  ;;  %v10752_v36 = vld [vmem:[#allocation14_spill] sm:$0xff] }
 0x2c4   : > { %v8564_v18 = vadd.f32 %v2784_v58, %v2611_v59  ;;  %2888 = vmatmul.f32.gmra.mxu0 %v10751_v23  ;;  %3560 = vmatpush.msra.mxu2 %v8567_v12  ;;  %v10405_v42 = vand.u32 4294901760, %v8567_v12  ;;  %v10757_v23 = vld [vmem:[#allocation19_spill] sm:$0xff] }
 0x2c5   : > { %2991 = vmatmul.f32.gmra.mxu1 %v10752_v36  ;;  %3215 = vmatmul.f32.gmra.mxu3 %v7060_v49 }
 0x2c6   : > { %v3449_v58 = vsub.f32 %v8567_v12, %v10405_v42 }
 0x2c8   : > { %3126 = vmatmul.f32.gmra.mxu2 %v7060_v49  ;;  %v2788_v56 = vpop.f32.mrf.mxu3  ;;  %v3450_v60 = vand.u32 4294901760, %v3449_v58 }
 0x2c9   : > { %v8577_v59 = vpop.f32.mrf.mxu0 }
 0x2ca   : > { %10753 = vst [vmem:[#allocation151_spill] sm:$0xff] %v8577_v59  ;;  %v8579_v13 = vpop.f32.mrf.mxu1  ;;  %3451 = vmatpush.msra.mxu1 %v3450_v60  ;;  %v10761_v60 = vld [vmem:[#allocation25_spill] sm:$0xff] }
 0x2cb   : > { %10754 = vst [vmem:[#allocation152_spill] sm:$0xff] %v8579_v13  ;;  %v2619_v47 = vpop.f32.mrf.mxu2 }
 0x2cc   : > { %v8581_v44 = vadd.f32 %v2788_v56, %v2619_v47  ;;  %2893 = vmatmul.f32.gmra.mxu0 %v10756_v40  ;;  %v6380_v47 = vsel %vm326_vm5, 1.0, %v10546_v33  ;;  %v10766_v40 = vld [vmem:[#allocation29_spill] sm:$0xff] }
 0x2cd   : > { %2997 = vmatmul.f32.gmra.mxu1 %v10757_v23  ;;  %3219 = vmatmul.f32.gmra.mxu3 %v10661_v2 }
 0x2ce   : > { %10755 = vst [vmem:[#allocation153_spill] sm:$0xff] %v8581_v44 }
 0x2d0   : > { %3130 = vmatmul.f32.gmra.mxu2 %v10661_v2  ;;  %v2792_v49 = vpop.f32.mrf.mxu3 }
 0x2d1   : > { %v8587_v61 = vpop.f32.mrf.mxu0 }
 0x2d2   : > { %10758 = vst [vmem:[#allocation154_spill] sm:$0xff] %v8587_v61  ;;  %v8589_v42 = vpop.f32.mrf.mxu1  ;;  %v8608_v61 = vsub.f32 %v6380_v47, %v6380_v47 }
 0x2d3   : > { %10759 = vst [vmem:[#allocation155_spill] sm:$0xff] %v8589_v42  ;;  %v2627_v58 = vpop.f32.mrf.mxu2  ;;  %v10762_v42 = vld [vmem:[#allocation23_spill] sm:$0xff] }
 0x2d4   : > { %v8605_v56 = vadd.f32 %v2792_v49, %v2627_v58  ;;  %2898 = vmatmul.f32.gmra.mxu0 %v10761_v60  ;;  %3563 = vmatpush.msra.mxu2 %v8608_v61  ;;  %v10408_v59 = vand.u32 4294901760, %v8608_v61 }
 0x2d5   : > { %3003 = vmatmul.f32.gmra.mxu1 %v10762_v42  ;;  %3223 = vmatmul.f32.gmra.mxu3 %v10719_v25  ;;  %v10767_v42 = vld [vmem:[#allocation27_spill] sm:$0xff] }
 0x2d6   : > { %10760 = vst [vmem:[#allocation156_spill] sm:$0xff] %v8605_v56  ;;  %v3455_v49 = vsub.f32 %v8608_v61, %v10408_v59 }
 0x2d8   : > { %3134 = vmatmul.f32.gmra.mxu2 %v10719_v25  ;;  %v2796_v13 = vpop.f32.mrf.mxu3  ;;  %v3456_v47 = vand.u32 4294901760, %v3455_v49 }
 0x2d9   : > { %v8618_v58 = vpop.f32.mrf.mxu0 }
 0x2da   : > { %10763 = vst [vmem:[#allocation157_spill] sm:$0xff] %v8618_v58  ;;  %v8620_v60 = vpop.f32.mrf.mxu1  ;;  %3457 = vmatpush.msra.mxu1 %v3456_v47  ;;  %v10771_v47 = vld [vmem:[#allocation33_spill] sm:$0xff] }
 0x2db   : > { %10764 = vst [vmem:[#allocation158_spill] sm:$0xff] %v8620_v60  ;;  %v2635_v2 = vpop.f32.mrf.mxu2 }
 0x2dc   : > { %v8622_v56 = vadd.f32 %v2796_v13, %v2635_v2  ;;  %2903 = vmatmul.f32.gmra.mxu0 %v10766_v40  ;;  %v6376_v2 = vsel %vm322_vm6, 1.0, %v10546_v33  ;;  %v10776_v40 = vld [vmem:[#allocation37_spill] sm:$0xff] }
 0x2dd   : > { %3009 = vmatmul.f32.gmra.mxu1 %v10767_v42  ;;  %3227 = vmatmul.f32.gmra.mxu3 %v10722_v54 }
 0x2de   : > { %10765 = vst [vmem:[#allocation159_spill] sm:$0xff] %v8622_v56 }
 0x2e0   : > { %3138 = vmatmul.f32.gmra.mxu2 %v10722_v54  ;;  %v2800_v25 = vpop.f32.mrf.mxu3 }
 0x2e1   : > { %v8628_v44 = vpop.f32.mrf.mxu0 }
 0x2e2   : > { %10768 = vst [vmem:[#allocation160_spill] sm:$0xff] %v8628_v44  ;;  %v8630_v59 = vpop.f32.mrf.mxu1  ;;  %v8649_v44 = vsub.f32 %v6376_v2, %v6376_v2 }
 0x2e3   : > { %10769 = vst [vmem:[#allocation161_spill] sm:$0xff] %v8630_v59  ;;  %v2643_v49 = vpop.f32.mrf.mxu2  ;;  %v10772_v59 = vld [vmem:[#allocation31_spill] sm:$0xff] }
 0x2e4   : > { %v8646_v13 = vadd.f32 %v2800_v25, %v2643_v49  ;;  %2908 = vmatmul.f32.gmra.mxu0 %v10771_v47  ;;  %3566 = vmatpush.msra.mxu2 %v8649_v44  ;;  %v10411_v58 = vand.u32 4294901760, %v8649_v44 }
 0x2e5   : > { %3015 = vmatmul.f32.gmra.mxu1 %v10772_v59  ;;  %3231 = vmatmul.f32.gmra.mxu3 %v10677_v53  ;;  %v10777_v59 = vld [vmem:[#allocation35_spill] sm:$0xff] }
 0x2e6   : > { %10770 = vst [vmem:[#allocation162_spill] sm:$0xff] %v8646_v13  ;;  %v3461_v25 = vsub.f32 %v8649_v44, %v10411_v58 }
 0x2e8   : > { %3142 = vmatmul.f32.gmra.mxu2 %v10677_v53  ;;  %v2804_v60 = vpop.f32.mrf.mxu3  ;;  %v3462_v2 = vand.u32 4294901760, %v3461_v25 }
 0x2e9   : > { %v8659_v49 = vpop.f32.mrf.mxu0 }
 0x2ea   : > { %10773 = vst [vmem:[#allocation163_spill] sm:$0xff] %v8659_v49  ;;  %v8661_v47 = vpop.f32.mrf.mxu1  ;;  %3463 = vmatpush.msra.mxu1 %v3462_v2  ;;  %v10781_v2 = vld [vmem:[#allocation41_spill] sm:$0xff] }
 0x2eb   : > { %10774 = vst [vmem:[#allocation164_spill] sm:$0xff] %v8661_v47  ;;  %v2651_v54 = vpop.f32.mrf.mxu2 }
 0x2ec   : > { %v8663_v13 = vadd.f32 %v2804_v60, %v2651_v54  ;;  %2913 = vmatmul.f32.gmra.mxu0 %v10776_v40  ;;  %v6372_v54 = vsel %vm318_vm7, 1.0, %v10546_v33  ;;  %v10785_v40 = vld [vmem:[#allocation45_spill] sm:$0xff] }
 0x2ed   : > { %3021 = vmatmul.f32.gmra.mxu1 %v10777_v59  ;;  %3235 = vmatmul.f32.gmra.mxu3 %v10727_v38 }
 0x2ee   : > { %10775 = vst [vmem:[#allocation165_spill] sm:$0xff] %v8663_v13 }
 0x2f0   : > { %3146 = vmatmul.f32.gmra.mxu2 %v10727_v38  ;;  %v2808_v53 = vpop.f32.mrf.mxu3 }
 0x2f1   : > { %v8669_v56 = vpop.f32.mrf.mxu0 }
 0x2f2   : > { %10778 = vst [vmem:[#allocation166_spill] sm:$0xff] %v8669_v56  ;;  %v8671_v58 = vpop.f32.mrf.mxu1  ;;  %v8690_v56 = vsub.f32 %v6372_v54, %v6372_v54 }
 0x2f3   : > { %10779 = vst [vmem:[#allocation167_spill] sm:$0xff] %v8671_v58  ;;  %v2659_v25 = vpop.f32.mrf.mxu2  ;;  %v10782_v58 = vld [vmem:[#allocation39_spill] sm:$0xff] }
 0x2f4   : > { %v8687_v60 = vadd.f32 %v2808_v53, %v2659_v25  ;;  %2918 = vmatmul.f32.gmra.mxu0 %v10781_v2  ;;  %3569 = vmatpush.msra.mxu2 %v8690_v56  ;;  %v10414_v49 = vand.u32 4294901760, %v8690_v56 }
 0x2f5   : > { %3027 = vmatmul.f32.gmra.mxu1 %v10782_v58  ;;  %3239 = vmatmul.f32.gmra.mxu3 %v10687_v3  ;;  %v10786_v58 = vld [vmem:[#allocation43_spill] sm:$0xff] }
 0x2f6   : > { %10780 = vst [vmem:[#allocation168_spill] sm:$0xff] %v8687_v60  ;;  %v3467_v53 = vsub.f32 %v8690_v56, %v10414_v49 }
 0x2f8   : > { %3150 = vmatmul.f32.gmra.mxu2 %v10687_v3  ;;  %v2812_v47 = vpop.f32.mrf.mxu3  ;;  %v3468_v54 = vand.u32 4294901760, %v3467_v53 }
 0x2f9   : > { %v8700_v25 = vpop.f32.mrf.mxu0 }
 0x2fa   : > { %10783 = vst [vmem:[#allocation169_spill] sm:$0xff] %v8700_v25  ;;  %v8702_v2 = vpop.f32.mrf.mxu1  ;;  %3469 = vmatpush.msra.mxu1 %v3468_v54  ;;  %v10791_v25 = vand.u32 4294901760, %v8446_v21  ;;  %v10796_v21 = vld [vmem:[#allocation51_spill] sm:$0xff] }
 0x2fb   : > { %10784 = vst [vmem:[#allocation170_spill] sm:$0xff] %v8702_v2  ;;  %v2667_v38 = vpop.f32.mrf.mxu2 }
 0x2fc   : > { %v8704_v60 = vadd.f32 %v2812_v47, %v2667_v38  ;;  %2923 = vmatmul.f32.gmra.mxu0 %v10785_v40  ;;  %v6368_v38 = vsel %vm314_vm8, 1.0, %v10546_v33  ;;  %v10792_v40 = vand.u32 4294901760, %v8485_v29  ;;  %v10799_v29 = vand.u32 4294901760, %v8608_v61 }
 0x2fd   : > { %3033 = vmatmul.f32.gmra.mxu1 %v10786_v58  ;;  %3243 = vmatmul.f32.gmra.mxu3 %v10694_v46  ;;  %v3471_v54 = vsub.f32 %v6368_v38, %v6368_v38 }
 0x2fe   : > { %3786 = vmatpush.msrb.mxu0 %v10791_v25  ;;  %v10801_v25 = vand.u32 4294901760, %v8649_v44 }
 0x2ff   : > { %3572 = vmatpush.msra.mxu2 %v3471_v54 }
 0x300   : > { %3154 = vmatmul.f32.gmra.mxu2 %v10694_v46  ;;  %v2816_v3 = vpop.f32.mrf.mxu3  ;;  %3790 = vmatpush.msrb.mxu0 %v10792_v40 }
 0x301   : > { %v8710_v13 = vpop.f32.mrf.mxu0 }
 0x302   : > { %10787 = vst [vmem:[#allocation171_spill] sm:$0xff] %v8710_v13  ;;  %v8712_v49 = vpop.f32.mrf.mxu1  ;;  %v10790_v13 = vld [vmem:[#allocation47_spill] sm:$0xff] }
 0x303   : > { %10788 = vst [vmem:[#allocation172_spill] sm:$0xff] %v8712_v49  ;;  %v2675_v53 = vpop.f32.mrf.mxu2  ;;  %v3472_v49 = vand.u32 4294901760, %v3471_v54 }
 0x304   : > { %v8728_v47 = vadd.f32 %v2816_v3, %v2675_v53  ;;  %2928 = vmatmul.f32.gmra.mxu0 %v10697_v28  ;;  %v10795_v28 = vand.u32 4294901760, %v8526_v31 }
 0x305   : > { %3039 = vmatmul.f32.gmra.mxu1 %v10790_v13  ;;  %3247 = vmatmul.f32.gmra.mxu3 %v7371_v20  ;;  %v3473_v46 = vsub.f32 %v3471_v54, %v3472_v49 }
 0x306   : > { %10789 = vst [vmem:[#allocation173_spill] sm:$0xff] %v8728_v47  ;;  %3794 = vmatpush.msrb.mxu0 %v10795_v28 }
 0x307   : > { %v3474_v38 = vand.u32 4294901760, %v3473_v46  ;;  %v10797_v46 = vand.u32 4294901760, %v8567_v12 }
 0x308   : > { %3158 = vmatmul.f32.gmra.mxu2 %v7371_v20  ;;  %v2820_v2 = vpop.f32.mrf.mxu3 }
 0x309   : > { %v8738_v3 = vpop.f32.mrf.mxu0  ;;  %3475 = vmatpush.msra.mxu1 %v3474_v38  ;;  %3798 = vmatpush.msrb.mxu0 %v10797_v46 }
 0x30a   : > { %10793 = vst [vmem:[#allocation174_spill] sm:$0xff] %v8738_v3  ;;  %v8740_v53 = vpop.f32.mrf.mxu1 }
 0x30b   : > { %10794 = vst [vmem:[#allocation175_spill] sm:$0xff] %v8740_v53  ;;  %v2683_v47 = vpop.f32.mrf.mxu2  ;;  %6512 = vmatpush.msk.msrb.mxu1 %vm342_vm0, %v10545_v1  ;;  %3802 = vmatpush.msrb.mxu0 %v10799_v29 }
 0x30c   : > { %v8744_v13 = vadd.f32 %v2820_v2, %v2683_v47  ;;  %2933 = vmatmul.f32.gmra.mxu0 %v7421_v62  ;;  %v8767_v2 = vperm.slane %v8429_v30, 1  ;;  %v10802_v30 = vand.u32 4294901760, %v8690_v56 }
 0x30d   : > { %3045 = vmatmul.f32.gmra.mxu1 %v10796_v21  ;;  %3251 = vmatmul.f32.gmra.mxu3 %v7412_v52 }
 0x30e   : > { %6513 = vmatpush.msk.msrb.mxu1 %vm338_vm2, %v10545_v1  ;;  %3806 = vmatpush.msrb.mxu0 %v10801_v25  ;;  %vm343_vm9 = vcmp.eq.s32.totalorder %v6792_v7, %v8767_v2  ;;  %vm339_vm10 = vcmp.eq.s32.totalorder %v6804_v9, %v8767_v2  ;;  %vm335_vm11 = vcmp.eq.s32.totalorder %v6807_v10, %v8767_v2 }
 0x30f   : > { %v6397_v61 = vsel %vm343_vm9, 1.0, %v10546_v33  ;;  %6520 = vmatpush.msk.msrb.mxu2 %vm343_vm9, %v10545_v1  ;;  %v6393_v39 = vsel %vm339_vm10, 1.0, %v10546_v33  ;;  %vm331_vm12 = vcmp.eq.s32.totalorder %v6810_v11, %v8767_v2  ;;  %vm327_vm13 = vcmp.eq.s32.totalorder %v6819_v14, %v8767_v2 }
 0x310   : > { %3162 = vmatmul.f32.gmra.mxu2 %v7412_v52  ;;  %v2824_v28 = vpop.f32.mrf.mxu3  ;;  %6514 = vmatpush.msk.msrb.mxu1 %vm334_vm3, %v10545_v1  ;;  %v8794_v44 = vsub.f32 %v6397_v61, %v6397_v61  ;;  %vm323_vm14 = vcmp.eq.s32.totalorder %v6825_v16, %v8767_v2  ;;  %vm319_vm15 = vcmp.eq.s32.totalorder %v6828_v17, %v8767_v2 }
 0x311   : > { %v8760_v40 = vpop.f32.mrf.mxu0  ;;  %3810 = vmatpush.msrb.mxu0 %v10802_v30  ;;  %6521 = vmatpush.msk.msrb.mxu2 %vm339_vm10, %v10545_v1  ;;  %vm315_vm1 = vcmp.eq.s32.totalorder %v6786_v5, %v8767_v2 }
 0x312   : > { %10798 = vst [vmem:[#allocation176_spill] sm:$0xff] %v8760_v40  ;;  %v8764_v31 = vpop.f32.mrf.mxu1  ;;  %6515 = vmatpush.msk.msrb.mxu1 %vm330_vm4, %v10545_v1  ;;  %v10417_v38 = vand.u32 4294901760, %v8794_v44 }
 0x313   : > { %10800 = vst [vmem:[#allocation177_spill] sm:$0xff] %v8764_v31  ;;  %v2691_v12 = vpop.f32.mrf.mxu2  ;;  %3814 = vmatpush.msrb.mxu0 %v3472_v49  ;;  %6522 = vmatpush.msk.msrb.mxu2 %vm335_vm11, %v10545_v1 }
 0x314   : > { %v8775_v47 = vadd.f32 %v2824_v28, %v2691_v12  ;;  %2938 = vmatmul.f32.gmra.mxu0 %v7457_v63  ;;  %6516 = vmatpush.msk.msrb.mxu1 %vm326_vm5, %v10545_v1  ;;  %v4133_v56 = vsub.f32 %v8794_v44, %v10417_v38 }
 0x315   : > { %3051 = vmatmul.f32.gmra.mxu1 %v7430_v41  ;;  %3255 = vmatmul.f32.gmra.mxu3 %v7432_v0 }
 0x316   : > { %6517 = vmatpush.msk.msrb.mxu1 %vm322_vm6, %v10545_v1  ;;  %v4134_v25 = vand.u32 4294901760, %v4133_v56  ;;  %6523 = vmatpush.msk.msrb.mxu2 %vm331_vm12, %v10545_v1 }
 0x318   : > { %3166 = vmatmul.f32.gmra.mxu2 %v7432_v0  ;;  %v2828_v54 = vpop.f32.mrf.mxu3  ;;  %6518 = vmatpush.msk.msrb.mxu1 %vm318_vm7, %v10545_v1 }
 0x319   : > { %v8808_v46 = vpop.f32.mrf.mxu0  ;;  %4135 = vmatpush.msrb.mxu3 %v4134_v25  ;;  %6524 = vmatpush.msk.msrb.mxu2 %vm327_vm13, %v10545_v1 }
 0x31a   : > { %10803 = vst [vmem:[#allocation178_spill] sm:$0xff] %v8808_v46  ;;  %v8810_v28 = vpop.f32.mrf.mxu1  ;;  %6519 = vmatpush.msk.msrb.mxu1 %vm314_vm8, %v10545_v1 }
 0x31b   : > { %10804 = vst [vmem:[#allocation179_spill] sm:$0xff] %v8810_v28  ;;  %v2699_v29 = vpop.f32.mrf.mxu2  ;;  %6525 = vmatpush.msk.msrb.mxu2 %vm323_vm14, %v10545_v1 }
 0x31c   : > { %v8819_v12 = vadd.f32 %v2828_v54, %v2699_v29  ;;  %2943 = vmatmul.f32.gmra.mxu0 %v10645_v22  ;;  %v8846_v29 = vsub.f32 %v6393_v39, %v6393_v39 }
 0x31d   : > { %3057 = vmatmul.f32.gmra.mxu1 %v10646_v57  ;;  %3259 = vmatmul.f32.gmra.mxu3 %v7472_v24 }
 0x31e   : > { %v10418_v25 = vand.u32 4294901760, %v8846_v29  ;;  %6526 = vmatpush.msk.msrb.mxu2 %vm319_vm15, %v10545_v1 }
 0x320   : > { %3170 = vmatmul.f32.gmra.mxu2 %v7472_v24  ;;  %v2832_v49 = vpop.f32.mrf.mxu3 }
 0x321   : > { %v8829_v61 = vpop.f32.mrf.mxu0  ;;  %6527 = vmatpush.msk.msrb.mxu2 %vm315_vm1, %v10545_v1 }
 0x322   : > { %10805 = vst [vmem:[#allocation180_spill] sm:$0xff] %v8829_v61  ;;  %v8831_v30 = vpop.f32.mrf.mxu1  ;;  %v4139_v61 = vsub.f32 %v8846_v29, %v10418_v25 }
 0x323   : > { %10806 = vst [vmem:[#allocation181_spill] sm:$0xff] %v8831_v30  ;;  %v2707_v54 = vpop.f32.mrf.mxu2 }
 0x324   : > { %v8843_v56 = vadd.f32 %v2832_v49, %v2707_v54  ;;  %2948 = vmatmul.f32.gmra.mxu0 %v10711_v32  ;;  %v4140_v54 = vand.u32 4294901760, %v4139_v61 }
 0x325   : > { %3063 = vmatmul.f32.gmra.mxu1 %v10650_v37  ;;  %3263 = vmatmul.f32.gmra.mxu3 %v10712_v55 }
 0x326   : > { %4141 = vmatpush.msrb.mxu3 %v4140_v54  ;;  %v6389_v54 = vsel %vm335_vm11, 1.0, %v10546_v33 }
 0x328   : > { %3174 = vmatmul.f32.gmra.mxu2 %v10712_v55  ;;  %v2836_v38 = vpop.f32.mrf.mxu3 }
 0x329   : > { %v2874_v30 = vpop.f32.mrf.mxu0 }
 0x32a   : > { %v8855_v49 = vpop.f32.mrf.mxu1  ;;  %v2875_v25 = vadd.f32 %v2874_v30, %v8523_v15  ;;  %v8877_v15 = vsub.f32 %v6389_v54, %v6389_v54 }
 0x32b   : > { %10807 = vst [vmem:[#allocation182_spill] sm:$0xff] %v8855_v49  ;;  %v2715_v46 = vpop.f32.mrf.mxu2 }
 0x32c   : > { %v8857_v39 = vadd.f32 %v2836_v38, %v2715_v46  ;;  %3296 = vmatmul.f32.vlgmr.msra.gmra.mxu0 %v10652_v26 }
 0x32d   : > { %3069 = vmatmul.f32.gmra.mxu1 %v10653_v51  ;;  %3681 = vmatmul.f32.vlgmr.msra.gmra.mxu3 %v10744_v43 }
 0x32e   : > { %4253 = vmatpush.msra.mxu0 %v8794_v44 }
 0x330   : > { %3575 = vmatmul.f32.vlgmr.msra.gmra.mxu2 %v10739_v35  ;;  %v3204_v28 = vpop.f32.mrf.mxu3  ;;  %4256 = vmatpush.msra.mxu0 %v8846_v29 }
 0x331   : > { %v2879_v61 = vpop.f32.mrf.mxu0 }
 0x332   : > { %v2980_v49 = vpop.f32.mrf.mxu1  ;;  %4259 = vmatpush.msra.mxu0 %v8877_v15 }
 0x333   : > { %v2981_v38 = vadd.f32 %v2980_v49, %v2875_v25  ;;  %v3115_v46 = vpop.f32.mrf.mxu2  ;;  %v10419_v25 = vand.u32 4294901760, %v8877_v15 }
 0x334   : > { %3304 = vmatmul.f32.gmra.mxu0 %v7063_v50 }
 0x335   : > { %v3116_v30 = vadd.f32 %v3115_v46, %v2981_v38  ;;  %3477 = vmatmul.f32.vlgmr.msra.gmra.mxu1 %v6788_v6  ;;  %3687 = vmatmul.f32.gmra.mxu3 %v10748_v4  ;;  %v4145_v38 = vsub.f32 %v8877_v15, %v10419_v25  ;;  %v2880_v46 = vadd.f32 %v2879_v61, %v8540_v48 }
 0x336   : > { %6528 = vmatpush.msk.msra.mxu1 %vm343_vm9, %v10545_v1 }
 0x337   : > { %v8887_v49 = vadd.f32 %v3204_v28, %v3116_v30  ;;  %v4146_v3 = vand.u32 4294901760, %v4145_v38 }
 0x338   : > { %3580 = vmatmul.f32.gmra.mxu2 %v10743_v19  ;;  %v3208_v54 = vpop.f32.mrf.mxu3  ;;  %6529 = vmatpush.msk.msra.mxu1 %vm339_vm10, %v10545_v1  ;;  %v10819_v19 = vld [vmem:[#allocation156_spill] sm:$0xff] }
 0x339   : > { %10808 = vst [vmem:[#allocation183_spill] sm:$0xff] %v8887_v49  ;;  %v2884_v40 = vpop.f32.mrf.mxu0  ;;  %4147 = vmatpush.msrb.mxu3 %v4146_v3  ;;  %v6385_v3 = vsel %vm331_vm12, 1.0, %v10546_v33 }
 0x33a   : > { %v2986_v31 = vpop.f32.mrf.mxu1  ;;  %6530 = vmatpush.msk.msra.mxu1 %vm335_vm11, %v10545_v1  ;;  %v2885_v61 = vadd.f32 %v2884_v40, %v8564_v18  ;;  %v8924_v18 = vsub.f32 %v6385_v3, %v6385_v3  ;;  %v10810_v40 = vld [vmem:[#allocation12_spill] sm:$0xff]  ;;  %v10813_v3 = vld [vmem:[#allocation153_spill] sm:$0xff] }
 0x33b   : > { %v2987_v28 = vadd.f32 %v2986_v31, %v2880_v46  ;;  %v3119_v30 = vpop.f32.mrf.mxu2 }
 0x33c   : > { %3312 = vmatmul.f32.gmra.mxu0 %v7112_v34  ;;  %6531 = vmatpush.msk.msra.mxu1 %vm331_vm12, %v10545_v1 }
 0x33d   : > { %v3120_v25 = vadd.f32 %v3119_v30, %v2987_v28  ;;  %3481 = vmatmul.f32.gmra.mxu1 %v6794_v8  ;;  %3693 = vmatmul.f32.gmra.mxu3 %v10752_v36  ;;  %v10812_v28 = vld [vmem:[#allocation17_spill] sm:$0xff] }
 0x33e   : > { %4262 = vmatpush.msra.mxu0 %v8924_v18  ;;  %6532 = vmatpush.msk.msra.mxu1 %vm327_vm13, %v10545_v1 }
 0x33f   : > { %v8905_v49 = vadd.f32 %v3208_v54, %v3120_v25  ;;  %v10425_v25 = vand.u32 4294901760, %v8924_v18 }
 0x340   : > { %3585 = vmatmul.f32.gmra.mxu2 %v10747_v27  ;;  %v3212_v48 = vpop.f32.mrf.mxu3  ;;  %v10814_v27 = vld [vmem:[#allocation26_spill] sm:$0xff]  ;;  %6533 = vmatpush.msk.msra.mxu1 %vm323_vm14, %v10545_v1 }
 0x341   : > { %10809 = vst [vmem:[#allocation184_spill] sm:$0xff] %v8905_v49  ;;  %v2889_v38 = vpop.f32.mrf.mxu0 }
 0x342   : > { %v2992_v53 = vpop.f32.mrf.mxu1  ;;  %v2890_v49 = vadd.f32 %v2889_v38, %v10813_v3  ;;  %6534 = vmatpush.msk.msra.mxu1 %vm319_vm15, %v10545_v1 }
 0x343   : > { %v2993_v31 = vadd.f32 %v2992_v53, %v2885_v61  ;;  %v3123_v46 = vpop.f32.mrf.mxu2  ;;  %v4151_v61 = vsub.f32 %v8924_v18, %v10425_v25 }
 0x344   : > { %3320 = vmatmul.f32.gmra.mxu0 %v7154_v45  ;;  %6535 = vmatpush.msk.msra.mxu1 %vm315_vm1, %v10545_v1 }
 0x345   : > { %v3124_v53 = vadd.f32 %v3123_v46, %v2993_v31  ;;  %3485 = vmatmul.f32.gmra.mxu1 %v10810_v40  ;;  %3699 = vmatmul.f32.gmra.mxu3 %v10757_v23  ;;  %v4152_v36 = vand.u32 4294901760, %v4151_v61 }
 0x347   : > { %v8930_v54 = vadd.f32 %v3212_v48, %v3124_v53  ;;  %4153 = vmatpush.msrb.mxu3 %v4152_v36  ;;  %v10815_v48 = vld [vmem:[#allocation15_spill] sm:$0xff]  ;;  %v10821_v36 = vld [vmem:[#allocation20_spill] sm:$0xff] }
 0x348   : > { %3590 = vmatmul.f32.gmra.mxu2 %v10812_v28  ;;  %v3216_v30 = vpop.f32.mrf.mxu3  ;;  %v10816_v53 = vld [vmem:[#allocation23_spill] sm:$0xff]  ;;  %v10818_v28 = vld [vmem:[#allocation21_spill] sm:$0xff] }
 0x349   : > { %10811 = vst [vmem:[#allocation185_spill] sm:$0xff] %v8930_v54  ;;  %v2894_v31 = vpop.f32.mrf.mxu0 }
 0x34a   : > { %v2998_v46 = vpop.f32.mrf.mxu1  ;;  %v2895_v38 = vadd.f32 %v2894_v31, %v10819_v19  ;;  %v10820_v19 = vld [vmem:[#allocation30_spill] sm:$0xff]  ;;  %v10823_v31 = vld [vmem:[#allocation25_spill] sm:$0xff] }
 0x34b   : > { %v2999_v4 = vadd.f32 %v2998_v46, %v2890_v49  ;;  %v3127_v23 = vpop.f32.mrf.mxu2 }
 0x34c   : > { %3328 = vmatmul.f32.gmra.mxu0 %v10814_v27 }
 0x34d   : > { %v3128_v43 = vadd.f32 %v3127_v23, %v2999_v4  ;;  %3489 = vmatmul.f32.gmra.mxu1 %v10815_v48  ;;  %3705 = vmatmul.f32.gmra.mxu3 %v10816_v53  ;;  %v6381_v4 = vsel %vm327_vm13, 1.0, %v10546_v33 }
 0x34f   : > { %v8940_v54 = vadd.f32 %v3216_v30, %v3128_v43  ;;  %v8959_v43 = vsub.f32 %v6381_v4, %v6381_v4  ;;  %v10824_v4 = vld [vmem:[#allocation159_spill] sm:$0xff] }
 0x350   : > { %3595 = vmatmul.f32.gmra.mxu2 %v10818_v28  ;;  %v3220_v25 = vpop.f32.mrf.mxu3 }
 0x351   : > { %10817 = vst [vmem:[#allocation153_spill] sm:$0xff] %v8940_v54  ;;  %v2899_v3 = vpop.f32.mrf.mxu0  ;;  %v10429_v23 = vand.u32 4294901760, %v8959_v43  ;;  %4265 = vmatpush.msra.mxu0 %v8959_v43 }
 0x352   : > { %v3004_v35 = vpop.f32.mrf.mxu1  ;;  %v2900_v54 = vadd.f32 %v2899_v3, %v10824_v4 }
 0x353   : > { %v3005_v49 = vadd.f32 %v3004_v35, %v2895_v38  ;;  %v3131_v61 = vpop.f32.mrf.mxu2  ;;  %v4157_v38 = vsub.f32 %v8959_v43, %v10429_v23 }
 0x354   : > { %3336 = vmatmul.f32.gmra.mxu0 %v10820_v19  ;;  %v10825_v19 = vld [vmem:[#allocation34_spill] sm:$0xff] }
 0x355   : > { %v3132_v35 = vadd.f32 %v3131_v61, %v3005_v49  ;;  %3493 = vmatmul.f32.gmra.mxu1 %v10821_v36  ;;  %3711 = vmatmul.f32.gmra.mxu3 %v10767_v42  ;;  %v4158_v53 = vand.u32 4294901760, %v4157_v38  ;;  %v10830_v36 = vld [vmem:[#allocation162_spill] sm:$0xff] }
 0x357   : > { %v8965_v30 = vadd.f32 %v3220_v25, %v3132_v35  ;;  %4159 = vmatpush.msrb.mxu3 %v4158_v53  ;;  %v10826_v25 = vld [vmem:[#allocation24_spill] sm:$0xff]  ;;  %v10827_v35 = vld [vmem:[#allocation31_spill] sm:$0xff] }
 0x358   : > { %3600 = vmatmul.f32.gmra.mxu2 %v10823_v31  ;;  %v3224_v46 = vpop.f32.mrf.mxu3  ;;  %v10829_v31 = vld [vmem:[#allocation29_spill] sm:$0xff]  ;;  %v10832_v53 = vld [vmem:[#allocation28_spill] sm:$0xff] }
 0x359   : > { %10822 = vst [vmem:[#allocation156_spill] sm:$0xff] %v8965_v30  ;;  %v2904_v49 = vpop.f32.mrf.mxu0 }
 0x35a   : > { %v3010_v61 = vpop.f32.mrf.mxu1  ;;  %v2905_v3 = vadd.f32 %v2904_v49, %v10830_v36  ;;  %v10834_v49 = vld [vmem:[#allocation33_spill] sm:$0xff] }
 0x35b   : > { %v3011_v28 = vadd.f32 %v3010_v61, %v2900_v54  ;;  %v3135_v42 = vpop.f32.mrf.mxu2 }
 0x35c   : > { %3344 = vmatmul.f32.gmra.mxu0 %v10825_v19 }
 0x35d   : > { %v3136_v27 = vadd.f32 %v3135_v42, %v3011_v28  ;;  %3497 = vmatmul.f32.gmra.mxu1 %v10826_v25  ;;  %3717 = vmatmul.f32.gmra.mxu3 %v10827_v35  ;;  %v6377_v42 = vsel %vm323_vm14, 1.0, %v10546_v33 }
 0x35e   : > { %v8994_v28 = vsub.f32 %v6377_v42, %v6377_v42  ;;  %v10835_v42 = vld [vmem:[#allocation165_spill] sm:$0xff] }
 0x35f   : > { %v8975_v30 = vadd.f32 %v3224_v46, %v3136_v27  ;;  %v10831_v27 = vld [vmem:[#allocation38_spill] sm:$0xff] }
 0x360   : > { %3605 = vmatmul.f32.gmra.mxu2 %v10829_v31  ;;  %v3228_v23 = vpop.f32.mrf.mxu3  ;;  %v10433_v36 = vand.u32 4294901760, %v8994_v28  ;;  %4268 = vmatpush.msra.mxu0 %v8994_v28 }
 0x361   : > { %10828 = vst [vmem:[#allocation159_spill] sm:$0xff] %v8975_v30  ;;  %v2909_v4 = vpop.f32.mrf.mxu0 }
 0x362   : > { %v3016_v45 = vpop.f32.mrf.mxu1  ;;  %v2910_v30 = vadd.f32 %v2909_v4, %v10835_v42 }
 0x363   : > { %v3017_v54 = vadd.f32 %v3016_v45, %v2905_v3  ;;  %v3139_v38 = vpop.f32.mrf.mxu2  ;;  %v4163_v3 = vsub.f32 %v8994_v28, %v10433_v36 }
 0x364   : > { %3352 = vmatmul.f32.gmra.mxu0 %v10831_v27  ;;  %v10836_v27 = vld [vmem:[#allocation42_spill] sm:$0xff] }
 0x365   : > { %v3140_v45 = vadd.f32 %v3139_v38, %v3017_v54  ;;  %3501 = vmatmul.f32.gmra.mxu1 %v10832_v53  ;;  %3723 = vmatmul.f32.gmra.mxu3 %v10777_v59  ;;  %v4164_v35 = vand.u32 4294901760, %v4163_v3  ;;  %v10841_v53 = vld [vmem:[#allocation168_spill] sm:$0xff] }
 0x367   : > { %v9000_v46 = vadd.f32 %v3228_v23, %v3140_v45  ;;  %4165 = vmatpush.msrb.mxu3 %v4164_v35  ;;  %v10837_v23 = vld [vmem:[#allocation32_spill] sm:$0xff]  ;;  %v10838_v45 = vld [vmem:[#allocation39_spill] sm:$0xff] }
 0x368   : > { %3610 = vmatmul.f32.gmra.mxu2 %v10834_v49  ;;  %v3232_v61 = vpop.f32.mrf.mxu3  ;;  %v10840_v49 = vld [vmem:[#allocation37_spill] sm:$0xff]  ;;  %v10843_v35 = vld [vmem:[#allocation36_spill] sm:$0xff] }
 0x369   : > { %10833 = vst [vmem:[#allocation162_spill] sm:$0xff] %v9000_v46  ;;  %v2914_v54 = vpop.f32.mrf.mxu0 }
 0x36a   : > { %v3022_v38 = vpop.f32.mrf.mxu1  ;;  %v2915_v4 = vadd.f32 %v2914_v54, %v10841_v53  ;;  %v10845_v54 = vld [vmem:[#allocation41_spill] sm:$0xff] }
 0x36b   : > { %v3023_v31 = vadd.f32 %v3022_v38, %v2910_v30  ;;  %v3143_v59 = vpop.f32.mrf.mxu2 }
 0x36c   : > { %3360 = vmatmul.f32.gmra.mxu0 %v10836_v27  ;;  %v10851_v27 = vld [vmem:[#allocation173_spill] sm:$0xff] }
 0x36d   : > { %v3144_v19 = vadd.f32 %v3143_v59, %v3023_v31  ;;  %3505 = vmatmul.f32.gmra.mxu1 %v10837_v23  ;;  %3729 = vmatmul.f32.gmra.mxu3 %v10838_v45  ;;  %v6373_v59 = vsel %vm319_vm15, 1.0, %v10546_v33 }
 0x36e   : > { %v9029_v31 = vsub.f32 %v6373_v59, %v6373_v59 }
 0x36f   : > { %v9010_v46 = vadd.f32 %v3232_v61, %v3144_v19  ;;  %v10842_v19 = vld [vmem:[#allocation46_spill] sm:$0xff] }
 0x370   : > { %3615 = vmatmul.f32.gmra.mxu2 %v10840_v49  ;;  %v3236_v36 = vpop.f32.mrf.mxu3  ;;  %v10435_v53 = vand.u32 4294901760, %v9029_v31  ;;  %4271 = vmatpush.msra.mxu0 %v9029_v31  ;;  %v10846_v49 = vld [vmem:[#allocation50_spill] sm:$0xff] }
 0x371   : > { %10839 = vst [vmem:[#allocation165_spill] sm:$0xff] %v9010_v46  ;;  %v2919_v42 = vpop.f32.mrf.mxu0 }
 0x372   : > { %v3028_v25 = vpop.f32.mrf.mxu1  ;;  %v2920_v59 = vadd.f32 %v2919_v42, %v8704_v60 }
 0x373   : > { %v3029_v30 = vadd.f32 %v3028_v25, %v2915_v4  ;;  %v3147_v3 = vpop.f32.mrf.mxu2  ;;  %v4169_v4 = vsub.f32 %v9029_v31, %v10435_v53 }
 0x374   : > { %3368 = vmatmul.f32.gmra.mxu0 %v10842_v19 }
 0x375   : > { %v3148_v25 = vadd.f32 %v3147_v3, %v3029_v30  ;;  %3509 = vmatmul.f32.gmra.mxu1 %v10843_v35  ;;  %3735 = vmatmul.f32.gmra.mxu3 %v10786_v58  ;;  %v4170_v46 = vand.u32 4294901760, %v4169_v4 }
 0x377   : > { %v9035_v61 = vadd.f32 %v3236_v36, %v3148_v25  ;;  %4171 = vmatpush.msrb.mxu3 %v4170_v46  ;;  %v10847_v36 = vld [vmem:[#allocation40_spill] sm:$0xff]  ;;  %v10848_v25 = vld [vmem:[#allocation47_spill] sm:$0xff] }
 0x378   : > { %3620 = vmatmul.f32.gmra.mxu2 %v10845_v54  ;;  %v3240_v38 = vpop.f32.mrf.mxu3  ;;  %v10850_v54 = vld [vmem:[#allocation45_spill] sm:$0xff] }
 0x379   : > { %10844 = vst [vmem:[#allocation168_spill] sm:$0xff] %v9035_v61  ;;  %v2924_v30 = vpop.f32.mrf.mxu0 }
 0x37a   : > { %v3034_v3 = vpop.f32.mrf.mxu1  ;;  %v2925_v60 = vadd.f32 %v2924_v30, %v10851_v27  ;;  %v10852_v27 = vld [vmem:[#allocation52_spill] sm:$0xff]  ;;  %v10855_v30 = vand.u32 4294901760, %v8846_v29  ;;  %v10859_v29 = vand.u32 4294901760, %v8924_v18 }
 0x37b   : > { %v3035_v45 = vadd.f32 %v3034_v3, %v2920_v59  ;;  %v3151_v58 = vpop.f32.mrf.mxu2 }
 0x37c   : > { %3376 = vmatmul.f32.gmra.mxu0 %v10846_v49 }
 0x37d   : > { %v3152_v19 = vadd.f32 %v3151_v58, %v3035_v45  ;;  %3513 = vmatmul.f32.gmra.mxu1 %v10847_v36  ;;  %3741 = vmatmul.f32.gmra.mxu3 %v10848_v25  ;;  %v6369_v58 = vsel %vm315_vm1, 1.0, %v10546_v33  ;;  %v10853_v45 = vand.u32 4294901760, %v8794_v44 }
 0x37e   : > { %v4173_v46 = vsub.f32 %v6369_v58, %v6369_v58 }
 0x37f   : > { %v9045_v61 = vadd.f32 %v3240_v38, %v3152_v19  ;;  %4488 = vmatpush.msra.mxu2 %v10853_v45 }
 0x380   : > { %3625 = vmatmul.f32.gmra.mxu2 %v10850_v54  ;;  %v3244_v53 = vpop.f32.mrf.mxu3  ;;  %v4174_v38 = vand.u32 4294901760, %v4173_v46  ;;  %4274 = vmatpush.msra.mxu0 %v4173_v46 }
 0x381   : > { %10849 = vst [vmem:[#allocation186_spill] sm:$0xff] %v9045_v61  ;;  %v2929_v42 = vpop.f32.mrf.mxu0  ;;  %4492 = vmatpush.msra.mxu2 %v10855_v30  ;;  %v10860_v30 = vld [vmem:[#allocation53_spill] sm:$0xff] }
 0x382   : > { %v3040_v35 = vpop.f32.mrf.mxu1  ;;  %v4175_v25 = vsub.f32 %v4173_v46, %v4174_v38  ;;  %v2930_v58 = vadd.f32 %v2929_v42, %v8744_v13  ;;  %v10861_v13 = vand.u32 4294901760, %v8959_v43  ;;  %v10864_v46 = vand.u32 4294901760, %v9029_v31 }
 0x383   : > { %v3041_v4 = vadd.f32 %v3040_v35, %v2925_v60  ;;  %v3155_v59 = vpop.f32.mrf.mxu2  ;;  %v10854_v35 = vld [vmem:[#allocation44_spill] sm:$0xff]  ;;  %v10857_v60 = vld [vmem:[#allocation49_spill] sm:$0xff] }
 0x384   : > { %3384 = vmatmul.f32.gmra.mxu0 %v10852_v27  ;;  %v4176_v45 = vand.u32 4294901760, %v4175_v25  ;;  %v10863_v25 = vand.u32 4294901760, %v8994_v28 }
 0x385   : > { %v3156_v19 = vadd.f32 %v3155_v59, %v3041_v4  ;;  %3517 = vmatmul.f32.gmra.mxu1 %v10854_v35  ;;  %3747 = vmatmul.f32.gmra.mxu3 %v10796_v21  ;;  %v10858_v4 = vand.u32 4294901760, %v8877_v15 }
 0x386   : > { %4177 = vmatpush.msrb.mxu3 %v4176_v45  ;;  %v10867_v45 = vld [vmem:[#allocation61_spill] sm:$0xff] }
 0x387   : > { %v9070_v3 = vadd.f32 %v3244_v53, %v3156_v19  ;;  %4496 = vmatpush.msra.mxu2 %v10858_v4  ;;  %v10865_v19 = vld [vmem:[#allocation57_spill] sm:$0xff] }
 0x388   : > { %3630 = vmatmul.f32.gmra.mxu2 %v10857_v60  ;;  %v3248_v61 = vpop.f32.mrf.mxu3  ;;  %6536 = vmatpush.msk.msra.mxu3 %vm343_vm9, %v10545_v1 }
 0x389   : > { %10856 = vst [vmem:[#allocation173_spill] sm:$0xff] %v9070_v3  ;;  %v2934_v44 = vpop.f32.mrf.mxu0  ;;  %4500 = vmatpush.msra.mxu2 %v10859_v29 }
 0x38a   : > { %v3046_v59 = vpop.f32.mrf.mxu1  ;;  %6537 = vmatpush.msk.msra.mxu3 %vm339_vm10, %v10545_v1 }
 0x38b   : > { %v3047_v21 = vadd.f32 %v3046_v59, %v2930_v58  ;;  %v3159_v54 = vpop.f32.mrf.mxu2  ;;  %4504 = vmatpush.msra.mxu2 %v10861_v13 }
 0x38c   : > { %3392 = vmatmul.f32.gmra.mxu0 %v10860_v30  ;;  %6538 = vmatpush.msk.msra.mxu3 %vm335_vm11, %v10545_v1 }
 0x38d   : > { %v3160_v53 = vadd.f32 %v3159_v54, %v3047_v21  ;;  %3521 = vmatmul.f32.gmra.mxu1 %v7371_v20  ;;  %3753 = vmatmul.f32.gmra.mxu3 %v7430_v41  ;;  %v2935_v21 = vadd.f32 %v2934_v44, %v8775_v47 }
 0x38e   : > { %4508 = vmatpush.msra.mxu2 %v10863_v25  ;;  %6539 = vmatpush.msk.msra.mxu3 %vm331_vm12, %v10545_v1 }
 0x38f   : > { %v9087_v15 = vadd.f32 %v3248_v61, %v3160_v53 }
 0x390   : > { %3635 = vmatmul.f32.gmra.mxu2 %v7421_v62  ;;  %v3252_v18 = vpop.f32.mrf.mxu3  ;;  %6540 = vmatpush.msk.msra.mxu3 %vm327_vm13, %v10545_v1 }
 0x391   : > { %10862 = vst [vmem:[#allocation44_spill] sm:$0xff] %v9087_v15  ;;  %v2939_v54 = vpop.f32.mrf.mxu0  ;;  %4512 = vmatpush.msra.mxu2 %v10864_v46  ;;  %v10877_v15 = vld [vmem:[#allocation28_spill] sm:$0xff] }
 0x392   : > { %v3052_v42 = vpop.f32.mrf.mxu1  ;;  %6541 = vmatpush.msk.msra.mxu3 %vm323_vm14, %v10545_v1  ;;  %v2940_v58 = vadd.f32 %v2939_v54, %v8819_v12 }
 0x393   : > { %v3053_v43 = vadd.f32 %v3052_v42, %v2935_v21  ;;  %v3163_v61 = vpop.f32.mrf.mxu2  ;;  %4516 = vmatpush.msra.mxu2 %v4174_v38  ;;  %v10869_v42 = vld [vmem:[#allocation63_spill] sm:$0xff] }
 0x394   : > { %3400 = vmatmul.f32.gmra.mxu0 %v10865_v19  ;;  %6542 = vmatpush.msk.msra.mxu3 %vm319_vm15, %v10545_v1 }
 0x395   : > { %v3164_v47 = vadd.f32 %v3163_v61, %v3053_v43  ;;  %3525 = vmatmul.f32.gmra.mxu1 %v7412_v52  ;;  %3759 = vmatmul.f32.gmra.mxu3 %v10646_v57 }
 0x396   : > { %6543 = vmatpush.msk.msra.mxu3 %vm315_vm1, %v10545_v1 }
 0x397   : > { %v9114_v28 = vadd.f32 %v3252_v18, %v3164_v47 }
 0x398   : > { %3640 = vmatmul.f32.gmra.mxu2 %v7457_v63  ;;  %v3256_v31 = vpop.f32.mrf.mxu3 }
 0x399   : > { %10866 = vst [vmem:[#allocation187_spill] sm:$0xff] %v9114_v28  ;;  %v2944_v44 = vpop.f32.mrf.mxu0 }
 0x39a   : > { %v3058_v4 = vpop.f32.mrf.mxu1  ;;  %v2945_v13 = vadd.f32 %v2944_v44, %v8843_v56 }
 0x39b   : > { %v3059_v38 = vadd.f32 %v3058_v4, %v2940_v58  ;;  %v3167_v59 = vpop.f32.mrf.mxu2 }
 0x39c   : > { %3408 = vmatmul.f32.gmra.mxu0 %v10867_v45 }
 0x39d   : > { %v3168_v29 = vadd.f32 %v3167_v59, %v3059_v38  ;;  %3529 = vmatmul.f32.gmra.mxu1 %v7432_v0  ;;  %3765 = vmatmul.f32.gmra.mxu3 %v10650_v37 }
 0x39f   : > { %v9133_v12 = vadd.f32 %v3256_v31, %v3168_v29 }
 0x3a0   : > { %3645 = vmatmul.f32.gmra.mxu2 %v10645_v22  ;;  %v3260_v53 = vpop.f32.mrf.mxu3  ;;  %v10896_v22 = vld [vmem:[#allocation11_spill] sm:$0xff] }
 0x3a1   : > { %10868 = vst [vmem:[#allocation188_spill] sm:$0xff] %v9133_v12  ;;  %v2949_v18 = vpop.f32.mrf.mxu0 }
 0x3a2   : > { %v3064_v21 = vpop.f32.mrf.mxu1  ;;  %v2950_v46 = vadd.f32 %v2949_v18, %v8857_v39 }
 0x3a3   : > { %v3065_v54 = vadd.f32 %v3064_v21, %v2945_v13  ;;  %v3171_v25 = vpop.f32.mrf.mxu2 }
 0x3a4   : > { %3416 = vmatmul.f32.gmra.mxu0 %v10869_v42 }
 0x3a5   : > { %v3172_v2 = vadd.f32 %v3171_v25, %v3065_v54  ;;  %3533 = vmatmul.f32.gmra.mxu1 %v7472_v24  ;;  %3771 = vmatmul.f32.gmra.mxu3 %v10653_v51 }
 0x3a7   : > { %v9140_v43 = vadd.f32 %v3260_v53, %v3172_v2 }
 0x3a8   : > { %3650 = vmatmul.f32.gmra.mxu2 %v10711_v32  ;;  %v3264_v61 = vpop.f32.mrf.mxu3 }
 0x3a9   : > { %10870 = vst [vmem:[#allocation189_spill] sm:$0xff] %v9140_v43  ;;  %v3297_v47 = vpop.f32.mrf.mxu0  ;;  %v10875_v43 = vld [vmem:[#allocation24_spill] sm:$0xff] }
 0x3aa   : > { %v3070_v56 = vpop.f32.mrf.mxu1 }
 0x3ab   : > { %v3071_v31 = vadd.f32 %v3070_v56, %v2950_v46  ;;  %v3175_v58 = vpop.f32.mrf.mxu2 }
 0x3ac   : > { %3816 = vmatmul.f32.vlgmr.msrb.gmra.mxu0 %v6788_v6 }
 0x3ad   : > { %v3176_v44 = vadd.f32 %v3175_v58, %v3071_v31  ;;  %3537 = vmatmul.f32.gmra.mxu1 %v10712_v55  ;;  %4179 = vmatmul.f32.vlgmr.msrb.gmra.mxu3 %v6788_v6 }
 0x3af   : > { %v9147_v4 = vadd.f32 %v3264_v61, %v3176_v44 }
 0x3b0   : > { %3998 = vmatmul.f32.vlgmr.msrb.gmra.mxu2 %v10652_v26  ;;  %v3682_v38 = vpop.f32.mrf.mxu3 }
 0x3b1   : > { %10871 = vst [vmem:[#allocation190_spill] sm:$0xff] %v9147_v4  ;;  %v3305_v59 = vpop.f32.mrf.mxu0 }
 0x3b2   : > { %v3478_v29 = vpop.f32.mrf.mxu1 }
 0x3b3   : > { %v3479_v53 = vadd.f32 %v3478_v29, %v3297_v47  ;;  %v3576_v39 = vpop.f32.mrf.mxu2 }
 0x3b4   : > { %3820 = vmatmul.f32.gmra.mxu0 %v6794_v8 }
 0x3b5   : > { %v3577_v13 = vadd.f32 %v3576_v39, %v3479_v53  ;;  %3905 = vmatmul.f32.vlgmr.msrb.gmra.mxu1 %v6788_v6  ;;  %4183 = vmatmul.f32.gmra.mxu3 %v6794_v8  ;;  %v10872_v53 = vld [vmem:[#allocation22_spill] sm:$0xff] }
 0x3b7   : > { %v9153_v18 = vadd.f32 %v3682_v38, %v3577_v13 }
 0x3b8   : > { %4006 = vmatmul.f32.gmra.mxu2 %v7063_v50  ;;  %v3688_v21 = vpop.f32.mrf.mxu3 }
 0x3b9   : > { %v3313_v54 = vpop.f32.mrf.mxu0 }
 0x3ba   : > { %v3482_v25 = vpop.f32.mrf.mxu1 }
 0x3bb   : > { %v3483_v2 = vadd.f32 %v3482_v25, %v3305_v59  ;;  %v3581_v61 = vpop.f32.mrf.mxu2 }
 0x3bc   : > { %3824 = vmatmul.f32.gmra.mxu0 %v10810_v40 }
 0x3bd   : > { %v3582_v46 = vadd.f32 %v3581_v61, %v3483_v2  ;;  %3909 = vmatmul.f32.gmra.mxu1 %v6794_v8  ;;  %4187 = vmatmul.f32.gmra.mxu3 %v10810_v40  ;;  %v10873_v61 = vld [vmem:[#allocation20_spill] sm:$0xff] }
 0x3bf   : > { %v9159_v47 = vadd.f32 %v3688_v21, %v3582_v46 }
 0x3c0   : > { %4014 = vmatmul.f32.gmra.mxu2 %v7112_v34  ;;  %v3694_v56 = vpop.f32.mrf.mxu3 }
 0x3c1   : > { %v3321_v31 = vpop.f32.mrf.mxu0 }
 0x3c2   : > { %v3486_v58 = vpop.f32.mrf.mxu1 }
 0x3c3   : > { %v3487_v44 = vadd.f32 %v3486_v58, %v3313_v54  ;;  %v3586_v38 = vpop.f32.mrf.mxu2  ;;  %v10874_v58 = vld [vmem:[#allocation26_spill] sm:$0xff] }
 0x3c4   : > { %3828 = vmatmul.f32.gmra.mxu0 %v10815_v48 }
 0x3c5   : > { %v3587_v59 = vadd.f32 %v3586_v38, %v3487_v44  ;;  %3913 = vmatmul.f32.gmra.mxu1 %v10810_v40  ;;  %4191 = vmatmul.f32.gmra.mxu3 %v10815_v48 }
 0x3c7   : > { %v9165_v29 = vadd.f32 %v3694_v56, %v3587_v59 }
 0x3c8   : > { %4022 = vmatmul.f32.gmra.mxu2 %v10872_v53  ;;  %v3700_v39 = vpop.f32.mrf.mxu3  ;;  %v10880_v53 = vld [vmem:[#allocation36_spill] sm:$0xff] }
 0x3c9   : > { %v3329_v13 = vpop.f32.mrf.mxu0 }
 0x3ca   : > { %v3490_v21 = vpop.f32.mrf.mxu1 }
 0x3cb   : > { %v3491_v25 = vadd.f32 %v3490_v21, %v3321_v31  ;;  %v3591_v2 = vpop.f32.mrf.mxu2 }
 0x3cc   : > { %3832 = vmatmul.f32.gmra.mxu0 %v10873_v61 }
 0x3cd   : > { %v3592_v54 = vadd.f32 %v3591_v2, %v3491_v25  ;;  %3917 = vmatmul.f32.gmra.mxu1 %v10815_v48  ;;  %4195 = vmatmul.f32.gmra.mxu3 %v10873_v61  ;;  %v10876_v25 = vld [vmem:[#allocation30_spill] sm:$0xff] }
 0x3cf   : > { %v9171_v46 = vadd.f32 %v3700_v39, %v3592_v54 }
 0x3d0   : > { %4030 = vmatmul.f32.gmra.mxu2 %v10874_v58  ;;  %v3706_v56 = vpop.f32.mrf.mxu3 }
 0x3d1   : > { %v3337_v44 = vpop.f32.mrf.mxu0 }
 0x3d2   : > { %v3494_v38 = vpop.f32.mrf.mxu1 }
 0x3d3   : > { %v3495_v59 = vadd.f32 %v3494_v38, %v3329_v13  ;;  %v3596_v4 = vpop.f32.mrf.mxu2  ;;  %v10878_v38 = vld [vmem:[#allocation34_spill] sm:$0xff] }
 0x3d4   : > { %3836 = vmatmul.f32.gmra.mxu0 %v10875_v43 }
 0x3d5   : > { %v3597_v31 = vadd.f32 %v3596_v4, %v3495_v59  ;;  %3921 = vmatmul.f32.gmra.mxu1 %v10873_v61  ;;  %4199 = vmatmul.f32.gmra.mxu3 %v10875_v43 }
 0x3d7   : > { %v9177_v21 = vadd.f32 %v3706_v56, %v3597_v31 }
 0x3d8   : > { %4038 = vmatmul.f32.gmra.mxu2 %v10876_v25  ;;  %v3712_v39 = vpop.f32.mrf.mxu3 }
 0x3d9   : > { %v3345_v2 = vpop.f32.mrf.mxu0 }
 0x3da   : > { %v3498_v54 = vpop.f32.mrf.mxu1 }
 0x3db   : > { %v3499_v12 = vadd.f32 %v3498_v54, %v3337_v44  ;;  %v3601_v28 = vpop.f32.mrf.mxu2 }
 0x3dc   : > { %3840 = vmatmul.f32.gmra.mxu0 %v10877_v15 }
 0x3dd   : > { %v3602_v13 = vadd.f32 %v3601_v28, %v3499_v12  ;;  %3925 = vmatmul.f32.gmra.mxu1 %v10875_v43  ;;  %4203 = vmatmul.f32.gmra.mxu3 %v10877_v15  ;;  %v10879_v12 = vld [vmem:[#allocation38_spill] sm:$0xff] }
 0x3df   : > { %v9183_v4 = vadd.f32 %v3712_v39, %v3602_v13 }
 0x3e0   : > { %4046 = vmatmul.f32.gmra.mxu2 %v10878_v38  ;;  %v3718_v56 = vpop.f32.mrf.mxu3 }
 0x3e1   : > { %v3353_v59 = vpop.f32.mrf.mxu0 }
 0x3e2   : > { %v3502_v31 = vpop.f32.mrf.mxu1 }
 0x3e3   : > { %v3503_v3 = vadd.f32 %v3502_v31, %v3345_v2  ;;  %v3606_v25 = vpop.f32.mrf.mxu2 }
 0x3e4   : > { %3844 = vmatmul.f32.gmra.mxu0 %v10837_v23 }
 0x3e5   : > { %v3607_v44 = vadd.f32 %v3606_v25, %v3503_v3  ;;  %3929 = vmatmul.f32.gmra.mxu1 %v10877_v15  ;;  %4207 = vmatmul.f32.gmra.mxu3 %v10837_v23  ;;  %v10881_v25 = vld [vmem:[#allocation42_spill] sm:$0xff] }
 0x3e7   : > { %v9189_v28 = vadd.f32 %v3718_v56, %v3607_v44 }
 0x3e8   : > { %4054 = vmatmul.f32.gmra.mxu2 %v10879_v12  ;;  %v3724_v39 = vpop.f32.mrf.mxu3 }
 0x3e9   : > { %v3361_v54 = vpop.f32.mrf.mxu0 }
 0x3ea   : > { %v3506_v13 = vpop.f32.mrf.mxu1 }
 0x3eb   : > { %v3507_v38 = vadd.f32 %v3506_v13, %v3353_v59  ;;  %v3611_v58 = vpop.f32.mrf.mxu2 }
 0x3ec   : > { %3848 = vmatmul.f32.gmra.mxu0 %v10880_v53 }
 0x3ed   : > { %v3612_v2 = vadd.f32 %v3611_v58, %v3507_v38  ;;  %3933 = vmatmul.f32.gmra.mxu1 %v10837_v23  ;;  %4211 = vmatmul.f32.gmra.mxu3 %v10880_v53  ;;  %v10882_v38 = vld [vmem:[#allocation46_spill] sm:$0xff] }
 0x3ef   : > { %v9195_v3 = vadd.f32 %v3724_v39, %v3612_v2 }
 0x3f0   : > { %4062 = vmatmul.f32.gmra.mxu2 %v10881_v25  ;;  %v3730_v56 = vpop.f32.mrf.mxu3 }
 0x3f1   : > { %v3369_v31 = vpop.f32.mrf.mxu0 }
 0x3f2   : > { %v3510_v44 = vpop.f32.mrf.mxu1 }
 0x3f3   : > { %v3511_v12 = vadd.f32 %v3510_v44, %v3361_v54  ;;  %v3616_v34 = vpop.f32.mrf.mxu2 }
 0x3f4   : > { %3852 = vmatmul.f32.gmra.mxu0 %v10847_v36 }
 0x3f5   : > { %v3617_v59 = vadd.f32 %v3616_v34, %v3511_v12  ;;  %3937 = vmatmul.f32.gmra.mxu1 %v10880_v53  ;;  %4215 = vmatmul.f32.gmra.mxu3 %v10847_v36 }
 0x3f7   : > { %v9201_v58 = vadd.f32 %v3730_v56, %v3617_v59 }
 0x3f8   : > { %4070 = vmatmul.f32.gmra.mxu2 %v10882_v38  ;;  %v3736_v39 = vpop.f32.mrf.mxu3 }
 0x3f9   : > { %v3377_v13 = vpop.f32.mrf.mxu0 }
 0x3fa   : > { %v3514_v2 = vpop.f32.mrf.mxu1 }
 0x3fb   : > { %v3515_v25 = vadd.f32 %v3514_v2, %v3369_v31  ;;  %v3621_v50 = vpop.f32.mrf.mxu2 }
 0x3fc   : > { %3856 = vmatmul.f32.gmra.mxu0 %v10854_v35 }
 0x3fd   : > { %v3622_v54 = vadd.f32 %v3621_v50, %v3515_v25  ;;  %3941 = vmatmul.f32.gmra.mxu1 %v10847_v36  ;;  %4219 = vmatmul.f32.gmra.mxu3 %v10854_v35 }
 0x3ff   : > { %v9207_v34 = vadd.f32 %v3736_v39, %v3622_v54 }
 0x400   : > { %4078 = vmatmul.f32.gmra.mxu2 %v10846_v49  ;;  %v3742_v12 = vpop.f32.mrf.mxu3 }
 0x401   : > { %v3385_v56 = vpop.f32.mrf.mxu0 }
 0x402   : > { %v3518_v44 = vpop.f32.mrf.mxu1 }
 0x403   : > { %v3519_v59 = vadd.f32 %v3518_v44, %v3377_v13  ;;  %v3626_v38 = vpop.f32.mrf.mxu2 }
 0x404   : > { %3860 = vmatmul.f32.gmra.mxu0 %v7371_v20 }
 0x405   : > { %v3627_v31 = vadd.f32 %v3626_v38, %v3519_v59  ;;  %3945 = vmatmul.f32.gmra.mxu1 %v10854_v35  ;;  %4223 = vmatmul.f32.gmra.mxu3 %v7371_v20 }
 0x407   : > { %v9213_v50 = vadd.f32 %v3742_v12, %v3627_v31  ;;  %v9223_v31 = vld [vmem:[%s8423_s4] sm:$0xf] }
 0x408   : > { %4086 = vmatmul.f32.gmra.mxu2 %v10852_v27  ;;  %v3748_v25 = vpop.f32.mrf.mxu3  ;;  %v9226_v27 = vperm.slane %v9223_v31, 2 }
 0x409   : > { %v3393_v39 = vpop.f32.mrf.mxu0 }
 0x40a   : > { %v3522_v2 = vpop.f32.mrf.mxu1  ;;  %vm344_vm0 = vcmp.eq.s32.totalorder %v6792_v7, %v9226_v27  ;;  %vm340_vm2 = vcmp.eq.s32.totalorder %v6804_v9, %v9226_v27  ;;  %vm336_vm3 = vcmp.eq.s32.totalorder %v6807_v10, %v9226_v27  ;;  %vm332_vm4 = vcmp.eq.s32.totalorder %v6810_v11, %v9226_v27 }
 0x40b   : > { %v3523_v54 = vadd.f32 %v3522_v2, %v3385_v56  ;;  %v3631_v49 = vpop.f32.mrf.mxu2  ;;  %6544 = vmatpush.msk.msrb.mxu0 %vm344_vm0, %v10545_v1  ;;  %6552 = vmatpush.msk.msrb.mxu3 %vm344_vm0, %v10545_v1  ;;  %vm328_vm5 = vcmp.eq.s32.totalorder %v6819_v14, %v9226_v27  ;;  %vm324_vm6 = vcmp.eq.s32.totalorder %v6825_v16, %v9226_v27 }
 0x40c   : > { %3864 = vmatmul.f32.gmra.mxu0 %v7412_v52  ;;  %vm320_vm7 = vcmp.eq.s32.totalorder %v6828_v17, %v9226_v27  ;;  %vm316_vm8 = vcmp.eq.s32.totalorder %v6786_v5, %v9226_v27 }
 0x40d   : > { %v3632_v13 = vadd.f32 %v3631_v49, %v3523_v54  ;;  %3949 = vmatmul.f32.gmra.mxu1 %v7371_v20  ;;  %4227 = vmatmul.f32.gmra.mxu3 %v7412_v52 }
 0x40e   : > { %6545 = vmatpush.msk.msrb.mxu0 %vm340_vm2, %v10545_v1  ;;  %6553 = vmatpush.msk.msrb.mxu3 %vm340_vm2, %v10545_v1 }
 0x40f   : > { %v9219_v38 = vadd.f32 %v3748_v25, %v3632_v13  ;;  %v6398_v25 = vsel %vm344_vm0, 1.0, %v10546_v33 }
 0x410   : > { %4094 = vmatmul.f32.gmra.mxu2 %v10860_v30  ;;  %v3754_v12 = vpop.f32.mrf.mxu3  ;;  %v9237_v54 = vsub.f32 %v6398_v25, %v6398_v25  ;;  %6546 = vmatpush.msk.msrb.mxu0 %vm336_vm3, %v10545_v1 }
 0x411   : > { %v3401_v44 = vpop.f32.mrf.mxu0  ;;  %6554 = vmatpush.msk.msrb.mxu3 %vm336_vm3, %v10545_v1 }
 0x412   : > { %v3526_v59 = vpop.f32.mrf.mxu1  ;;  %4955 = vmatpush.msrb.mxu2 %v9237_v54  ;;  %6547 = vmatpush.msk.msrb.mxu0 %vm332_vm4, %v10545_v1 }
 0x413   : > { %v3527_v56 = vadd.f32 %v3526_v59, %v3393_v39  ;;  %v3636_v2 = vpop.f32.mrf.mxu2  ;;  %v10449_v59 = vand.u32 4294901760, %v9237_v54  ;;  %6555 = vmatpush.msk.msrb.mxu3 %vm332_vm4, %v10545_v1 }
 0x414   : > { %3868 = vmatmul.f32.gmra.mxu0 %v7432_v0 }
 0x415   : > { %v3637_v49 = vadd.f32 %v3636_v2, %v3527_v56  ;;  %3953 = vmatmul.f32.gmra.mxu1 %v7412_v52  ;;  %4231 = vmatmul.f32.gmra.mxu3 %v7432_v0  ;;  %v4835_v25 = vsub.f32 %v9237_v54, %v10449_v59 }
 0x416   : > { %6548 = vmatpush.msk.msrb.mxu0 %vm328_vm5, %v10545_v1  ;;  %6556 = vmatpush.msk.msrb.mxu3 %vm328_vm5, %v10545_v1 }
 0x417   : > { %v9247_v39 = vadd.f32 %v3754_v12, %v3637_v49  ;;  %v4836_v26 = vand.u32 4294901760, %v4835_v25 }
 0x418   : > { %4102 = vmatmul.f32.gmra.mxu2 %v10865_v19  ;;  %v3760_v13 = vpop.f32.mrf.mxu3  ;;  %6549 = vmatpush.msk.msrb.mxu0 %vm324_vm6, %v10545_v1 }
 0x419   : > { %v3409_v56 = vpop.f32.mrf.mxu0  ;;  %4837 = vmatpush.msrb.mxu1 %v4836_v26  ;;  %6557 = vmatpush.msk.msrb.mxu3 %vm324_vm6, %v10545_v1 }
 0x41a   : > { %v3530_v2 = vpop.f32.mrf.mxu1  ;;  %6550 = vmatpush.msk.msrb.mxu0 %vm320_vm7, %v10545_v1 }
 0x41b   : > { %v3531_v30 = vadd.f32 %v3530_v2, %v3401_v44  ;;  %v3641_v51 = vpop.f32.mrf.mxu2  ;;  %6558 = vmatpush.msk.msrb.mxu3 %vm320_vm7, %v10545_v1 }
 0x41c   : > { %3872 = vmatmul.f32.gmra.mxu0 %v7472_v24 }
 0x41d   : > { %v3642_v12 = vadd.f32 %v3641_v51, %v3531_v30  ;;  %3957 = vmatmul.f32.gmra.mxu1 %v7432_v0  ;;  %4235 = vmatmul.f32.gmra.mxu3 %v7472_v24  ;;  %v6394_v51 = vsel %vm340_vm2, 1.0, %v10546_v33 }
 0x41e   : > { %v9276_v26 = vsub.f32 %v6394_v51, %v6394_v51  ;;  %6551 = vmatpush.msk.msrb.mxu0 %vm316_vm8, %v10545_v1  ;;  %6559 = vmatpush.msk.msrb.mxu3 %vm316_vm8, %v10545_v1 }
 0x41f   : > { %v9258_v49 = vadd.f32 %v3760_v13, %v3642_v12 }
 0x420   : > { %4110 = vmatmul.f32.gmra.mxu2 %v10867_v45  ;;  %v3766_v19 = vpop.f32.mrf.mxu3  ;;  %v10454_v13 = vand.u32 4294901760, %v9276_v26  ;;  %v10884_v45 = vld [vmem:[#allocation7_spill] sm:$0xff] }
 0x421   : > { %v3417_v37 = vpop.f32.mrf.mxu0  ;;  %4958 = vmatpush.msrb.mxu2 %v9276_v26 }
 0x422   : > { %v3534_v32 = vpop.f32.mrf.mxu1  ;;  %v4841_v12 = vsub.f32 %v9276_v26, %v10454_v13 }
 0x423   : > { %v3535_v44 = vadd.f32 %v3534_v32, %v3409_v56  ;;  %v3646_v2 = vpop.f32.mrf.mxu2 }
 0x424   : > { %3876 = vmatmul.f32.gmra.mxu0 %v10712_v55  ;;  %v4842_v59 = vand.u32 4294901760, %v4841_v12 }
 0x425   : > { %v3647_v32 = vadd.f32 %v3646_v2, %v3535_v44  ;;  %3961 = vmatmul.f32.gmra.mxu1 %v7472_v24  ;;  %4239 = vmatmul.f32.gmra.mxu3 %v10712_v55 }
 0x426   : > { %4843 = vmatpush.msrb.mxu1 %v4842_v59 }
 0x427   : > { %v9281_v30 = vadd.f32 %v3766_v19, %v3647_v32 }
 0x428   : > { %4118 = vmatmul.f32.gmra.mxu2 %v10869_v42  ;;  %v3772_v56 = vpop.f32.mrf.mxu3  ;;  %v10886_v42 = vld [vmem:[#allocation64_spill] sm:$0xff] }
 0x429   : > { %10883 = vst [vmem:[#allocation191_spill] sm:$0xff] %v9281_v30  ;;  %v3817_v25 = vpop.f32.mrf.mxu0  ;;  %v10887_v30 = vld [vmem:[#allocation79_spill] sm:$0xff] }
 0x42a   : > { %v3538_v51 = vpop.f32.mrf.mxu1  ;;  %v1010_v13 = vadd.f32 %v10887_v30, %v10886_v42 }
 0x42b   : > { %v3539_v44 = vadd.f32 %v3538_v51, %v3417_v37  ;;  %v3651_v2 = vpop.f32.mrf.mxu2  ;;  %v3818_v37 = vadd.f32 %v3817_v25, %v9153_v18  ;;  %v10890_v18 = vld [vmem:[#allocation9_spill] sm:$0xff] }
 0x42c   : > { %4277 = vmatmul.f32.vlgmr.msra.gmra.mxu0 %v10884_v45 }
 0x42d   : > { %v3652_v24 = vadd.f32 %v3651_v2, %v3539_v44  ;;  %3965 = vmatmul.f32.gmra.mxu1 %v10712_v55  ;;  %4607 = vmatmul.f32.vlgmr.msra.gmra.mxu3 %v6788_v6  ;;  %v10888_v44 = vld [vmem:[#allocation82_spill] sm:$0xff] }
 0x42e   : > { %v1099_v2 = vadd.f32 %v10888_v44, %v1010_v13  ;;  %v10891_v13 = vld [vmem:[#allocation8_spill] sm:$0xff] }
 0x42f   : > { %v9291_v19 = vadd.f32 %v3772_v56, %v3652_v24  ;;  %v6390_v24 = vsel %vm336_vm3, 1.0, %v10546_v33 }
 0x430   : > { %4518 = vmatmul.f32.vlgmr.msra.gmra.mxu2 %v6788_v6  ;;  %v4180_v32 = vpop.f32.mrf.mxu3  ;;  %v9315_v59 = vsub.f32 %v6390_v24, %v6390_v24  ;;  %v10894_v24 = vld [vmem:[#allocation84_spill] sm:$0xff] }
 0x431   : > { %10885 = vst [vmem:[#allocation192_spill] sm:$0xff] %v9291_v19  ;;  %v3821_v51 = vpop.f32.mrf.mxu0 }
 0x432   : > { %v3906_v12 = vpop.f32.mrf.mxu1  ;;  %4961 = vmatpush.msrb.mxu2 %v9315_v59  ;;  %v10462_v56 = vand.u32 4294901760, %v9315_v59 }
 0x433   : > { %v3907_v45 = vadd.f32 %v3906_v12, %v3818_v37  ;;  %v3999_v55 = vpop.f32.mrf.mxu2  ;;  %v10892_v37 = vld [vmem:[#allocation65_spill] sm:$0xff] }
 0x434   : > { %v9312_v42 = vadd.f32 %v4180_v32, %v3999_v55  ;;  %4282 = vmatmul.f32.gmra.mxu0 %v10890_v18  ;;  %v10893_v12 = vld [vmem:[#allocation81_spill] sm:$0xff]  ;;  %v3822_v32 = vadd.f32 %v3821_v51, %v9159_v47 }
 0x435   : > { %v6075_v30 = vmul.f32 %v3907_v45, %v1099_v2  ;;  %4383 = vmatmul.f32.vlgmr.msra.gmra.mxu1 %v10891_v13  ;;  %4611 = vmatmul.f32.gmra.mxu3 %v6794_v8  ;;  %v1014_v55 = vadd.f32 %v10893_v12, %v10892_v37  ;;  %v4847_v45 = vsub.f32 %v9315_v59, %v10462_v56  ;;  %v10897_v37 = vld [vmem:[#allocation66_spill] sm:$0xff]  ;;  %v10898_v12 = vld [vmem:[#allocation83_spill] sm:$0xff] }
 0x436   : > { %10889 = vst [vmem:[#allocation64_spill] sm:$0xff] %v9312_v42 }
 0x437   : > { %v1103_v18 = vadd.f32 %v10894_v24, %v1014_v55  ;;  %v4848_v13 = vand.u32 4294901760, %v4847_v45  ;;  %v1018_v55 = vadd.f32 %v10898_v12, %v10897_v37  ;;  %v10902_v24 = vld [vmem:[#allocation14_spill] sm:$0xff] }
 0x438   : > { %4522 = vmatmul.f32.gmra.mxu2 %v6794_v8  ;;  %v4184_v25 = vpop.f32.mrf.mxu3  ;;  %v10895_v8 = vld [vmem:[#allocation13_spill] sm:$0xff] }
 0x439   : > { %v3825_v44 = vpop.f32.mrf.mxu0  ;;  %4849 = vmatpush.msrb.mxu1 %v4848_v13 }
 0x43a   : > { %v3910_v2 = vpop.f32.mrf.mxu1 }
 0x43b   : > { %v3911_v6 = vadd.f32 %v3910_v2, %v3822_v32  ;;  %v4007_v42 = vpop.f32.mrf.mxu2  ;;  %v3826_v32 = vadd.f32 %v3825_v44, %v9165_v29 }
 0x43c   : > { %v9329_v19 = vadd.f32 %v4184_v25, %v4007_v42  ;;  %4287 = vmatmul.f32.gmra.mxu0 %v10895_v8  ;;  %v10907_v8 = vld [vmem:[#allocation19_spill] sm:$0xff] }
 0x43d   : > { %v6079_v57 = vmul.f32 %v3911_v6, %v1103_v18  ;;  %4389 = vmatmul.f32.gmra.mxu1 %v10896_v22  ;;  %4615 = vmatmul.f32.gmra.mxu3 %v10810_v40  ;;  %v10899_v6 = vld [vmem:[#allocation86_spill] sm:$0xff] }
 0x43e   : > { %v1107_v18 = vadd.f32 %v10899_v6, %v1018_v55 }
 0x43f   : > { %v6139_v47 = vadd.f32 %v6079_v57, %v6075_v30  ;;  %v6386_v57 = vsel %vm332_vm4, 1.0, %v10546_v33  ;;  %v10901_v30 = vld [vmem:[#allocation17_spill] sm:$0xff] }
 0x440   : > { %4526 = vmatmul.f32.gmra.mxu2 %v10810_v40  ;;  %v4188_v51 = vpop.f32.mrf.mxu3  ;;  %v9356_v13 = vsub.f32 %v6386_v57, %v6386_v57  ;;  %v10905_v57 = vld [vmem:[#allocation88_spill] sm:$0xff] }
 0x441   : > { %v3829_v45 = vpop.f32.mrf.mxu0 }
 0x442   : > { %v3914_v42 = vpop.f32.mrf.mxu1  ;;  %4964 = vmatpush.msrb.mxu2 %v9356_v13  ;;  %v10465_v12 = vand.u32 4294901760, %v9356_v13  ;;  %v3830_v6 = vadd.f32 %v3829_v45, %v9171_v46 }
 0x443   : > { %v3915_v25 = vadd.f32 %v3914_v42, %v3826_v32  ;;  %v4015_v2 = vpop.f32.mrf.mxu2  ;;  %v10903_v32 = vld [vmem:[#allocation67_spill] sm:$0xff] }
 0x444   : > { %v9353_v29 = vadd.f32 %v4188_v51, %v4015_v2  ;;  %4292 = vmatmul.f32.gmra.mxu0 %v10901_v30  ;;  %v10904_v51 = vld [vmem:[#allocation85_spill] sm:$0xff] }
 0x445   : > { %v6083_v44 = vmul.f32 %v3915_v25, %v1107_v18  ;;  %4395 = vmatmul.f32.gmra.mxu1 %v10902_v24  ;;  %4619 = vmatmul.f32.gmra.mxu3 %v10815_v48  ;;  %v1022_v42 = vadd.f32 %v10904_v51, %v10903_v32  ;;  %v4853_v18 = vsub.f32 %v9356_v13, %v10465_v12  ;;  %v10908_v32 = vld [vmem:[#allocation68_spill] sm:$0xff]  ;;  %v10909_v51 = vld [vmem:[#allocation87_spill] sm:$0xff] }
 0x446   : > { %10900 = vst [vmem:[#allocation79_spill] sm:$0xff] %v9353_v29 }
 0x447   : > { %v6140_v37 = vadd.f32 %v6139_v47, %v6083_v44  ;;  %v1111_v56 = vadd.f32 %v10905_v57, %v1022_v42  ;;  %v4854_v44 = vand.u32 4294901760, %v4853_v18  ;;  %v1026_v42 = vadd.f32 %v10909_v51, %v10908_v32 }
 0x448   : > { %4530 = vmatmul.f32.gmra.mxu2 %v10815_v48  ;;  %v4192_v55 = vpop.f32.mrf.mxu3  ;;  %v10906_v48 = vld [vmem:[#allocation21_spill] sm:$0xff] }
 0x449   : > { %v3833_v2 = vpop.f32.mrf.mxu0  ;;  %4855 = vmatpush.msrb.mxu1 %v4854_v44  ;;  %v10913_v44 = vld [vmem:[#allocation23_spill] sm:$0xff] }
 0x44a   : > { %v3918_v25 = vpop.f32.mrf.mxu1 }
 0x44b   : > { %v3919_v30 = vadd.f32 %v3918_v25, %v3830_v6  ;;  %v4023_v47 = vpop.f32.mrf.mxu2  ;;  %v3834_v6 = vadd.f32 %v3833_v2, %v9177_v21 }
 0x44c   : > { %v9370_v40 = vadd.f32 %v4192_v55, %v4023_v47  ;;  %4297 = vmatmul.f32.gmra.mxu0 %v10906_v48  ;;  %v10918_v48 = vld [vmem:[#allocation27_spill] sm:$0xff] }
 0x44d   : > { %v6087_v29 = vmul.f32 %v3919_v30, %v1111_v56  ;;  %4401 = vmatmul.f32.gmra.mxu1 %v10907_v8  ;;  %4623 = vmatmul.f32.gmra.mxu3 %v10873_v61  ;;  %v10910_v56 = vld [vmem:[#allocation90_spill] sm:$0xff] }
 0x44e   : > { %v1115_v30 = vadd.f32 %v10910_v56, %v1026_v42 }
 0x44f   : > { %v6141_v46 = vadd.f32 %v6140_v37, %v6087_v29  ;;  %v6382_v29 = vsel %vm328_vm5, 1.0, %v10546_v33  ;;  %v10912_v37 = vld [vmem:[#allocation25_spill] sm:$0xff] }
 0x450   : > { %4534 = vmatmul.f32.gmra.mxu2 %v10873_v61  ;;  %v4196_v45 = vpop.f32.mrf.mxu3  ;;  %v9397_v2 = vsub.f32 %v6382_v29, %v6382_v29  ;;  %v10916_v29 = vld [vmem:[#allocation93_spill] sm:$0xff] }
 0x451   : > { %v3837_v18 = vpop.f32.mrf.mxu0 }
 0x452   : > { %v3922_v55 = vpop.f32.mrf.mxu1  ;;  %4967 = vmatpush.msrb.mxu2 %v9397_v2  ;;  %v10468_v51 = vand.u32 4294901760, %v9397_v2  ;;  %v3838_v56 = vadd.f32 %v3837_v18, %v9183_v4 }
 0x453   : > { %v3923_v25 = vadd.f32 %v3922_v55, %v3834_v6  ;;  %v4031_v57 = vpop.f32.mrf.mxu2  ;;  %v10914_v6 = vld [vmem:[#allocation69_spill] sm:$0xff] }
 0x454   : > { %v9394_v21 = vadd.f32 %v4196_v45, %v4031_v57  ;;  %4302 = vmatmul.f32.gmra.mxu0 %v10912_v37  ;;  %v10915_v45 = vld [vmem:[#allocation89_spill] sm:$0xff] }
 0x455   : > { %v6091_v47 = vmul.f32 %v3923_v25, %v1115_v30  ;;  %4407 = vmatmul.f32.gmra.mxu1 %v10913_v44  ;;  %4627 = vmatmul.f32.gmra.mxu3 %v10875_v43  ;;  %v1030_v55 = vadd.f32 %v10915_v45, %v10914_v6  ;;  %v4859_v30 = vsub.f32 %v9397_v2, %v10468_v51  ;;  %v10919_v6 = vld [vmem:[#allocation70_spill] sm:$0xff]  ;;  %v10920_v45 = vld [vmem:[#allocation92_spill] sm:$0xff] }
 0x456   : > { %10911 = vst [vmem:[#allocation82_spill] sm:$0xff] %v9394_v21 }
 0x457   : > { %v6142_v32 = vadd.f32 %v6141_v46, %v6091_v47  ;;  %v1119_v12 = vadd.f32 %v10916_v29, %v1030_v55  ;;  %v4860_v47 = vand.u32 4294901760, %v4859_v30  ;;  %v1034_v55 = vadd.f32 %v10920_v45, %v10919_v6 }
 0x458   : > { %4538 = vmatmul.f32.gmra.mxu2 %v10875_v43  ;;  %v4200_v42 = vpop.f32.mrf.mxu3  ;;  %v10917_v43 = vld [vmem:[#allocation29_spill] sm:$0xff] }
 0x459   : > { %v3841_v57 = vpop.f32.mrf.mxu0  ;;  %4861 = vmatpush.msrb.mxu1 %v4860_v47  ;;  %v10924_v47 = vld [vmem:[#allocation31_spill] sm:$0xff] }
 0x45a   : > { %v3926_v25 = vpop.f32.mrf.mxu1 }
 0x45b   : > { %v3927_v37 = vadd.f32 %v3926_v25, %v3838_v56  ;;  %v4039_v46 = vpop.f32.mrf.mxu2  ;;  %v3842_v56 = vadd.f32 %v3841_v57, %v9189_v28 }
 0x45c   : > { %v9411_v61 = vadd.f32 %v4200_v42, %v4039_v46  ;;  %4307 = vmatmul.f32.gmra.mxu0 %v10917_v43  ;;  %v10929_v43 = vld [vmem:[#allocation35_spill] sm:$0xff] }
 0x45d   : > { %v6095_v21 = vmul.f32 %v3927_v37, %v1119_v12  ;;  %4413 = vmatmul.f32.gmra.mxu1 %v10918_v48  ;;  %4631 = vmatmul.f32.gmra.mxu3 %v10877_v15  ;;  %v10921_v12 = vld [vmem:[#allocation96_spill] sm:$0xff] }
 0x45e   : > { %v1123_v37 = vadd.f32 %v10921_v12, %v1034_v55 }
 0x45f   : > { %v6143_v4 = vadd.f32 %v6142_v32, %v6095_v21  ;;  %v6378_v21 = vsel %vm324_vm6, 1.0, %v10546_v33  ;;  %v10923_v32 = vld [vmem:[#allocation33_spill] sm:$0xff] }
 0x460   : > { %4542 = vmatmul.f32.gmra.mxu2 %v10877_v15  ;;  %v4204_v18 = vpop.f32.mrf.mxu3  ;;  %v9438_v57 = vsub.f32 %v6378_v21, %v6378_v21  ;;  %v10927_v21 = vld [vmem:[#allocation99_spill] sm:$0xff] }
 0x461   : > { %v3845_v30 = vpop.f32.mrf.mxu0 }
 0x462   : > { %v3930_v42 = vpop.f32.mrf.mxu1  ;;  %4970 = vmatpush.msrb.mxu2 %v9438_v57  ;;  %v10471_v45 = vand.u32 4294901760, %v9438_v57  ;;  %v3846_v12 = vadd.f32 %v3845_v30, %v9195_v3 }
 0x463   : > { %v3931_v25 = vadd.f32 %v3930_v42, %v3842_v56  ;;  %v4047_v29 = vpop.f32.mrf.mxu2  ;;  %v10925_v56 = vld [vmem:[#allocation71_spill] sm:$0xff] }
 0x464   : > { %v9435_v28 = vadd.f32 %v4204_v18, %v4047_v29  ;;  %4312 = vmatmul.f32.gmra.mxu0 %v10923_v32  ;;  %v10926_v18 = vld [vmem:[#allocation95_spill] sm:$0xff] }
 0x465   : > { %v6099_v46 = vmul.f32 %v3931_v25, %v1123_v37  ;;  %4419 = vmatmul.f32.gmra.mxu1 %v10924_v47  ;;  %4635 = vmatmul.f32.gmra.mxu3 %v10837_v23  ;;  %v1038_v42 = vadd.f32 %v10926_v18, %v10925_v56  ;;  %v4865_v37 = vsub.f32 %v9438_v57, %v10471_v45  ;;  %v10930_v56 = vld [vmem:[#allocation72_spill] sm:$0xff]  ;;  %v10931_v18 = vld [vmem:[#allocation98_spill] sm:$0xff] }
 0x466   : > { %10922 = vst [vmem:[#allocation65_spill] sm:$0xff] %v9435_v28 }
 0x467   : > { %v6144_v6 = vadd.f32 %v6143_v4, %v6099_v46  ;;  %v1127_v51 = vadd.f32 %v10927_v21, %v1038_v42  ;;  %v4866_v46 = vand.u32 4294901760, %v4865_v37  ;;  %v1042_v42 = vadd.f32 %v10931_v18, %v10930_v56 }
 0x468   : > { %4546 = vmatmul.f32.gmra.mxu2 %v10837_v23  ;;  %v4208_v55 = vpop.f32.mrf.mxu3  ;;  %v10928_v23 = vld [vmem:[#allocation37_spill] sm:$0xff] }
 0x469   : > { %v3849_v29 = vpop.f32.mrf.mxu0  ;;  %4867 = vmatpush.msrb.mxu1 %v4866_v46  ;;  %v10935_v46 = vld [vmem:[#allocation39_spill] sm:$0xff] }
 0x46a   : > { %v3934_v25 = vpop.f32.mrf.mxu1 }
 0x46b   : > { %v3935_v32 = vadd.f32 %v3934_v25, %v3846_v12  ;;  %v4055_v4 = vpop.f32.mrf.mxu2  ;;  %v3850_v12 = vadd.f32 %v3849_v29, %v9201_v58 }
 0x46c   : > { %v9452_v15 = vadd.f32 %v4208_v55, %v4055_v4  ;;  %4317 = vmatmul.f32.gmra.mxu0 %v10928_v23  ;;  %v10940_v23 = vld [vmem:[#allocation43_spill] sm:$0xff] }
 0x46d   : > { %v6103_v28 = vmul.f32 %v3935_v32, %v1127_v51  ;;  %4425 = vmatmul.f32.gmra.mxu1 %v10929_v43  ;;  %4639 = vmatmul.f32.gmra.mxu3 %v10880_v53  ;;  %v10932_v51 = vld [vmem:[#allocation102_spill] sm:$0xff] }
 0x46e   : > { %v1131_v32 = vadd.f32 %v10932_v51, %v1042_v42 }
 0x46f   : > { %v6145_v3 = vadd.f32 %v6144_v6, %v6103_v28  ;;  %v6374_v28 = vsel %vm320_vm7, 1.0, %v10546_v33  ;;  %v10934_v6 = vld [vmem:[#allocation41_spill] sm:$0xff] }
 0x470   : > { %4550 = vmatmul.f32.gmra.mxu2 %v10880_v53  ;;  %v4212_v30 = vpop.f32.mrf.mxu3  ;;  %v9479_v29 = vsub.f32 %v6374_v28, %v6374_v28  ;;  %v10938_v28 = vld [vmem:[#allocation105_spill] sm:$0xff] }
 0x471   : > { %v3853_v37 = vpop.f32.mrf.mxu0 }
 0x472   : > { %v3938_v55 = vpop.f32.mrf.mxu1  ;;  %4973 = vmatpush.msrb.mxu2 %v9479_v29  ;;  %v10474_v18 = vand.u32 4294901760, %v9479_v29  ;;  %v3854_v51 = vadd.f32 %v3853_v37, %v9207_v34 }
 0x473   : > { %v3939_v25 = vadd.f32 %v3938_v55, %v3850_v12  ;;  %v4063_v21 = vpop.f32.mrf.mxu2  ;;  %v10936_v12 = vld [vmem:[#allocation73_spill] sm:$0xff] }
 0x474   : > { %v9476_v58 = vadd.f32 %v4212_v30, %v4063_v21  ;;  %4322 = vmatmul.f32.gmra.mxu0 %v10934_v6  ;;  %v10937_v30 = vld [vmem:[#allocation101_spill] sm:$0xff] }
 0x475   : > { %v6107_v4 = vmul.f32 %v3939_v25, %v1131_v32  ;;  %4431 = vmatmul.f32.gmra.mxu1 %v10935_v46  ;;  %4643 = vmatmul.f32.gmra.mxu3 %v10847_v36  ;;  %v1046_v55 = vadd.f32 %v10937_v30, %v10936_v12  ;;  %v4871_v32 = vsub.f32 %v9479_v29, %v10474_v18  ;;  %v10941_v12 = vld [vmem:[#allocation74_spill] sm:$0xff]  ;;  %v10942_v30 = vld [vmem:[#allocation104_spill] sm:$0xff]  ;;  %v10949_v18 = vand.u32 4294901760, %v9315_v59 }
 0x476   : > { %10933 = vst [vmem:[#allocation81_spill] sm:$0xff] %v9476_v58 }
 0x477   : > { %v6146_v56 = vadd.f32 %v6145_v3, %v6107_v4  ;;  %v1135_v45 = vadd.f32 %v10938_v28, %v1046_v55  ;;  %v4872_v4 = vand.u32 4294901760, %v4871_v32  ;;  %v1050_v55 = vadd.f32 %v10942_v30, %v10941_v12 }
 0x478   : > { %4554 = vmatmul.f32.gmra.mxu2 %v10847_v36  ;;  %v4216_v42 = vpop.f32.mrf.mxu3  ;;  %v10939_v36 = vld [vmem:[#allocation45_spill] sm:$0xff] }
 0x479   : > { %v3857_v21 = vpop.f32.mrf.mxu0  ;;  %4873 = vmatpush.msrb.mxu1 %v4872_v4  ;;  %v10945_v4 = vand.u32 4294901760, %v9237_v54  ;;  %v10950_v54 = vld [vmem:[#allocation110_spill] sm:$0xff] }
 0x47a   : > { %v3942_v25 = vpop.f32.mrf.mxu1 }
 0x47b   : > { %v3943_v6 = vadd.f32 %v3942_v25, %v3854_v51  ;;  %v4071_v3 = vpop.f32.mrf.mxu2  ;;  %v3858_v51 = vadd.f32 %v3857_v21, %v9213_v50  ;;  %5190 = vmatpush.msra.mxu0 %v10945_v4 }
 0x47c   : > { %v9493_v53 = vadd.f32 %v4216_v42, %v4071_v3  ;;  %4327 = vmatmul.f32.gmra.mxu0 %v10939_v36  ;;  %v10944_v3 = vld [vmem:[#allocation47_spill] sm:$0xff] }
 0x47d   : > { %v6111_v58 = vmul.f32 %v3943_v6, %v1135_v45  ;;  %4437 = vmatmul.f32.gmra.mxu1 %v10940_v23  ;;  %4647 = vmatmul.f32.gmra.mxu3 %v10854_v35  ;;  %v10943_v45 = vld [vmem:[#allocation107_spill] sm:$0xff] }
 0x47e   : > { %v1139_v6 = vadd.f32 %v10943_v45, %v1050_v55 }
 0x47f   : > { %v6147_v34 = vadd.f32 %v6146_v56, %v6111_v58  ;;  %v6370_v58 = vsel %vm316_vm8, 1.0, %v10546_v33 }
 0x480   : > { %4558 = vmatmul.f32.gmra.mxu2 %v10854_v35  ;;  %v4220_v37 = vpop.f32.mrf.mxu3  ;;  %v4875_v56 = vsub.f32 %v6370_v58, %v6370_v58 }
 0x481   : > { %v3861_v32 = vpop.f32.mrf.mxu0 }
 0x482   : > { %v3946_v42 = vpop.f32.mrf.mxu1  ;;  %4976 = vmatpush.msrb.mxu2 %v4875_v56  ;;  %v4876_v30 = vand.u32 4294901760, %v4875_v56 }
 0x483   : > { %v3947_v25 = vadd.f32 %v3946_v42, %v3858_v51  ;;  %v4079_v28 = vpop.f32.mrf.mxu2  ;;  %v10947_v51 = vld [vmem:[#allocation75_spill] sm:$0xff]  ;;  %v10948_v42 = vld [vmem:[#allocation106_spill] sm:$0xff] }
 0x484   : > { %v9517_v50 = vadd.f32 %v4220_v37, %v4079_v28  ;;  %4332 = vmatmul.f32.gmra.mxu0 %v10857_v60  ;;  %v10946_v37 = vand.u32 4294901760, %v9276_v26  ;;  %v1054_v45 = vadd.f32 %v10948_v42, %v10947_v51  ;;  %v4877_v28 = vsub.f32 %v4875_v56, %v4876_v30  ;;  %v10954_v56 = vld [vmem:[#allocation76_spill] sm:$0xff] }
 0x485   : > { %v6115_v21 = vmul.f32 %v3947_v25, %v1139_v6  ;;  %4443 = vmatmul.f32.gmra.mxu1 %v10944_v3  ;;  %4651 = vmatmul.f32.gmra.mxu3 %v7371_v20  ;;  %v3862_v6 = vadd.f32 %v3861_v32, %v9219_v38  ;;  %v10952_v38 = vand.u32 4294901760, %v9356_v13  ;;  %v10953_v32 = vand.u32 4294901760, %v9397_v2 }
 0x486   : > { %5194 = vmatpush.msra.mxu0 %v10946_v37  ;;  %v10951_v37 = vld [vmem:[#allocation51_spill] sm:$0xff] }
 0x487   : > { %v6148_v12 = vadd.f32 %v6147_v34, %v6115_v21  ;;  %v1143_v34 = vadd.f32 %v10950_v54, %v1054_v45  ;;  %v10957_v45 = vld [vmem:[#allocation112_spill] sm:$0xff] }
 0x488   : > { %4562 = vmatmul.f32.gmra.mxu2 %v7371_v20  ;;  %v4224_v55 = vpop.f32.mrf.mxu3  ;;  %5198 = vmatpush.msra.mxu0 %v10949_v18  ;;  %v4878_v20 = vand.u32 4294901760, %v4877_v28 }
 0x489   : > { %v3865_v25 = vpop.f32.mrf.mxu0 }
 0x48a   : > { %v3950_v58 = vpop.f32.mrf.mxu1  ;;  %4879 = vmatpush.msrb.mxu1 %v4878_v20  ;;  %5202 = vmatpush.msra.mxu0 %v10952_v38  ;;  %v3866_v20 = vadd.f32 %v3865_v25, %v9247_v39 }
 0x48b   : > { %v3951_v21 = vadd.f32 %v3950_v58, %v3862_v6  ;;  %v4087_v4 = vpop.f32.mrf.mxu2 }
 0x48c   : > { %v9533_v60 = vadd.f32 %v4224_v55, %v4087_v4  ;;  %4337 = vmatmul.f32.gmra.mxu0 %v7421_v62  ;;  %6560 = vmatpush.msk.msra.mxu1 %vm344_vm0, %v10545_v1  ;;  %v10955_v55 = vld [vmem:[#allocation109_spill] sm:$0xff]  ;;  %vm6230_vm0 = vcmask 1040384  }
 0x48d   : > { %v6119_v26 = vmul.f32 %v3951_v21, %v1143_v34  ;;  %4449 = vmatmul.f32.gmra.mxu1 %v10951_v37  ;;  %4655 = vmatmul.f32.gmra.mxu3 %v7412_v52  ;;  %v1058_v51 = vadd.f32 %v10955_v55, %v10954_v56  ;;  %v10959_v34 = vld [vmem:[#allocation77_spill] sm:$0xff]  ;;  %v10960_v21 = vld [vmem:[#allocation111_spill] sm:$0xff]  ;;  %v9586_v55 = vperm.slane %v9223_v31, 3 }
 0x48e   : > { %5206 = vmatpush.msra.mxu0 %v10953_v32  ;;  %6561 = vmatpush.msk.msra.mxu1 %vm340_vm2, %v10545_v1  ;;  %v1062_v4 = vadd.f32 %v10960_v21, %v10959_v34  ;;  %vm6232_vm2 = vcmask 1042434  }
 0x48f   : > { %v6149_v59 = vadd.f32 %v6148_v12, %v6119_v26  ;;  %v10956_v12 = vand.u32 4294901760, %v9438_v57  ;;  %v1147_v6 = vadd.f32 %v10957_v45, %v1058_v51  ;;  %v10958_v57 = vand.u32 4294901760, %v9479_v29  ;;  %v10961_v29 = vld [vmem:[#allocation114_spill] sm:$0xff] }
 0x490   : > { %4566 = vmatmul.f32.gmra.mxu2 %v7412_v52  ;;  %v4228_v18 = vpop.f32.mrf.mxu3  ;;  %6562 = vmatpush.msk.msra.mxu1 %vm336_vm3, %v10545_v1  ;;  %vm345_vm9 = vcmp.eq.s32.totalorder %v6792_v7, %v9586_v55  ;;  %vm341_vm10 = vcmp.eq.s32.totalorder %v6804_v9, %v9586_v55  ;;  %vm337_vm11 = vcmp.eq.s32.totalorder %v6807_v10, %v9586_v55  ;;  %vm6234_vm3 = vcmask 1041408  }
 0x491   : > { %v3869_v42 = vpop.f32.mrf.mxu0  ;;  %5210 = vmatpush.msra.mxu0 %v10956_v12  ;;  %v6399_v31 = vsel %vm345_vm9, 1.0, %v10546_v33  ;;  %6568 = vmatpush.msk.msra.mxu2 %vm345_vm9, %v10545_v1  ;;  %vm333_vm12 = vcmp.eq.s32.totalorder %v6810_v11, %v9586_v55  ;;  %vm329_vm13 = vcmp.eq.s32.totalorder %v6819_v14, %v9586_v55  ;;  %vm325_vm14 = vcmp.eq.s32.totalorder %v6825_v16, %v9586_v55 }
 0x492   : > { %v3954_v13 = vpop.f32.mrf.mxu1  ;;  %6563 = vmatpush.msk.msra.mxu1 %vm332_vm4, %v10545_v1  ;;  %v3870_v26 = vadd.f32 %v3869_v42, %v9258_v49  ;;  %v10964_v42 = vld [vmem:[#allocation55_spill] sm:$0xff]  ;;  %v9611_v12 = vsub.f32 %v6399_v31, %v6399_v31  ;;  %vm321_vm15 = vcmp.eq.s32.totalorder %v6828_v17, %v9586_v55  ;;  %vm317_vm1 = vcmp.eq.s32.totalorder %v6786_v5, %v9586_v55 }
 0x493   : > { %v3955_v28 = vadd.f32 %v3954_v13, %v3866_v20  ;;  %v4095_v2 = vpop.f32.mrf.mxu2  ;;  %5214 = vmatpush.msra.mxu0 %v10958_v57  ;;  %v10962_v20 = vld [vmem:[#allocation56_spill] sm:$0xff]  ;;  %6569 = vmatpush.msk.msra.mxu2 %vm341_vm10, %v10545_v1 }
 0x494   : > { %v9561_v39 = vadd.f32 %v4228_v18, %v4095_v2  ;;  %4342 = vmatmul.f32.gmra.mxu0 %v7457_v63  ;;  %6564 = vmatpush.msk.msra.mxu1 %vm328_vm5, %v10545_v1  ;;  %v10478_v34 = vand.u32 4294901760, %v9611_v12 }
 0x495   : > { %v6123_v25 = vmul.f32 %v3955_v28, %v1147_v6  ;;  %4455 = vmatmul.f32.gmra.mxu1 %v7430_v41  ;;  %4659 = vmatmul.f32.gmra.mxu3 %v7432_v0  ;;  %v10965_v6 = vld [vmem:[#allocation78_spill] sm:$0xff]  ;;  %v10966_v28 = vld [vmem:[#allocation113_spill] sm:$0xff] }
 0x496   : > { %5218 = vmatpush.msra.mxu0 %v4876_v30  ;;  %6565 = vmatpush.msk.msra.mxu1 %vm324_vm6, %v10545_v1  ;;  %v10963_v30 = vld [vmem:[#allocation54_spill] sm:$0xff]  ;;  %v1066_v2 = vadd.f32 %v10966_v28, %v10965_v6 }
 0x497   : > { %v6150_v58 = vadd.f32 %v6149_v59, %v6123_v25  ;;  %v1151_v59 = vadd.f32 %v10961_v29, %v1062_v4  ;;  %v10967_v25 = vld [vmem:[#allocation191_spill] sm:$0xff]  ;;  %v10968_v4 = vld [vmem:[#allocation116_spill] sm:$0xff]  ;;  %6570 = vmatpush.msk.msra.mxu2 %vm337_vm11, %v10545_v1 }
 0x498   : > { %4570 = vmatmul.f32.gmra.mxu2 %v7432_v0  ;;  %v4232_v54 = vpop.f32.mrf.mxu3  ;;  %6566 = vmatpush.msk.msra.mxu1 %vm320_vm7, %v10545_v1 }
 0x499   : > { %v3873_v38 = vpop.f32.mrf.mxu0  ;;  %6571 = vmatpush.msk.msra.mxu2 %vm333_vm12, %v10545_v1 }
 0x49a   : > { %v3958_v18 = vpop.f32.mrf.mxu1  ;;  %6567 = vmatpush.msk.msra.mxu1 %vm316_vm8, %v10545_v1  ;;  %v3874_v57 = vadd.f32 %v3873_v38, %v10967_v25  ;;  %v6395_v38 = vsel %vm341_vm10, 1.0, %v10546_v33  ;;  %v10973_v25 = vld [vmem:[#allocation80_spill] sm:$0xff] }
 0x49b   : > { %v3959_v32 = vadd.f32 %v3958_v18, %v3870_v26  ;;  %v4103_v56 = vpop.f32.mrf.mxu2  ;;  %v1155_v26 = vadd.f32 %v10968_v4, %v1066_v2  ;;  %v10975_v4 = vld [vmem:[#allocation192_spill] sm:$0xff]  ;;  %6572 = vmatpush.msk.msra.mxu2 %vm329_vm13, %v10545_v1 }
 0x49c   : > { %v9588_v51 = vadd.f32 %v4232_v54, %v4103_v56  ;;  %4347 = vmatmul.f32.gmra.mxu0 %v10962_v20  ;;  %v10971_v56 = vld [vmem:[#allocation58_spill] sm:$0xff] }
 0x49d   : > { %v6127_v49 = vmul.f32 %v3959_v32, %v1151_v59  ;;  %4461 = vmatmul.f32.gmra.mxu1 %v10963_v30  ;;  %4663 = vmatmul.f32.gmra.mxu3 %v10964_v42  ;;  %v10970_v59 = vld [vmem:[#allocation60_spill] sm:$0xff] }
 0x49e   : > { %6573 = vmatpush.msk.msra.mxu2 %vm325_vm14, %v10545_v1 }
 0x49f   : > { %v6151_v13 = vadd.f32 %v6150_v58, %v6127_v49  ;;  %v5537_v58 = vsub.f32 %v9611_v12, %v10478_v34  ;;  %v10972_v49 = vld [vmem:[#allocation59_spill] sm:$0xff] }
 0x4a0   : > { %4574 = vmatmul.f32.gmra.mxu2 %v10964_v42  ;;  %v4236_v45 = vpop.f32.mrf.mxu3 }
 0x4a1   : > { %v3877_v54 = vpop.f32.mrf.mxu0  ;;  %v5538_v31 = vand.u32 4294901760, %v5537_v58  ;;  %6574 = vmatpush.msk.msra.mxu2 %vm321_vm15, %v10545_v1 }
 0x4a2   : > { %v3962_v21 = vpop.f32.mrf.mxu1 }
 0x4a3   : > { %v3963_v18 = vadd.f32 %v3962_v21, %v3874_v57  ;;  %v4111_v27 = vpop.f32.mrf.mxu2  ;;  %5539 = vmatpush.msra.mxu3 %v5538_v31  ;;  %v10974_v57 = vld [vmem:[#allocation115_spill] sm:$0xff]  ;;  %6575 = vmatpush.msk.msra.mxu2 %vm317_vm1, %v10545_v1 }
 0x4a4   : > { %v9624_v29 = vadd.f32 %v4236_v45, %v4111_v27  ;;  %4352 = vmatmul.f32.gmra.mxu0 %v10970_v59  ;;  %v9637_v45 = vsub.f32 %v6395_v38, %v6395_v38  ;;  %v1070_v21 = vadd.f32 %v10974_v57, %v10973_v25  ;;  %v3878_v27 = vadd.f32 %v3877_v54, %v10975_v4  ;;  %v10976_v38 = vld [vmem:[#allocation117_spill] sm:$0xff]  ;;  %v10980_v25 = vld [vmem:[#allocation8_spill] sm:$0xff]  ;;  %v10982_v57 = vld [vmem:[#allocation7_spill] sm:$0xff] }
 0x4a5   : > { %v6131_v32 = vmul.f32 %v3963_v18, %v1155_v26  ;;  %4467 = vmatmul.f32.gmra.mxu1 %v10971_v56  ;;  %4667 = vmatmul.f32.gmra.mxu3 %v10972_v49  ;;  %v10983_v4 = vld [vmem:[#allocation64_spill] sm:$0xff] }
 0x4a6   : > { %10969 = vst [vmem:[#allocation84_spill] sm:$0xff] %v9624_v29  ;;  %v10481_v28 = vand.u32 4294901760, %v9637_v45  ;;  %v1159_v34 = vadd.f32 %v10976_v38, %v1070_v21  ;;  %v10979_v29 = vld [vmem:[#allocation62_spill] sm:$0xff]  ;;  %v10984_v38 = vld [vmem:[#allocation16_spill] sm:$0xff] }
 0x4a7   : > { %v6152_v6 = vadd.f32 %v6151_v13, %v6131_v32 }
 0x4a8   : > { %4578 = vmatmul.f32.gmra.mxu2 %v10972_v49  ;;  %v4240_v2 = vpop.f32.mrf.mxu3  ;;  %v5543_v18 = vsub.f32 %v9637_v45, %v10481_v28  ;;  %v10978_v49 = vld [vmem:[#allocation10_spill] sm:$0xff] }
 0x4a9   : > { %v4278_v26 = vpop.f32.mrf.mxu0 }
 0x4aa   : > { %v3966_v58 = vpop.f32.mrf.mxu1  ;;  %v5544_v31 = vand.u32 4294901760, %v5543_v18 }
 0x4ab   : > { %v3967_v13 = vadd.f32 %v3966_v58, %v3878_v27  ;;  %v4119_v32 = vpop.f32.mrf.mxu2 }
 0x4ac   : > { %v9648_v59 = vadd.f32 %v4240_v2, %v4119_v32  ;;  %4700 = vmatmul.f32.vlgmr.msrb.gmra.mxu0 %v10978_v49  ;;  %5545 = vmatpush.msra.mxu3 %v5544_v31  ;;  %v4279_v2 = vadd.f32 %v4278_v26, %v10983_v4  ;;  %v10985_v26 = vld [vmem:[#allocation5_spill] sm:$0xff]  ;;  %v10992_v49 = vld [vmem:[#allocation119_spill] sm:$0xff] }
 0x4ad   : > { %v6135_v42 = vmul.f32 %v3967_v13, %v1159_v34  ;;  %4473 = vmatmul.f32.gmra.mxu1 %v10979_v29  ;;  %5085 = vmatmul.f32.vlgmr.msrb.gmra.mxu3 %v10980_v25  ;;  %v10986_v4 = vld [vmem:[#allocation9_spill] sm:$0xff] }
 0x4ae   : > { %10977 = vst [vmem:[#allocation66_spill] sm:$0xff] %v9648_v59  ;;  %5657 = vmatpush.msrb.mxu0 %v9611_v12 }
 0x4af   : > { %v9654_v54 = vadd.f32 %v6152_v6, %v6135_v42  ;;  %v6391_v42 = vsel %vm337_vm11, 1.0, %v10546_v33 }
 0x4b0   : > { %4979 = vmatmul.f32.vlgmr.msrb.gmra.mxu2 %v10982_v57  ;;  %v4608_v21 = vpop.f32.mrf.mxu3  ;;  %5660 = vmatpush.msrb.mxu0 %v9637_v45  ;;  %v9672_v13 = vsub.f32 %v6391_v42, %v6391_v42 }
 0x4b1   : > { %10981 = vst [vmem:[#allocation83_spill] sm:$0xff] %v9654_v54  ;;  %v4283_v27 = vpop.f32.mrf.mxu0 }
 0x4b2   : > { %v4384_v18 = vpop.f32.mrf.mxu1  ;;  %v10483_v31 = vand.u32 4294901760, %v9672_v13  ;;  %5663 = vmatpush.msrb.mxu0 %v9672_v13 }
 0x4b3   : > { %v4385_v58 = vadd.f32 %v4384_v18, %v4279_v2  ;;  %v4519_v34 = vpop.f32.mrf.mxu2  ;;  %v4284_v18 = vadd.f32 %v4283_v27, %v9329_v19  ;;  %v10989_v19 = vld [vmem:[#allocation6_spill] sm:$0xff] }
 0x4b4   : > { %4708 = vmatmul.f32.gmra.mxu0 %v10984_v38 }
 0x4b5   : > { %v4520_v6 = vadd.f32 %v4519_v34, %v4385_v58  ;;  %4881 = vmatmul.f32.vlgmr.msrb.gmra.mxu1 %v10985_v26  ;;  %5091 = vmatmul.f32.gmra.mxu3 %v10896_v22  ;;  %v10987_v58 = vld [vmem:[#allocation118_spill] sm:$0xff] }
 0x4b6   : > { %6576 = vmatpush.msk.msrb.mxu1 %vm345_vm9, %v10545_v1 }
 0x4b7   : > { %v4609_v32 = vadd.f32 %v4608_v21, %v4520_v6  ;;  %v5549_v21 = vsub.f32 %v9672_v13, %v10483_v31  ;;  %v10991_v31 = vld [vmem:[#allocation79_spill] sm:$0xff] }
 0x4b8   : > { %4984 = vmatmul.f32.gmra.mxu2 %v10986_v4  ;;  %v4612_v2 = vpop.f32.mrf.mxu3  ;;  %6577 = vmatpush.msk.msrb.mxu1 %vm341_vm10, %v10545_v1  ;;  %v10988_v4 = vld [vmem:[#allocation18_spill] sm:$0xff] }
 0x4b9   : > { %v6076_v34 = vmul.f32 %v4609_v32, %v10987_v58  ;;  %v4288_v42 = vpop.f32.mrf.mxu0  ;;  %v5550_v25 = vand.u32 4294901760, %v5549_v21  ;;  %v10990_v32 = vld [vmem:[#allocation13_spill] sm:$0xff] }
 0x4ba   : > { %v4390_v6 = vpop.f32.mrf.mxu1  ;;  %6578 = vmatpush.msk.msrb.mxu1 %vm337_vm11, %v10545_v1  ;;  %v4289_v38 = vadd.f32 %v4288_v42, %v10991_v31  ;;  %v10995_v31 = vld [vmem:[#allocation17_spill] sm:$0xff] }
 0x4bb   : > { %v4391_v28 = vadd.f32 %v4390_v6, %v4284_v18  ;;  %v4523_v22 = vpop.f32.mrf.mxu2  ;;  %5551 = vmatpush.msra.mxu3 %v5550_v25  ;;  %v10994_v25 = vld [vmem:[#allocation12_spill] sm:$0xff] }
 0x4bc   : > { %4716 = vmatmul.f32.gmra.mxu0 %v10988_v4  ;;  %6579 = vmatpush.msk.msrb.mxu1 %vm333_vm12, %v10545_v1 }
 0x4bd   : > { %v4524_v57 = vadd.f32 %v4523_v22, %v4391_v28  ;;  %4885 = vmatmul.f32.gmra.mxu1 %v10989_v19  ;;  %5097 = vmatmul.f32.gmra.mxu3 %v10902_v24  ;;  %v10993_v22 = vld [vmem:[#allocation22_spill] sm:$0xff]  ;;  %v6387_v28 = vsel %vm333_vm12, 1.0, %v10546_v33 }
 0x4be   : > { %v10997_v24 = vld [vmem:[#allocation26_spill] sm:$0xff]  ;;  %6580 = vmatpush.msk.msrb.mxu1 %vm329_vm13, %v10545_v1 }
 0x4bf   : > { %v4613_v27 = vadd.f32 %v4612_v2, %v4524_v57 }
 0x4c0   : > { %4989 = vmatmul.f32.gmra.mxu2 %v10990_v32  ;;  %v4616_v58 = vpop.f32.mrf.mxu3  ;;  %6581 = vmatpush.msk.msrb.mxu1 %vm325_vm14, %v10545_v1 }
 0x4c1   : > { %v6080_v54 = vmul.f32 %v4613_v27, %v10992_v49  ;;  %v4293_v26 = vpop.f32.mrf.mxu0 }
 0x4c2   : > { %v4396_v18 = vpop.f32.mrf.mxu1  ;;  %6582 = vmatpush.msk.msrb.mxu1 %vm321_vm15, %v10545_v1 }
 0x4c3   : > { %v6160_v6 = vadd.f32 %v6080_v54, %v6076_v34  ;;  %v4397_v21 = vadd.f32 %v4396_v18, %v4289_v38  ;;  %v4527_v59 = vpop.f32.mrf.mxu2  ;;  %v9713_v54 = vsub.f32 %v6387_v28, %v6387_v28  ;;  %v10996_v34 = vld [vmem:[#allocation120_spill] sm:$0xff] }
 0x4c4   : > { %4724 = vmatmul.f32.gmra.mxu0 %v10993_v22  ;;  %v10998_v22 = vld [vmem:[#allocation15_spill] sm:$0xff]  ;;  %6583 = vmatpush.msk.msrb.mxu1 %vm317_vm1, %v10545_v1 }
 0x4c5   : > { %v4528_v49 = vadd.f32 %v4527_v59, %v4397_v21  ;;  %4889 = vmatmul.f32.gmra.mxu1 %v10994_v25  ;;  %5103 = vmatmul.f32.gmra.mxu3 %v10907_v8  ;;  %v10487_v38 = vand.u32 4294901760, %v9713_v54  ;;  %v4294_v59 = vadd.f32 %v4293_v26, %v9370_v40  ;;  %v10999_v26 = vld [vmem:[#allocation21_spill] sm:$0xff] }
 0x4c6   : > { %5666 = vmatpush.msrb.mxu0 %v9713_v54 }
 0x4c7   : > { %v4617_v57 = vadd.f32 %v4616_v58, %v4528_v49  ;;  %v5555_v18 = vsub.f32 %v9713_v54, %v10487_v38  ;;  %v11001_v38 = vld [vmem:[#allocation121_spill] sm:$0xff] }
 0x4c8   : > { %4994 = vmatmul.f32.gmra.mxu2 %v10995_v31  ;;  %v4620_v2 = vpop.f32.mrf.mxu3 }
 0x4c9   : > { %v6084_v42 = vmul.f32 %v4617_v57, %v10996_v34  ;;  %v4298_v27 = vpop.f32.mrf.mxu0  ;;  %v5556_v49 = vand.u32 4294901760, %v5555_v18  ;;  %v11000_v34 = vld [vmem:[#allocation82_spill] sm:$0xff] }
 0x4ca   : > { %v4402_v21 = vpop.f32.mrf.mxu1  ;;  %v4299_v31 = vadd.f32 %v4298_v27, %v11000_v34 }
 0x4cb   : > { %v6161_v28 = vadd.f32 %v6160_v6, %v6084_v42  ;;  %v4403_v8 = vadd.f32 %v4402_v21, %v4294_v59  ;;  %v4531_v58 = vpop.f32.mrf.mxu2  ;;  %5557 = vmatpush.msra.mxu3 %v5556_v49 }
 0x4cc   : > { %4732 = vmatmul.f32.gmra.mxu0 %v10997_v24 }
 0x4cd   : > { %v4532_v32 = vadd.f32 %v4531_v58, %v4403_v8  ;;  %4893 = vmatmul.f32.gmra.mxu1 %v10998_v22  ;;  %5109 = vmatmul.f32.gmra.mxu3 %v10913_v44  ;;  %v11002_v8 = vld [vmem:[#allocation30_spill] sm:$0xff] }
 0x4ce   : > { %v11006_v44 = vld [vmem:[#allocation34_spill] sm:$0xff] }
 0x4cf   : > { %v4621_v40 = vadd.f32 %v4620_v2, %v4532_v32  ;;  %v6383_v32 = vsel %vm329_vm13, 1.0, %v10546_v33  ;;  %v11003_v2 = vld [vmem:[#allocation20_spill] sm:$0xff] }
 0x4d0   : > { %4999 = vmatmul.f32.gmra.mxu2 %v10999_v26  ;;  %v4624_v57 = vpop.f32.mrf.mxu3 }
 0x4d1   : > { %v6088_v4 = vmul.f32 %v4621_v40, %v11001_v38  ;;  %v4303_v6 = vpop.f32.mrf.mxu0  ;;  %v11005_v40 = vld [vmem:[#allocation91_spill] sm:$0xff] }
 0x4d2   : > { %v4408_v59 = vpop.f32.mrf.mxu1  ;;  %v4304_v49 = vadd.f32 %v4303_v6, %v9411_v61  ;;  %v11008_v6 = vld [vmem:[#allocation29_spill] sm:$0xff] }
 0x4d3   : > { %v6162_v42 = vadd.f32 %v6161_v28, %v6088_v4  ;;  %v4409_v18 = vadd.f32 %v4408_v59, %v4299_v31  ;;  %v4535_v21 = vpop.f32.mrf.mxu2  ;;  %v9746_v4 = vsub.f32 %v6383_v32, %v6383_v32  ;;  %v11004_v28 = vld [vmem:[#allocation25_spill] sm:$0xff] }
 0x4d4   : > { %4740 = vmatmul.f32.gmra.mxu0 %v11002_v8  ;;  %v11007_v8 = vld [vmem:[#allocation24_spill] sm:$0xff] }
 0x4d5   : > { %v4536_v38 = vadd.f32 %v4535_v21, %v4409_v18  ;;  %4897 = vmatmul.f32.gmra.mxu1 %v11003_v2  ;;  %5115 = vmatmul.f32.gmra.mxu3 %v10918_v48  ;;  %v10490_v27 = vand.u32 4294901760, %v9746_v4 }
 0x4d6   : > { %5669 = vmatpush.msrb.mxu0 %v9746_v4 }
 0x4d7   : > { %v4625_v31 = vadd.f32 %v4624_v57, %v4536_v38  ;;  %v5561_v18 = vsub.f32 %v9746_v4, %v10490_v27  ;;  %v11010_v27 = vld [vmem:[#allocation94_spill] sm:$0xff] }
 0x4d8   : > { %5004 = vmatmul.f32.gmra.mxu2 %v11004_v28  ;;  %v4628_v58 = vpop.f32.mrf.mxu3 }
 0x4d9   : > { %v6092_v34 = vmul.f32 %v4625_v31, %v11005_v40  ;;  %v4308_v59 = vpop.f32.mrf.mxu0  ;;  %v5562_v38 = vand.u32 4294901760, %v5561_v18  ;;  %v11009_v40 = vld [vmem:[#allocation65_spill] sm:$0xff] }
 0x4da   : > { %v4414_v21 = vpop.f32.mrf.mxu1  ;;  %v4309_v28 = vadd.f32 %v4308_v59, %v11009_v40 }
 0x4db   : > { %v6163_v32 = vadd.f32 %v6162_v42, %v6092_v34  ;;  %v4415_v48 = vadd.f32 %v4414_v21, %v4304_v49  ;;  %v4539_v57 = vpop.f32.mrf.mxu2  ;;  %5563 = vmatpush.msra.mxu3 %v5562_v38 }
 0x4dc   : > { %4748 = vmatmul.f32.gmra.mxu0 %v11006_v44 }
 0x4dd   : > { %v4540_v26 = vadd.f32 %v4539_v57, %v4415_v48  ;;  %4901 = vmatmul.f32.gmra.mxu1 %v11007_v8  ;;  %5121 = vmatmul.f32.gmra.mxu3 %v10924_v47  ;;  %v11011_v48 = vld [vmem:[#allocation38_spill] sm:$0xff] }
 0x4de   : > { %v11015_v47 = vld [vmem:[#allocation42_spill] sm:$0xff] }
 0x4df   : > { %v4629_v61 = vadd.f32 %v4628_v58, %v4540_v26  ;;  %v6379_v26 = vsel %vm325_vm14, 1.0, %v10546_v33  ;;  %v11012_v58 = vld [vmem:[#allocation28_spill] sm:$0xff] }
 0x4e0   : > { %5009 = vmatmul.f32.gmra.mxu2 %v11008_v6  ;;  %v4632_v31 = vpop.f32.mrf.mxu3 }
 0x4e1   : > { %v6096_v24 = vmul.f32 %v4629_v61, %v11010_v27  ;;  %v4313_v42 = vpop.f32.mrf.mxu0  ;;  %v11014_v61 = vld [vmem:[#allocation97_spill] sm:$0xff] }
 0x4e2   : > { %v4420_v49 = vpop.f32.mrf.mxu1  ;;  %v4314_v38 = vadd.f32 %v4313_v42, %v9452_v15  ;;  %v11017_v42 = vld [vmem:[#allocation37_spill] sm:$0xff] }
 0x4e3   : > { %v6164_v34 = vadd.f32 %v6163_v32, %v6096_v24  ;;  %v4421_v18 = vadd.f32 %v4420_v49, %v4309_v28  ;;  %v4543_v21 = vpop.f32.mrf.mxu2  ;;  %v9779_v24 = vsub.f32 %v6379_v26, %v6379_v26  ;;  %v11013_v32 = vld [vmem:[#allocation33_spill] sm:$0xff] }
 0x4e4   : > { %4756 = vmatmul.f32.gmra.mxu0 %v11011_v48  ;;  %v11016_v48 = vld [vmem:[#allocation32_spill] sm:$0xff] }
 0x4e5   : > { %v4544_v27 = vadd.f32 %v4543_v21, %v4421_v18  ;;  %4905 = vmatmul.f32.gmra.mxu1 %v11012_v58  ;;  %5127 = vmatmul.f32.gmra.mxu3 %v10929_v43  ;;  %v10493_v59 = vand.u32 4294901760, %v9779_v24 }
 0x4e6   : > { %5672 = vmatpush.msrb.mxu0 %v9779_v24 }
 0x4e7   : > { %v4633_v28 = vadd.f32 %v4632_v31, %v4544_v27  ;;  %v5567_v18 = vsub.f32 %v9779_v24, %v10493_v59  ;;  %v11019_v59 = vld [vmem:[#allocation100_spill] sm:$0xff] }
 0x4e8   : > { %5014 = vmatmul.f32.gmra.mxu2 %v11013_v32  ;;  %v4636_v57 = vpop.f32.mrf.mxu3 }
 0x4e9   : > { %v6100_v40 = vmul.f32 %v4633_v28, %v11014_v61  ;;  %v4318_v49 = vpop.f32.mrf.mxu0  ;;  %v5568_v27 = vand.u32 4294901760, %v5567_v18  ;;  %v11018_v61 = vld [vmem:[#allocation81_spill] sm:$0xff] }
 0x4ea   : > { %v4426_v21 = vpop.f32.mrf.mxu1  ;;  %v4319_v32 = vadd.f32 %v4318_v49, %v11018_v61 }
 0x4eb   : > { %v6165_v26 = vadd.f32 %v6164_v34, %v6100_v40  ;;  %v4427_v43 = vadd.f32 %v4426_v21, %v4314_v38  ;;  %v4547_v31 = vpop.f32.mrf.mxu2  ;;  %5569 = vmatpush.msra.mxu3 %v5568_v27 }
 0x4ec   : > { %4764 = vmatmul.f32.gmra.mxu0 %v11015_v47 }
 0x4ed   : > { %v4548_v6 = vadd.f32 %v4547_v31, %v4427_v43  ;;  %4909 = vmatmul.f32.gmra.mxu1 %v11016_v48  ;;  %5133 = vmatmul.f32.gmra.mxu3 %v10935_v46  ;;  %v11020_v43 = vld [vmem:[#allocation46_spill] sm:$0xff] }
 0x4ee   : > { %v11024_v46 = vld [vmem:[#allocation50_spill] sm:$0xff] }
 0x4ef   : > { %v4637_v15 = vadd.f32 %v4636_v57, %v4548_v6  ;;  %v6375_v6 = vsel %vm321_vm15, 1.0, %v10546_v33  ;;  %v11021_v57 = vld [vmem:[#allocation36_spill] sm:$0xff] }
 0x4f0   : > { %5019 = vmatmul.f32.gmra.mxu2 %v11017_v42  ;;  %v4640_v28 = vpop.f32.mrf.mxu3 }
 0x4f1   : > { %v6104_v44 = vmul.f32 %v4637_v15, %v11019_v59  ;;  %v4323_v34 = vpop.f32.mrf.mxu0  ;;  %v11023_v15 = vld [vmem:[#allocation103_spill] sm:$0xff] }
 0x4f2   : > { %v4432_v38 = vpop.f32.mrf.mxu1  ;;  %v4324_v27 = vadd.f32 %v4323_v34, %v9493_v53 }
 0x4f3   : > { %v6166_v40 = vadd.f32 %v6165_v26, %v6104_v44  ;;  %v4433_v18 = vadd.f32 %v4432_v38, %v4319_v32  ;;  %v4551_v21 = vpop.f32.mrf.mxu2  ;;  %v9812_v44 = vsub.f32 %v6375_v6, %v6375_v6  ;;  %v11022_v26 = vld [vmem:[#allocation41_spill] sm:$0xff] }
 0x4f4   : > { %4772 = vmatmul.f32.gmra.mxu0 %v11020_v43  ;;  %v11025_v43 = vld [vmem:[#allocation40_spill] sm:$0xff] }
 0x4f5   : > { %v4552_v59 = vadd.f32 %v4551_v21, %v4433_v18  ;;  %4913 = vmatmul.f32.gmra.mxu1 %v11021_v57  ;;  %5139 = vmatmul.f32.gmra.mxu3 %v10940_v23  ;;  %v10496_v49 = vand.u32 4294901760, %v9812_v44  ;;  %v11040_v9 = vand.u32 4294901760, %v9812_v44 }
 0x4f6   : > { %5675 = vmatpush.msrb.mxu0 %v9812_v44 }
 0x4f7   : > { %v4641_v32 = vadd.f32 %v4640_v28, %v4552_v59  ;;  %v5573_v18 = vsub.f32 %v9812_v44, %v10496_v49 }
 0x4f8   : > { %5024 = vmatmul.f32.gmra.mxu2 %v11022_v26  ;;  %v4644_v31 = vpop.f32.mrf.mxu3 }
 0x4f9   : > { %v6108_v61 = vmul.f32 %v4641_v32, %v11023_v15  ;;  %v4328_v38 = vpop.f32.mrf.mxu0  ;;  %v5574_v59 = vand.u32 4294901760, %v5573_v18  ;;  %v11026_v15 = vld [vmem:[#allocation122_spill] sm:$0xff] }
 0x4fa   : > { %v4438_v21 = vpop.f32.mrf.mxu1  ;;  %v4329_v32 = vadd.f32 %v4328_v38, %v9517_v50 }
 0x4fb   : > { %v6167_v6 = vadd.f32 %v6166_v40, %v6108_v61  ;;  %v4439_v23 = vadd.f32 %v4438_v21, %v4324_v27  ;;  %v4555_v28 = vpop.f32.mrf.mxu2  ;;  %5575 = vmatpush.msra.mxu3 %v5574_v59 }
 0x4fc   : > { %4780 = vmatmul.f32.gmra.mxu0 %v11024_v46 }
 0x4fd   : > { %v4556_v42 = vadd.f32 %v4555_v28, %v4439_v23  ;;  %4917 = vmatmul.f32.gmra.mxu1 %v11025_v43  ;;  %5145 = vmatmul.f32.gmra.mxu3 %v10944_v3  ;;  %v11027_v23 = vld [vmem:[#allocation52_spill] sm:$0xff] }
 0x4ff   : > { %v4645_v53 = vadd.f32 %v4644_v31, %v4556_v42  ;;  %v6371_v42 = vsel %vm317_vm1, 1.0, %v10546_v33  ;;  %v11028_v31 = vand.u32 4294901760, %v9611_v12  ;;  %v11031_v12 = vand.u32 4294901760, %v9637_v45 }
 0x500   : > { %5029 = vmatmul.f32.gmra.mxu2 %v10939_v36  ;;  %v4648_v34 = vpop.f32.mrf.mxu3 }
 0x501   : > { %v6112_v49 = vmul.f32 %v4645_v53, %v11026_v15  ;;  %v4333_v40 = vpop.f32.mrf.mxu0  ;;  %5892 = vmatpush.msrb.mxu2 %v11028_v31  ;;  %v11030_v53 = vld [vmem:[#allocation108_spill] sm:$0xff] }
 0x502   : > { %v4444_v27 = vpop.f32.mrf.mxu1  ;;  %v4334_v59 = vadd.f32 %v4333_v40, %v9533_v60  ;;  %v11035_v60 = vand.u32 4294901760, %v9713_v54 }
 0x503   : > { %v6168_v61 = vadd.f32 %v6167_v6, %v6112_v49  ;;  %v4445_v18 = vadd.f32 %v4444_v27, %v4329_v32  ;;  %v4559_v21 = vpop.f32.mrf.mxu2  ;;  %v5577_v49 = vsub.f32 %v6371_v42, %v6371_v42  ;;  %v11029_v6 = vld [vmem:[#allocation49_spill] sm:$0xff]  ;;  %5896 = vmatpush.msrb.mxu2 %v11031_v12 }
 0x504   : > { %4788 = vmatmul.f32.gmra.mxu0 %v11027_v23 }
 0x505   : > { %v4560_v50 = vadd.f32 %v4559_v21, %v4445_v18  ;;  %4921 = vmatmul.f32.gmra.mxu1 %v10854_v35  ;;  %5151 = vmatmul.f32.gmra.mxu3 %v10951_v37  ;;  %v5578_v38 = vand.u32 4294901760, %v5577_v49 }
 0x506   : > { %5678 = vmatpush.msrb.mxu0 %v5577_v49 }
 0x507   : > { %v4649_v33 = vadd.f32 %v4648_v34, %v4560_v50  ;;  %v5579_v27 = vsub.f32 %v5577_v49, %v5578_v38  ;;  %v11032_v34 = vand.u32 4294901760, %v9672_v13  ;;  %v11033_v50 = vld [vmem:[#allocation53_spill] sm:$0xff] }
 0x508   : > { %5034 = vmatmul.f32.gmra.mxu2 %v11029_v6  ;;  %v4652_v28 = vpop.f32.mrf.mxu3  ;;  %v11034_v6 = vld [vmem:[#allocation48_spill] sm:$0xff] }
 0x509   : > { %v6116_v32 = vmul.f32 %v4649_v33, %v11030_v53  ;;  %v4338_v15 = vpop.f32.mrf.mxu0  ;;  %v5580_v37 = vand.u32 4294901760, %v5579_v27  ;;  %5900 = vmatpush.msrb.mxu2 %v11032_v34 }
 0x50a   : > { %v4450_v18 = vpop.f32.mrf.mxu1  ;;  %v4339_v40 = vadd.f32 %v4338_v15, %v9561_v39  ;;  %v11038_v39 = vand.u32 4294901760, %v9779_v24 }
 0x50b   : > { %v6169_v21 = vadd.f32 %v6168_v61, %v6116_v32  ;;  %v4451_v42 = vadd.f32 %v4450_v18, %v4334_v59  ;;  %v4563_v31 = vpop.f32.mrf.mxu2  ;;  %5581 = vmatpush.msra.mxu3 %v5580_v37  ;;  %5904 = vmatpush.msrb.mxu2 %v11035_v60  ;;  %v11036_v61 = vld [vmem:[#allocation123_spill] sm:$0xff]  ;;  %v11039_v59 = vld [vmem:[#allocation57_spill] sm:$0xff]  ;;  %v11041_v32 = vld [vmem:[#allocation124_spill] sm:$0xff] }
 0x50c   : > { %4796 = vmatmul.f32.gmra.mxu0 %v11033_v50 }
 0x50d   : > { %v4564_v3 = vadd.f32 %v4563_v31, %v4451_v42  ;;  %4925 = vmatmul.f32.gmra.mxu1 %v11034_v6  ;;  %5157 = vmatmul.f32.gmra.mxu3 %v7430_v41  ;;  %v11044_v31 = vld [vmem:[#allocation125_spill] sm:$0xff] }
 0x50e   : > { %6584 = vmatpush.msk.msrb.mxu3 %vm345_vm9, %v10545_v1 }
 0x50f   : > { %v4653_v45 = vadd.f32 %v4652_v28, %v4564_v3  ;;  %v11037_v3 = vand.u32 4294901760, %v9746_v4 }
 0x510   : > { %5039 = vmatmul.f32.gmra.mxu2 %v7421_v62  ;;  %v4656_v13 = vpop.f32.mrf.mxu3  ;;  %6585 = vmatpush.msk.msrb.mxu3 %vm341_vm10, %v10545_v1 }
 0x511   : > { %v6120_v49 = vmul.f32 %v4653_v45, %v11036_v61  ;;  %v4343_v33 = vpop.f32.mrf.mxu0  ;;  %5908 = vmatpush.msrb.mxu2 %v11037_v3  ;;  %v11045_v61 = vld [vmem:[#allocation63_spill] sm:$0xff]  ;;  %v11048_v3 = vld [vmem:[#allocation66_spill] sm:$0xff] }
 0x512   : > { %v4456_v37 = vpop.f32.mrf.mxu1  ;;  %6586 = vmatpush.msk.msrb.mxu3 %vm337_vm11, %v10545_v1  ;;  %v4344_v24 = vadd.f32 %v4343_v33, %v9588_v51  ;;  %v11046_v33 = vld [vmem:[#allocation55_spill] sm:$0xff] }
 0x513   : > { %v6170_v54 = vadd.f32 %v6169_v21, %v6120_v49  ;;  %v4457_v7 = vadd.f32 %v4456_v37, %v4339_v40  ;;  %v4567_v28 = vpop.f32.mrf.mxu2  ;;  %5912 = vmatpush.msrb.mxu2 %v11038_v39  ;;  %v11042_v21 = vld [vmem:[#allocation61_spill] sm:$0xff] }
 0x514   : > { %4804 = vmatmul.f32.gmra.mxu0 %v11039_v59  ;;  %6587 = vmatpush.msk.msrb.mxu3 %vm333_vm12, %v10545_v1 }
 0x515   : > { %v4568_v53 = vadd.f32 %v4567_v28, %v4457_v7  ;;  %4929 = vmatmul.f32.gmra.mxu1 %v7412_v52  ;;  %5163 = vmatmul.f32.gmra.mxu3 %v10963_v30 }
 0x516   : > { %5916 = vmatpush.msrb.mxu2 %v11040_v9  ;;  %6588 = vmatpush.msk.msrb.mxu3 %vm329_vm13, %v10545_v1 }
 0x517   : > { %v4657_v10 = vadd.f32 %v4656_v13, %v4568_v53 }
 0x518   : > { %5044 = vmatmul.f32.gmra.mxu2 %v7457_v63  ;;  %v4660_v4 = vpop.f32.mrf.mxu3  ;;  %6589 = vmatpush.msk.msrb.mxu3 %vm325_vm14, %v10545_v1 }
 0x519   : > { %v6124_v15 = vmul.f32 %v4657_v10, %v11041_v32  ;;  %v4348_v27 = vpop.f32.mrf.mxu0  ;;  %5920 = vmatpush.msrb.mxu2 %v5578_v38  ;;  %v11043_v38 = vld [vmem:[#allocation84_spill] sm:$0xff] }
 0x51a   : > { %v4462_v11 = vpop.f32.mrf.mxu1  ;;  %6590 = vmatpush.msk.msrb.mxu3 %vm321_vm15, %v10545_v1  ;;  %v4349_v42 = vadd.f32 %v4348_v27, %v11043_v38  ;;  %v11052_v27 = vld [vmem:[#allocation59_spill] sm:$0xff] }
 0x51b   : > { %v6171_v44 = vadd.f32 %v6170_v54, %v6124_v15  ;;  %v4463_v12 = vadd.f32 %v4462_v11, %v4344_v24  ;;  %v4571_v18 = vpop.f32.mrf.mxu2  ;;  %v11049_v54 = vld [vmem:[#allocation126_spill] sm:$0xff]  ;;  %v11051_v24 = vld [vmem:[#allocation83_spill] sm:$0xff] }
 0x51c   : > { %4812 = vmatmul.f32.gmra.mxu0 %v11042_v21  ;;  %6591 = vmatpush.msk.msrb.mxu3 %vm317_vm1, %v10545_v1  ;;  %v11047_v1 = vld [vmem:[#allocation60_spill] sm:$0xff]  ;;  %v6154_v32 = vrot.slane %v11051_v24, 4 }
 0x51d   : > { %v4572_v14 = vadd.f32 %v4571_v18, %v4463_v12  ;;  %4933 = vmatmul.f32.gmra.mxu1 %v7432_v0  ;;  %5169 = vmatmul.f32.gmra.mxu3 %v10971_v56 }
 0x51e   : > { %v6155_v18 = vadd.f32 %v6154_v32, %v11051_v24 }
 0x51f   : > { %v4661_v16 = vadd.f32 %v4660_v4, %v4572_v14  ;;  %v11050_v4 = vld [vmem:[#allocation5_spill] sm:$0xff]  ;;  %v11054_v14 = vld [vmem:[#allocation127_spill] sm:$0xff] }
 0x520   : > { %5049 = vmatmul.f32.gmra.mxu2 %v10962_v20  ;;  %v4664_v51 = vpop.f32.mrf.mxu3 }
 0x521   : > { %v6128_v34 = vmul.f32 %v4661_v16, %v11044_v31  ;;  %v4353_v17 = vpop.f32.mrf.mxu0 }
 0x522   : > { %v4468_v60 = vpop.f32.mrf.mxu1  ;;  %v4354_v37 = vadd.f32 %v4353_v17, %v11048_v3  ;;  %v6156_v17 = vrot.slane %v6155_v18, 2 }
 0x523   : > { %v6172_v45 = vadd.f32 %v6171_v44, %v6128_v34  ;;  %v4469_v13 = vadd.f32 %v4468_v60, %v4349_v42  ;;  %v4575_v40 = vpop.f32.mrf.mxu2  ;;  %v11053_v44 = vld [vmem:[#allocation10_spill] sm:$0xff] }
 0x524   : > { %4820 = vmatmul.f32.gmra.mxu0 %v11045_v61 }
 0x525   : > { %v4576_v49 = vadd.f32 %v4575_v40, %v4469_v13  ;;  %4937 = vmatmul.f32.gmra.mxu1 %v11046_v33  ;;  %5175 = vmatmul.f32.gmra.mxu3 %v10979_v29 }
 0x527   : > { %v4665_v5 = vadd.f32 %v4664_v51, %v4576_v49  ;;  %v11055_v49 = vld [vmem:[#allocation16_spill] sm:$0xff] }
 0x528   : > { %5054 = vmatmul.f32.gmra.mxu2 %v11047_v1  ;;  %v4668_v55 = vpop.f32.mrf.mxu3 }
 0x529   : > { %v6132_v7 = vmul.f32 %v4665_v5, %v11049_v54  ;;  %v4701_v28 = vpop.f32.mrf.mxu0 }
 0x52a   : > { %v4474_v39 = vpop.f32.mrf.mxu1 }
 0x52b   : > { %v6173_v53 = vadd.f32 %v6172_v45, %v6132_v7  ;;  %v4475_v9 = vadd.f32 %v4474_v39, %v4354_v37  ;;  %v4579_v10 = vpop.f32.mrf.mxu2 }
 0x52c   : > { %5220 = vmatmul.f32.vlgmr.msra.gmra.mxu0 %v11050_v4 }
 0x52d   : > { %v4580_v15 = vadd.f32 %v4579_v10, %v4475_v9  ;;  %4941 = vmatmul.f32.gmra.mxu1 %v11052_v27  ;;  %5583 = vmatmul.f32.vlgmr.msra.gmra.mxu3 %v11050_v4 }
 0x52f   : > { %v4669_v11 = vadd.f32 %v4668_v55, %v4580_v15  ;;  %v6157_v55 = vadd.f32 %v6156_v17, %v6155_v18  ;;  %v11056_v15 = vld [vmem:[#allocation18_spill] sm:$0xff] }
 0x530   : > { %5402 = vmatmul.f32.vlgmr.msra.gmra.mxu2 %v11053_v44  ;;  %v5086_v12 = vpop.f32.mrf.mxu3 }
 0x531   : > { %v6136_v16 = vmul.f32 %v4669_v11, %v11054_v14  ;;  %v4709_v51 = vpop.f32.mrf.mxu0 }
 0x532   : > { %v4882_v38 = vpop.f32.mrf.mxu1 }
 0x533   : > { %v6174_v42 = vadd.f32 %v6173_v53, %v6136_v16  ;;  %v4883_v31 = vadd.f32 %v4882_v38, %v4701_v28  ;;  %v4980_v34 = vpop.f32.mrf.mxu2  ;;  %v6158_v53 = vrot.slane %v6157_v55, 1 }
 0x534   : > { %5224 = vmatmul.f32.gmra.mxu0 %v10989_v19 }
 0x535   : > { %v6175_v60 = vrot.slane %v6174_v42, 4  ;;  %v4981_v45 = vadd.f32 %v4980_v34, %v4883_v31  ;;  %5309 = vmatmul.f32.vlgmr.msra.gmra.mxu1 %v11050_v4  ;;  %5587 = vmatmul.f32.gmra.mxu3 %v10989_v19  ;;  %v6159_v44 = vadd.f32 %v6158_v53, %v6157_v55  ;;  %v11057_v34 = vld [vmem:[#allocation22_spill] sm:$0xff] }
 0x537   : > { %v6176_v13 = vadd.f32 %v6175_v60, %v6174_v42  ;;  %v9932_v40 = vadd.f32 %v5086_v12, %v4981_v45 }
 0x538   : > { %5410 = vmatmul.f32.gmra.mxu2 %v11055_v49  ;;  %v5092_v5 = vpop.f32.mrf.mxu3 }
 0x539   : > { %v6177_v3 = vrot.slane %v6176_v13, 2  ;;  %v4717_v37 = vpop.f32.mrf.mxu0 }
 0x53a   : > { %v4886_v54 = vpop.f32.mrf.mxu1 }
 0x53b   : > { %v6178_v7 = vadd.f32 %v6177_v3, %v6176_v13  ;;  %v4887_v28 = vadd.f32 %v4886_v54, %v4709_v51  ;;  %v4985_v39 = vpop.f32.mrf.mxu2  ;;  %v11058_v3 = vld [vmem:[#allocation26_spill] sm:$0xff] }
 0x53c   : > { %5228 = vmatmul.f32.gmra.mxu0 %v10994_v25 }
 0x53d   : > { %v6179_v9 = vrot.slane %v6178_v7, 1  ;;  %v4986_v10 = vadd.f32 %v4985_v39, %v4887_v28  ;;  %5313 = vmatmul.f32.gmra.mxu1 %v10989_v19  ;;  %5591 = vmatmul.f32.gmra.mxu3 %v10994_v25 }
 0x53f   : > { %v6180_v24 = vadd.f32 %v6179_v9, %v6178_v7  ;;  %v9938_v32 = vadd.f32 %v5092_v5, %v4986_v10  ;;  %v11059_v10 = vld [vmem:[#allocation30_spill] sm:$0xff] }
 0x540   : > { %5418 = vmatmul.f32.gmra.mxu2 %v11056_v15  ;;  %v5098_v11 = vpop.f32.mrf.mxu3 }
 0x541   : > { %v6227_v12 = vrot.slane %v6180_v24, 7  ;;  %v4725_v18 = vpop.f32.mrf.mxu0 }
 0x542   : > { %v4890_v14 = vpop.f32.mrf.mxu1 }
 0x543   : > { %v4891_v16 = vadd.f32 %v4890_v14, %v4717_v37  ;;  %v4990_v51 = vpop.f32.mrf.mxu2  ;;  %v9941_v38 = vsel %vm6230_vm0, %v6159_v44, %v6227_v12 }
 0x544   : > { %5232 = vmatmul.f32.gmra.mxu0 %v10998_v22 }
 0x545   : > { %v4991_v42 = vadd.f32 %v4990_v51, %v4891_v16  ;;  %5317 = vmatmul.f32.gmra.mxu1 %v10994_v25  ;;  %5595 = vmatmul.f32.gmra.mxu3 %v10998_v22  ;;  %v11060_v16 = vld [vmem:[#allocation34_spill] sm:$0xff] }
 0x547   : > { %v9946_v31 = vadd.f32 %v5098_v11, %v4991_v42 }
 0x548   : > { %5426 = vmatmul.f32.gmra.mxu2 %v11057_v34  ;;  %v5104_v17 = vpop.f32.mrf.mxu3 }
 0x549   : > { %v4733_v60 = vpop.f32.mrf.mxu0 }
 0x54a   : > { %v4894_v45 = vpop.f32.mrf.mxu1 }
 0x54b   : > { %v4895_v13 = vadd.f32 %v4894_v45, %v4725_v18  ;;  %v4995_v49 = vpop.f32.mrf.mxu2 }
 0x54c   : > { %5236 = vmatmul.f32.gmra.mxu0 %v11003_v2 }
 0x54d   : > { %v4996_v5 = vadd.f32 %v4995_v49, %v4895_v13  ;;  %5321 = vmatmul.f32.gmra.mxu1 %v10998_v22  ;;  %5599 = vmatmul.f32.gmra.mxu3 %v11003_v2  ;;  %v11061_v49 = vld [vmem:[#allocation38_spill] sm:$0xff] }
 0x54f   : > { %v9952_v55 = vadd.f32 %v5104_v17, %v4996_v5 }
 0x550   : > { %5434 = vmatmul.f32.gmra.mxu2 %v11058_v3  ;;  %v5110_v37 = vpop.f32.mrf.mxu3 }
 0x551   : > { %v4741_v54 = vpop.f32.mrf.mxu0 }
 0x552   : > { %v4898_v7 = vpop.f32.mrf.mxu1 }
 0x553   : > { %v4899_v28 = vadd.f32 %v4898_v7, %v4733_v60  ;;  %v5000_v39 = vpop.f32.mrf.mxu2 }
 0x554   : > { %5240 = vmatmul.f32.gmra.mxu0 %v11007_v8 }
 0x555   : > { %v5001_v53 = vadd.f32 %v5000_v39, %v4899_v28  ;;  %5325 = vmatmul.f32.gmra.mxu1 %v11003_v2  ;;  %5603 = vmatmul.f32.gmra.mxu3 %v11007_v8 }
 0x557   : > { %v9958_v9 = vadd.f32 %v5110_v37, %v5001_v53 }
 0x558   : > { %5442 = vmatmul.f32.gmra.mxu2 %v11059_v10  ;;  %v5116_v24 = vpop.f32.mrf.mxu3 }
 0x559   : > { %v4749_v15 = vpop.f32.mrf.mxu0 }
 0x55a   : > { %v4902_v11 = vpop.f32.mrf.mxu1 }
 0x55b   : > { %v4903_v44 = vadd.f32 %v4902_v11, %v4741_v54  ;;  %v5005_v12 = vpop.f32.mrf.mxu2 }
 0x55c   : > { %5244 = vmatmul.f32.gmra.mxu0 %v11012_v58 }
 0x55d   : > { %v5006_v18 = vadd.f32 %v5005_v12, %v4903_v44  ;;  %5329 = vmatmul.f32.gmra.mxu1 %v11007_v8  ;;  %5607 = vmatmul.f32.gmra.mxu3 %v11012_v58 }
 0x55f   : > { %v9964_v14 = vadd.f32 %v5116_v24, %v5006_v18  ;;  %v11062_v18 = vld [vmem:[#allocation46_spill] sm:$0xff] }
 0x560   : > { %5450 = vmatmul.f32.gmra.mxu2 %v11060_v16  ;;  %v5122_v51 = vpop.f32.mrf.mxu3 }
 0x561   : > { %v4757_v42 = vpop.f32.mrf.mxu0 }
 0x562   : > { %v4906_v34 = vpop.f32.mrf.mxu1 }
 0x563   : > { %v4907_v17 = vadd.f32 %v4906_v34, %v4749_v15  ;;  %v5010_v60 = vpop.f32.mrf.mxu2 }
 0x564   : > { %5248 = vmatmul.f32.gmra.mxu0 %v11016_v48 }
 0x565   : > { %v5011_v45 = vadd.f32 %v5010_v60, %v4907_v17  ;;  %5333 = vmatmul.f32.gmra.mxu1 %v11012_v58  ;;  %5611 = vmatmul.f32.gmra.mxu3 %v11016_v48 }
 0x567   : > { %v9970_v13 = vadd.f32 %v5122_v51, %v5011_v45 }
 0x568   : > { %5458 = vmatmul.f32.gmra.mxu2 %v11061_v49  ;;  %v5128_v5 = vpop.f32.mrf.mxu3 }
 0x569   : > { %v4765_v3 = vpop.f32.mrf.mxu0 }
 0x56a   : > { %v4910_v37 = vpop.f32.mrf.mxu1 }
 0x56b   : > { %v4911_v54 = vadd.f32 %v4910_v37, %v4757_v42  ;;  %v5015_v7 = vpop.f32.mrf.mxu2 }
 0x56c   : > { %5252 = vmatmul.f32.gmra.mxu0 %v11021_v57 }
 0x56d   : > { %v5016_v28 = vadd.f32 %v5015_v7, %v4911_v54  ;;  %5337 = vmatmul.f32.gmra.mxu1 %v11016_v48  ;;  %5615 = vmatmul.f32.gmra.mxu3 %v11021_v57 }
 0x56f   : > { %v9976_v39 = vadd.f32 %v5128_v5, %v5016_v28 }
 0x570   : > { %5466 = vmatmul.f32.gmra.mxu2 %v11015_v47  ;;  %v5134_v53 = vpop.f32.mrf.mxu3 }
 0x571   : > { %v4773_v10 = vpop.f32.mrf.mxu0 }
 0x572   : > { %v4914_v24 = vpop.f32.mrf.mxu1 }
 0x573   : > { %v4915_v15 = vadd.f32 %v4914_v24, %v4765_v3  ;;  %v5020_v11 = vpop.f32.mrf.mxu2 }
 0x574   : > { %5256 = vmatmul.f32.gmra.mxu0 %v11025_v43 }
 0x575   : > { %v5021_v44 = vadd.f32 %v5020_v11, %v4915_v15  ;;  %5341 = vmatmul.f32.gmra.mxu1 %v11021_v57  ;;  %5619 = vmatmul.f32.gmra.mxu3 %v11025_v43 }
 0x577   : > { %v9982_v12 = vadd.f32 %v5134_v53, %v5021_v44 }
 0x578   : > { %5474 = vmatmul.f32.gmra.mxu2 %v11062_v18  ;;  %v5140_v16 = vpop.f32.mrf.mxu3 }
 0x579   : > { %v4781_v51 = vpop.f32.mrf.mxu0 }
 0x57a   : > { %v4918_v42 = vpop.f32.mrf.mxu1 }
 0x57b   : > { %v4919_v47 = vadd.f32 %v4918_v42, %v4773_v10  ;;  %v5025_v34 = vpop.f32.mrf.mxu2 }
 0x57c   : > { %5260 = vmatmul.f32.gmra.mxu0 %v10854_v35 }
 0x57d   : > { %v5026_v17 = vadd.f32 %v5025_v34, %v4919_v47  ;;  %5345 = vmatmul.f32.gmra.mxu1 %v11025_v43  ;;  %5623 = vmatmul.f32.gmra.mxu3 %v10854_v35 }
 0x57f   : > { %v9988_v60 = vadd.f32 %v5140_v16, %v5026_v17 }
 0x580   : > { %5482 = vmatmul.f32.gmra.mxu2 %v11024_v46  ;;  %v5146_v45 = vpop.f32.mrf.mxu3 }
 0x581   : > { %v4789_v49 = vpop.f32.mrf.mxu0 }
 0x582   : > { %v4922_v5 = vpop.f32.mrf.mxu1 }
 0x583   : > { %v4923_v3 = vadd.f32 %v4922_v5, %v4781_v51  ;;  %v5030_v37 = vpop.f32.mrf.mxu2 }
 0x584   : > { %5264 = vmatmul.f32.gmra.mxu0 %v11034_v6 }
 0x585   : > { %v5031_v54 = vadd.f32 %v5030_v37, %v4923_v3  ;;  %5349 = vmatmul.f32.gmra.mxu1 %v10854_v35  ;;  %5627 = vmatmul.f32.gmra.mxu3 %v11034_v6 }
 0x587   : > { %v9994_v7 = vadd.f32 %v5146_v45, %v5031_v54 }
 0x588   : > { %5490 = vmatmul.f32.gmra.mxu2 %v11027_v23  ;;  %v5152_v28 = vpop.f32.mrf.mxu3 }
 0x589   : > { %v4797_v53 = vpop.f32.mrf.mxu0 }
 0x58a   : > { %v4926_v10 = vpop.f32.mrf.mxu1 }
 0x58b   : > { %v4927_v46 = vadd.f32 %v4926_v10, %v4789_v49  ;;  %v5035_v24 = vpop.f32.mrf.mxu2 }
 0x58c   : > { %5268 = vmatmul.f32.gmra.mxu0 %v7412_v52 }
 0x58d   : > { %v5036_v15 = vadd.f32 %v5035_v24, %v4927_v46  ;;  %5353 = vmatmul.f32.gmra.mxu1 %v11034_v6  ;;  %5631 = vmatmul.f32.gmra.mxu3 %v7412_v52 }
 0x58f   : > { %v10000_v11 = vadd.f32 %v5152_v28, %v5036_v15 }
 0x590   : > { %5498 = vmatmul.f32.gmra.mxu2 %v11033_v50  ;;  %v5158_v44 = vpop.f32.mrf.mxu3 }
 0x591   : > { %v4805_v18 = vpop.f32.mrf.mxu0 }
 0x592   : > { %v4930_v16 = vpop.f32.mrf.mxu1 }
 0x593   : > { %v4931_v23 = vadd.f32 %v4930_v16, %v4797_v53  ;;  %v5040_v51 = vpop.f32.mrf.mxu2  ;;  %v11063_v16 = vld [vmem:[#allocation7_spill] sm:$0xff] }
 0x594   : > { %5272 = vmatmul.f32.gmra.mxu0 %v7432_v0 }
 0x595   : > { %v5041_v42 = vadd.f32 %v5040_v51, %v4931_v23  ;;  %5357 = vmatmul.f32.gmra.mxu1 %v7412_v52  ;;  %5635 = vmatmul.f32.gmra.mxu3 %v7432_v0 }
 0x597   : > { %v10006_v47 = vadd.f32 %v5158_v44, %v5041_v42 }
 0x598   : > { %5506 = vmatmul.f32.gmra.mxu2 %v11039_v59  ;;  %v5164_v34 = vpop.f32.mrf.mxu3 }
 0x599   : > { %v4813_v17 = vpop.f32.mrf.mxu0 }
 0x59a   : > { %v4934_v45 = vpop.f32.mrf.mxu1 }
 0x59b   : > { %v4935_v50 = vadd.f32 %v4934_v45, %v4805_v18  ;;  %v5045_v49 = vpop.f32.mrf.mxu2 }
 0x59c   : > { %5276 = vmatmul.f32.gmra.mxu0 %v11046_v33 }
 0x59d   : > { %v5046_v5 = vadd.f32 %v5045_v49, %v4935_v50  ;;  %5361 = vmatmul.f32.gmra.mxu1 %v7432_v0  ;;  %5639 = vmatmul.f32.gmra.mxu3 %v11046_v33 }
 0x59f   : > { %v10012_v3 = vadd.f32 %v5164_v34, %v5046_v5  ;;  %v11064_v34 = vld [vmem:[#allocation128_spill] sm:$0xff]  ;;  %v11066_v5 = vld [vmem:[#allocation146_spill] sm:$0xff] }
 0x5a0   : > { %5514 = vmatmul.f32.gmra.mxu2 %v11042_v21  ;;  %v5170_v37 = vpop.f32.mrf.mxu3 }
 0x5a1   : > { %v4821_v54 = vpop.f32.mrf.mxu0 }
 0x5a2   : > { %v4938_v28 = vpop.f32.mrf.mxu1 }
 0x5a3   : > { %v4939_v59 = vadd.f32 %v4938_v28, %v4813_v17  ;;  %v5050_v53 = vpop.f32.mrf.mxu2  ;;  %v11065_v17 = vld [vmem:[#allocation143_spill] sm:$0xff] }
 0x5a4   : > { %5280 = vmatmul.f32.gmra.mxu0 %v11052_v27 }
 0x5a5   : > { %v5051_v10 = vadd.f32 %v5050_v53, %v4939_v59  ;;  %5365 = vmatmul.f32.gmra.mxu1 %v11046_v33  ;;  %5643 = vmatmul.f32.gmra.mxu3 %v11052_v27  ;;  %v11067_v53 = vld [vmem:[#allocation9_spill] sm:$0xff] }
 0x5a7   : > { %v10018_v46 = vadd.f32 %v5170_v37, %v5051_v10 }
 0x5a8   : > { %5522 = vmatmul.f32.gmra.mxu2 %v11045_v61  ;;  %v5176_v24 = vpop.f32.mrf.mxu3  ;;  %v2414_v61 = vadd.f32 %v11065_v17, %v11064_v34 }
 0x5a9   : > { %v5221_v15 = vpop.f32.mrf.mxu0 }
 0x5aa   : > { %v4942_v44 = vpop.f32.mrf.mxu1  ;;  %v5222_v45 = vadd.f32 %v5221_v15, %v9932_v40  ;;  %v2503_v37 = vadd.f32 %v11066_v5, %v2414_v61  ;;  %v11070_v40 = vld [vmem:[#allocation145_spill] sm:$0xff]  ;;  %v11073_v5 = vld [vmem:[#allocation11_spill] sm:$0xff] }
 0x5ab   : > { %v4943_v21 = vadd.f32 %v4942_v44, %v4821_v54  ;;  %v5055_v18 = vpop.f32.mrf.mxu2  ;;  %v11069_v44 = vld [vmem:[#allocation129_spill] sm:$0xff] }
 0x5ac   : > { %5681 = vmatmul.f32.vlgmr.msrb.gmra.mxu0 %v11063_v16  ;;  %v2418_v15 = vadd.f32 %v11070_v40, %v11069_v44 }
 0x5ad   : > { %v5056_v23 = vadd.f32 %v5055_v18, %v4943_v21  ;;  %5369 = vmatmul.f32.gmra.mxu1 %v11052_v27  ;;  %6011 = vmatmul.f32.vlgmr.msrb.gmra.mxu3 %v11050_v4 }
 0x5af   : > { %v10024_v51 = vadd.f32 %v5176_v24, %v5056_v23  ;;  %v11068_v24 = vld [vmem:[#allocation8_spill] sm:$0xff] }
 0x5b0   : > { %5922 = vmatmul.f32.vlgmr.msrb.gmra.mxu2 %v11050_v4  ;;  %v5584_v42 = vpop.f32.mrf.mxu3  ;;  %v11071_v23 = vld [vmem:[#allocation148_spill] sm:$0xff] }
 0x5b1   : > { %v5225_v50 = vpop.f32.mrf.mxu0 }
 0x5b2   : > { %v5310_v49 = vpop.f32.mrf.mxu1  ;;  %v5226_v21 = vadd.f32 %v5225_v50, %v9938_v32  ;;  %v11074_v32 = vld [vmem:[#allocation130_spill] sm:$0xff]  ;;  %v11075_v50 = vld [vmem:[#allocation147_spill] sm:$0xff] }
 0x5b3   : > { %v5311_v54 = vadd.f32 %v5310_v49, %v5222_v45  ;;  %v5403_v28 = vpop.f32.mrf.mxu2  ;;  %v11072_v45 = vld [vmem:[#allocation13_spill] sm:$0xff] }
 0x5b4   : > { %v10031_v59 = vadd.f32 %v5584_v42, %v5403_v28  ;;  %5686 = vmatmul.f32.gmra.mxu0 %v11067_v53  ;;  %v2507_v42 = vadd.f32 %v11071_v23, %v2418_v15 }
 0x5b5   : > { %v6077_v10 = vmul.f32 %v5311_v54, %v2503_v37  ;;  %5787 = vmatmul.f32.vlgmr.msrb.gmra.mxu1 %v11068_v24  ;;  %6015 = vmatmul.f32.gmra.mxu3 %v10989_v19  ;;  %v2422_v54 = vadd.f32 %v11075_v50, %v11074_v32 }
 0x5b8   : > { %5926 = vmatmul.f32.gmra.mxu2 %v10989_v19  ;;  %v5588_v4 = vpop.f32.mrf.mxu3 }
 0x5b9   : > { %v5229_v18 = vpop.f32.mrf.mxu0 }
 0x5ba   : > { %v5314_v16 = vpop.f32.mrf.mxu1  ;;  %v5230_v28 = vadd.f32 %v5229_v18, %v9946_v31  ;;  %v11079_v31 = vld [vmem:[#allocation131_spill] sm:$0xff]  ;;  %v11080_v18 = vld [vmem:[#allocation149_spill] sm:$0xff] }
 0x5bb   : > { %v5315_v34 = vadd.f32 %v5314_v16, %v5226_v21  ;;  %v5411_v17 = vpop.f32.mrf.mxu2  ;;  %v11077_v16 = vld [vmem:[#allocation17_spill] sm:$0xff] }
 0x5bc   : > { %v10041_v61 = vadd.f32 %v5588_v4, %v5411_v17  ;;  %5691 = vmatmul.f32.gmra.mxu0 %v11072_v45  ;;  %v11076_v4 = vld [vmem:[#allocation150_spill] sm:$0xff] }
 0x5bd   : > { %v6081_v49 = vmul.f32 %v5315_v34, %v2507_v42  ;;  %5793 = vmatmul.f32.gmra.mxu1 %v11073_v5  ;;  %6019 = vmatmul.f32.gmra.mxu3 %v10994_v25  ;;  %v2511_v44 = vadd.f32 %v11076_v4, %v2422_v54  ;;  %v2426_v34 = vadd.f32 %v11080_v18, %v11079_v31  ;;  %v11081_v5 = vld [vmem:[#allocation152_spill] sm:$0xff] }
 0x5bf   : > { %v6181_v19 = vadd.f32 %v6081_v49, %v6077_v10  ;;  %v11078_v10 = vld [vmem:[#allocation14_spill] sm:$0xff] }
 0x5c0   : > { %5930 = vmatmul.f32.gmra.mxu2 %v10994_v25  ;;  %v5592_v37 = vpop.f32.mrf.mxu3 }
 0x5c1   : > { %v5233_v53 = vpop.f32.mrf.mxu0 }
 0x5c2   : > { %v5318_v24 = vpop.f32.mrf.mxu1  ;;  %v5234_v17 = vadd.f32 %v5233_v53, %v9952_v55  ;;  %v11084_v55 = vld [vmem:[#allocation132_spill] sm:$0xff]  ;;  %v11085_v53 = vld [vmem:[#allocation151_spill] sm:$0xff] }
 0x5c3   : > { %v5319_v40 = vadd.f32 %v5318_v24, %v5230_v28  ;;  %v5419_v15 = vpop.f32.mrf.mxu2  ;;  %v11082_v28 = vld [vmem:[#allocation21_spill] sm:$0xff] }
 0x5c4   : > { %v10051_v21 = vadd.f32 %v5592_v37, %v5419_v15  ;;  %5696 = vmatmul.f32.gmra.mxu0 %v11077_v16  ;;  %v2515_v37 = vadd.f32 %v11081_v5, %v2426_v34  ;;  %v11087_v34 = vld [vmem:[#allocation25_spill] sm:$0xff] }
 0x5c5   : > { %v6085_v23 = vmul.f32 %v5319_v40, %v2511_v44  ;;  %5799 = vmatmul.f32.gmra.mxu1 %v11078_v10  ;;  %6023 = vmatmul.f32.gmra.mxu3 %v10998_v22  ;;  %v2430_v44 = vadd.f32 %v11085_v53, %v11084_v55  ;;  %v11092_v53 = vld [vmem:[#allocation29_spill] sm:$0xff] }
 0x5c7   : > { %v6182_v25 = vadd.f32 %v6181_v19, %v6085_v23  ;;  %v11083_v19 = vld [vmem:[#allocation19_spill] sm:$0xff] }
 0x5c8   : > { %5934 = vmatmul.f32.gmra.mxu2 %v10998_v22  ;;  %v5596_v42 = vpop.f32.mrf.mxu3  ;;  %v11086_v23 = vld [vmem:[#allocation155_spill] sm:$0xff] }
 0x5c9   : > { %v5237_v45 = vpop.f32.mrf.mxu0  ;;  %v2519_v10 = vadd.f32 %v11086_v23, %v2430_v44 }
 0x5ca   : > { %v5322_v49 = vpop.f32.mrf.mxu1  ;;  %v5238_v40 = vadd.f32 %v5237_v45, %v9958_v9  ;;  %v11089_v9 = vld [vmem:[#allocation133_spill] sm:$0xff]  ;;  %v11090_v45 = vld [vmem:[#allocation154_spill] sm:$0xff] }
 0x5cb   : > { %v5323_v32 = vadd.f32 %v5322_v49, %v5234_v17  ;;  %v5427_v50 = vpop.f32.mrf.mxu2  ;;  %v2434_v5 = vadd.f32 %v11090_v45, %v11089_v9  ;;  %v11097_v9 = vld [vmem:[#allocation33_spill] sm:$0xff] }
 0x5cc   : > { %v10061_v54 = vadd.f32 %v5596_v42, %v5427_v50  ;;  %5701 = vmatmul.f32.gmra.mxu0 %v11082_v28  ;;  %v11091_v28 = vld [vmem:[#allocation158_spill] sm:$0xff] }
 0x5cd   : > { %v6089_v24 = vmul.f32 %v5323_v32, %v2515_v37  ;;  %5805 = vmatmul.f32.gmra.mxu1 %v11083_v19  ;;  %6027 = vmatmul.f32.gmra.mxu3 %v11003_v2 }
 0x5cf   : > { %v6183_v22 = vadd.f32 %v6182_v25, %v6089_v24  ;;  %v11088_v25 = vld [vmem:[#allocation23_spill] sm:$0xff]  ;;  %v2523_v24 = vadd.f32 %v11091_v28, %v2434_v5 }
 0x5d0   : > { %5938 = vmatmul.f32.gmra.mxu2 %v11003_v2  ;;  %v5600_v4 = vpop.f32.mrf.mxu3 }
 0x5d1   : > { %v5241_v15 = vpop.f32.mrf.mxu0 }
 0x5d2   : > { %v5326_v16 = vpop.f32.mrf.mxu1  ;;  %v5242_v37 = vadd.f32 %v5241_v15, %v9964_v14  ;;  %v11094_v14 = vld [vmem:[#allocation134_spill] sm:$0xff]  ;;  %v11095_v15 = vld [vmem:[#allocation157_spill] sm:$0xff] }
 0x5d3   : > { %v5327_v42 = vadd.f32 %v5326_v16, %v5238_v40  ;;  %v5435_v31 = vpop.f32.mrf.mxu2  ;;  %v2438_v16 = vadd.f32 %v11095_v15, %v11094_v14  ;;  %v11102_v14 = vld [vmem:[#allocation37_spill] sm:$0xff] }
 0x5d4   : > { %v10071_v18 = vadd.f32 %v5600_v4, %v5435_v31  ;;  %5706 = vmatmul.f32.gmra.mxu0 %v11087_v34  ;;  %v11096_v31 = vld [vmem:[#allocation161_spill] sm:$0xff] }
 0x5d5   : > { %v6093_v17 = vmul.f32 %v5327_v42, %v2519_v10  ;;  %5811 = vmatmul.f32.gmra.mxu1 %v11088_v25  ;;  %6031 = vmatmul.f32.gmra.mxu3 %v11007_v8  ;;  %v2527_v34 = vadd.f32 %v11096_v31, %v2438_v16  ;;  %v11104_v16 = vld [vmem:[#allocation136_spill] sm:$0xff] }
 0x5d7   : > { %v6184_v2 = vadd.f32 %v6183_v22, %v6093_v17  ;;  %v11093_v22 = vld [vmem:[#allocation27_spill] sm:$0xff] }
 0x5d8   : > { %5942 = vmatmul.f32.gmra.mxu2 %v11007_v8  ;;  %v5604_v49 = vpop.f32.mrf.mxu3 }
 0x5d9   : > { %v5245_v32 = vpop.f32.mrf.mxu0 }
 0x5da   : > { %v5330_v50 = vpop.f32.mrf.mxu1  ;;  %v5246_v23 = vadd.f32 %v5245_v32, %v9970_v13  ;;  %v11099_v13 = vld [vmem:[#allocation135_spill] sm:$0xff] }
 0x5db   : > { %v5331_v19 = vadd.f32 %v5330_v50, %v5242_v37  ;;  %v5443_v4 = vpop.f32.mrf.mxu2  ;;  %v11100_v37 = vld [vmem:[#allocation160_spill] sm:$0xff] }
 0x5dc   : > { %v10081_v55 = vadd.f32 %v5604_v49, %v5443_v4  ;;  %5711 = vmatmul.f32.gmra.mxu0 %v11092_v53  ;;  %v2442_v32 = vadd.f32 %v11100_v37, %v11099_v13  ;;  %v11101_v4 = vld [vmem:[#allocation164_spill] sm:$0xff]  ;;  %v11108_v13 = vld [vmem:[#allocation137_spill] sm:$0xff] }
 0x5dd   : > { %v6097_v44 = vmul.f32 %v5331_v19, %v2523_v24  ;;  %5817 = vmatmul.f32.gmra.mxu1 %v11093_v22  ;;  %6035 = vmatmul.f32.gmra.mxu3 %v11012_v58 }
 0x5de   : > { %v2531_v53 = vadd.f32 %v11101_v4, %v2442_v32 }
 0x5df   : > { %v6185_v8 = vadd.f32 %v6184_v2, %v6097_v44  ;;  %v11098_v2 = vld [vmem:[#allocation31_spill] sm:$0xff] }
 0x5e0   : > { %5946 = vmatmul.f32.gmra.mxu2 %v11012_v58  ;;  %v5608_v40 = vpop.f32.mrf.mxu3 }
 0x5e1   : > { %v5249_v10 = vpop.f32.mrf.mxu0 }
 0x5e2   : > { %v5334_v42 = vpop.f32.mrf.mxu1  ;;  %v5250_v50 = vadd.f32 %v5249_v10, %v9976_v39 }
 0x5e3   : > { %v5335_v17 = vadd.f32 %v5334_v42, %v5246_v23  ;;  %v5451_v25 = vpop.f32.mrf.mxu2 }
 0x5e4   : > { %v10091_v49 = vadd.f32 %v5608_v40, %v5451_v25  ;;  %5716 = vmatmul.f32.gmra.mxu0 %v11097_v9 }
 0x5e5   : > { %v6101_v45 = vmul.f32 %v5335_v17, %v2527_v34  ;;  %5823 = vmatmul.f32.gmra.mxu1 %v11098_v2  ;;  %6039 = vmatmul.f32.gmra.mxu3 %v11016_v48  ;;  %v11106_v34 = vld [vmem:[#allocation167_spill] sm:$0xff] }
 0x5e7   : > { %v6186_v58 = vadd.f32 %v6185_v8, %v6101_v45 }
 0x5e8   : > { %5950 = vmatmul.f32.gmra.mxu2 %v11016_v48  ;;  %v5612_v5 = vpop.f32.mrf.mxu3  ;;  %v11103_v48 = vld [vmem:[#allocation35_spill] sm:$0xff] }
 0x5e9   : > { %v5253_v28 = vpop.f32.mrf.mxu0 }
 0x5ea   : > { %v5254_v24 = vadd.f32 %v5253_v28, %v9982_v12  ;;  %v5338_v19 = vpop.f32.mrf.mxu1  ;;  %v11105_v12 = vld [vmem:[#allocation163_spill] sm:$0xff] }
 0x5eb   : > { %v5339_v44 = vadd.f32 %v5338_v19, %v5250_v50  ;;  %v5459_v22 = vpop.f32.mrf.mxu2  ;;  %v2446_v23 = vadd.f32 %v11105_v12, %v11104_v16  ;;  %v11114_v12 = vld [vmem:[#allocation172_spill] sm:$0xff] }
 0x5ec   : > { %v10102_v40 = vadd.f32 %v5612_v5, %v5459_v22  ;;  %5721 = vmatmul.f32.gmra.mxu0 %v11102_v14  ;;  %v11111_v22 = vld [vmem:[#allocation43_spill] sm:$0xff] }
 0x5ed   : > { %v6105_v8 = vmul.f32 %v5339_v44, %v2531_v53  ;;  %5829 = vmatmul.f32.gmra.mxu1 %v11103_v48  ;;  %6043 = vmatmul.f32.gmra.mxu3 %v11021_v57  ;;  %v2535_v17 = vadd.f32 %v11106_v34, %v2446_v23 }
 0x5ef   : > { %v6187_v15 = vadd.f32 %v6186_v58, %v6105_v8  ;;  %v11107_v58 = vld [vmem:[#allocation39_spill] sm:$0xff]  ;;  %v11112_v8 = vld [vmem:[#allocation138_spill] sm:$0xff] }
 0x5f0   : > { %5954 = vmatmul.f32.gmra.mxu2 %v11021_v57  ;;  %v5616_v39 = vpop.f32.mrf.mxu3 }
 0x5f1   : > { %v5257_v10 = vpop.f32.mrf.mxu0 }
 0x5f2   : > { %v5258_v42 = vadd.f32 %v5257_v10, %v9988_v60  ;;  %v5342_v31 = vpop.f32.mrf.mxu1  ;;  %v11109_v60 = vld [vmem:[#allocation166_spill] sm:$0xff] }
 0x5f3   : > { %v5343_v25 = vadd.f32 %v5342_v31, %v5254_v24  ;;  %v5467_v9 = vpop.f32.mrf.mxu2  ;;  %v2450_v37 = vadd.f32 %v11109_v60, %v11108_v13  ;;  %v11110_v24 = vld [vmem:[#allocation170_spill] sm:$0xff]  ;;  %v11115_v31 = vld [vmem:[#allocation49_spill] sm:$0xff]  ;;  %v11119_v13 = vld [vmem:[#allocation175_spill] sm:$0xff] }
 0x5f4   : > { %v10112_v45 = vadd.f32 %v5616_v39, %v5467_v9  ;;  %5726 = vmatmul.f32.gmra.mxu0 %v11022_v26  ;;  %v11117_v9 = vld [vmem:[#allocation139_spill] sm:$0xff] }
 0x5f5   : > { %v6109_v2 = vmul.f32 %v5343_v25, %v2535_v17  ;;  %5835 = vmatmul.f32.gmra.mxu1 %v11107_v58  ;;  %6047 = vmatmul.f32.gmra.mxu3 %v11025_v43  ;;  %v2539_v19 = vadd.f32 %v11110_v24, %v2450_v37  ;;  %v11116_v17 = vld [vmem:[#allocation47_spill] sm:$0xff] }
 0x5f6   : > { %v11120_v24 = vld [vmem:[#allocation51_spill] sm:$0xff] }
 0x5f7   : > { %v6188_v57 = vadd.f32 %v6187_v15, %v6109_v2 }
 0x5f8   : > { %5958 = vmatmul.f32.gmra.mxu2 %v11025_v43  ;;  %v5620_v5 = vpop.f32.mrf.mxu3 }
 0x5f9   : > { %v5261_v32 = vpop.f32.mrf.mxu0 }
 0x5fa   : > { %v5262_v50 = vadd.f32 %v5261_v32, %v9994_v7  ;;  %v5346_v28 = vpop.f32.mrf.mxu1  ;;  %v11113_v7 = vld [vmem:[#allocation169_spill] sm:$0xff] }
 0x5fb   : > { %v5347_v4 = vadd.f32 %v5346_v28, %v5258_v42  ;;  %v5475_v26 = vpop.f32.mrf.mxu2  ;;  %v2454_v48 = vadd.f32 %v11113_v7, %v11112_v8 }
 0x5fc   : > { %v10122_v53 = vadd.f32 %v5620_v5, %v5475_v26  ;;  %5731 = vmatmul.f32.gmra.mxu0 %v10939_v36 }
 0x5fd   : > { %v6113_v44 = vmul.f32 %v5347_v4, %v2539_v19  ;;  %5841 = vmatmul.f32.gmra.mxu1 %v11111_v22  ;;  %6051 = vmatmul.f32.gmra.mxu3 %v10854_v35  ;;  %v2543_v23 = vadd.f32 %v11114_v12, %v2454_v48  ;;  %v11121_v4 = vld [vmem:[#allocation140_spill] sm:$0xff] }
 0x5ff   : > { %v6189_v43 = vadd.f32 %v6188_v57, %v6113_v44 }
 0x600   : > { %5962 = vmatmul.f32.gmra.mxu2 %v10854_v35  ;;  %v5624_v14 = vpop.f32.mrf.mxu3 }
 0x601   : > { %v5265_v15 = vpop.f32.mrf.mxu0 }
 0x602   : > { %v5266_v39 = vadd.f32 %v5265_v15, %v10000_v11  ;;  %v5350_v16 = vpop.f32.mrf.mxu1  ;;  %v11118_v11 = vld [vmem:[#allocation171_spill] sm:$0xff] }
 0x603   : > { %v5351_v10 = vadd.f32 %v5350_v16, %v5262_v50  ;;  %v5483_v36 = vpop.f32.mrf.mxu2  ;;  %v2458_v2 = vadd.f32 %v11118_v11, %v11117_v9  ;;  %v11124_v16 = vld [vmem:[#allocation141_spill] sm:$0xff]  ;;  %v11127_v9 = vld [vmem:[#allocation142_spill] sm:$0xff] }
 0x604   : > { %v10132_v42 = vadd.f32 %v5624_v14, %v5483_v36  ;;  %5736 = vmatmul.f32.gmra.mxu0 %v11115_v31  ;;  %v11123_v14 = vld [vmem:[#allocation177_spill] sm:$0xff]  ;;  %v11126_v31 = vld [vmem:[#allocation179_spill] sm:$0xff] }
 0x605   : > { %v6117_v34 = vmul.f32 %v5351_v10, %v2543_v23  ;;  %5847 = vmatmul.f32.gmra.mxu1 %v11116_v17  ;;  %6055 = vmatmul.f32.gmra.mxu3 %v11034_v6  ;;  %v2547_v60 = vadd.f32 %v11119_v13, %v2458_v2 }
 0x607   : > { %v6190_v35 = vadd.f32 %v6189_v43, %v6117_v34 }
 0x608   : > { %5966 = vmatmul.f32.gmra.mxu2 %v11034_v6  ;;  %v5628_v25 = vpop.f32.mrf.mxu3 }
 0x609   : > { %v5269_v58 = vpop.f32.mrf.mxu0 }
 0x60a   : > { %v5270_v57 = vadd.f32 %v5269_v58, %v10006_v47  ;;  %v5354_v5 = vpop.f32.mrf.mxu1  ;;  %v11122_v47 = vld [vmem:[#allocation174_spill] sm:$0xff] }
 0x60b   : > { %v5355_v37 = vadd.f32 %v5354_v5, %v5266_v39  ;;  %v5491_v32 = vpop.f32.mrf.mxu2  ;;  %v2462_v26 = vadd.f32 %v11122_v47, %v11121_v4  ;;  %v11129_v5 = vld [vmem:[#allocation181_spill] sm:$0xff]  ;;  %v11132_v47 = vld [vmem:[#allocation182_spill] sm:$0xff] }
 0x60c   : > { %v10142_v50 = vadd.f32 %v5628_v25, %v5491_v32  ;;  %5741 = vmatmul.f32.gmra.mxu0 %v7421_v62 }
 0x60d   : > { %v6121_v28 = vmul.f32 %v5355_v37, %v2547_v60  ;;  %5853 = vmatmul.f32.gmra.mxu1 %v11120_v24  ;;  %6059 = vmatmul.f32.gmra.mxu3 %v7412_v52  ;;  %v2551_v8 = vadd.f32 %v11123_v14, %v2462_v26 }
 0x60f   : > { %v6191_v6 = vadd.f32 %v6190_v35, %v6121_v28  ;;  %v11130_v28 = vld [vmem:[#allocation144_spill] sm:$0xff] }
 0x610   : > { %5970 = vmatmul.f32.gmra.mxu2 %v7412_v52  ;;  %v5632_v19 = vpop.f32.mrf.mxu3 }
 0x611   : > { %v5273_v44 = vpop.f32.mrf.mxu0 }
 0x612   : > { %v5274_v22 = vadd.f32 %v5273_v44, %v10012_v3  ;;  %v5358_v43 = vpop.f32.mrf.mxu1  ;;  %v11125_v3 = vld [vmem:[#allocation176_spill] sm:$0xff] }
 0x613   : > { %v5359_v7 = vadd.f32 %v5358_v43, %v5270_v57  ;;  %v5499_v62 = vpop.f32.mrf.mxu2  ;;  %v2466_v12 = vadd.f32 %v11125_v3, %v11124_v16  ;;  %v11133_v16 = vld [vmem:[#allocation183_spill] sm:$0xff] }
 0x614   : > { %v10152_v48 = vadd.f32 %v5632_v19, %v5499_v62  ;;  %5746 = vmatmul.f32.gmra.mxu0 %v7457_v63 }
 0x615   : > { %v6125_v15 = vmul.f32 %v5359_v7, %v2551_v8  ;;  %5859 = vmatmul.f32.gmra.mxu1 %v7430_v41  ;;  %6063 = vmatmul.f32.gmra.mxu3 %v7432_v0  ;;  %v2555_v34 = vadd.f32 %v11126_v31, %v2466_v12 }
 0x617   : > { %v6192_v52 = vadd.f32 %v6191_v6, %v6125_v15 }
 0x618   : > { %5974 = vmatmul.f32.gmra.mxu2 %v7432_v0  ;;  %v5636_v39 = vpop.f32.mrf.mxu3 }
 0x619   : > { %v5277_v23 = vpop.f32.mrf.mxu0 }
 0x61a   : > { %v5278_v10 = vadd.f32 %v5277_v23, %v10018_v46  ;;  %v5362_v36 = vpop.f32.mrf.mxu1  ;;  %v11128_v46 = vld [vmem:[#allocation178_spill] sm:$0xff] }
 0x61b   : > { %v5363_v17 = vadd.f32 %v5362_v36, %v5274_v22  ;;  %v5507_v63 = vpop.f32.mrf.mxu2  ;;  %v2470_v11 = vadd.f32 %v11128_v46, %v11127_v9 }
 0x61c   : > { %v10162_v35 = vadd.f32 %v5636_v39, %v5507_v63  ;;  %5751 = vmatmul.f32.gmra.mxu0 %v10962_v20  ;;  %v11134_v63 = vld [vmem:[#allocation184_spill] sm:$0xff] }
 0x61d   : > { %v6129_v41 = vmul.f32 %v5363_v17, %v2555_v34  ;;  %5865 = vmatmul.f32.gmra.mxu1 %v10963_v30  ;;  %6067 = vmatmul.f32.gmra.mxu3 %v11046_v33  ;;  %v2559_v13 = vadd.f32 %v11129_v5, %v2470_v11  ;;  %v11135_v5 = vld [vmem:[#allocation185_spill] sm:$0xff] }
 0x61f   : > { %v6193_v0 = vadd.f32 %v6192_v52, %v6129_v41 }
 0x620   : > { %5978 = vmatmul.f32.gmra.mxu2 %v11046_v33  ;;  %v5640_v25 = vpop.f32.mrf.mxu3 }
 0x621   : > { %v5281_v2 = vpop.f32.mrf.mxu0 }
 0x622   : > { %v5282_v58 = vadd.f32 %v5281_v2, %v10024_v51  ;;  %v5366_v57 = vpop.f32.mrf.mxu1  ;;  %v11131_v51 = vld [vmem:[#allocation180_spill] sm:$0xff] }
 0x623   : > { %v5367_v60 = vadd.f32 %v5366_v57, %v5278_v10  ;;  %v5515_v20 = vpop.f32.mrf.mxu2  ;;  %v2474_v24 = vadd.f32 %v11131_v51, %v11130_v28 }
 0x624   : > { %v10172_v37 = vadd.f32 %v5640_v25, %v5515_v20  ;;  %5756 = vmatmul.f32.gmra.mxu0 %v11047_v1 }
 0x625   : > { %v6133_v30 = vmul.f32 %v5367_v60, %v2559_v13  ;;  %5871 = vmatmul.f32.gmra.mxu1 %v10971_v56  ;;  %6071 = vmatmul.f32.gmra.mxu3 %v11052_v27  ;;  %v2563_v26 = vadd.f32 %v11132_v47, %v2474_v24 }
 0x627   : > { %v6194_v33 = vadd.f32 %v6193_v0, %v6133_v30 }
 0x628   : > { %5982 = vmatmul.f32.gmra.mxu2 %v11052_v27  ;;  %v5644_v32 = vpop.f32.mrf.mxu3 }
 0x629   : > { %v5682_v6 = vpop.f32.mrf.mxu0 }
 0x62a   : > { %v5683_v19 = vadd.f32 %v5682_v6, %v10031_v59  ;;  %v5370_v4 = vpop.f32.mrf.mxu1 }
 0x62b   : > { %v5371_v44 = vadd.f32 %v5370_v4, %v5282_v58  ;;  %v5523_v1 = vpop.f32.mrf.mxu2 }
 0x62c   : > { %v10182_v22 = vadd.f32 %v5644_v32, %v5523_v1 }
 0x62d   : > { %v6137_v56 = vmul.f32 %v5371_v44, %v2563_v26  ;;  %5877 = vmatmul.f32.gmra.mxu1 %v10979_v29 }
 0x62f   : > { %v10185_v43 = vadd.f32 %v6194_v33, %v6137_v56 }
 0x630   : > { %v6012_v27 = vpop.f32.mrf.mxu3 }
 0x631   : > { %v5687_v14 = vpop.f32.mrf.mxu0 }
 0x632   : > { %v5688_v8 = vadd.f32 %v5687_v14, %v10041_v61  ;;  %v5788_v7 = vpop.f32.mrf.mxu1 }
 0x633   : > { %v5789_v62 = vadd.f32 %v5788_v7, %v5683_v19  ;;  %v5923_v15 = vpop.f32.mrf.mxu2 }
 0x635   : > { %v5924_v59 = vadd.f32 %v5923_v15, %v5789_v62 }
 0x637   : > { %v6013_v52 = vadd.f32 %v6012_v27, %v5924_v59 }
 0x638   : > { %v6016_v39 = vpop.f32.mrf.mxu3 }
 0x639   : > { %v6078_v3 = vmul.f32 %v6013_v52, %v11133_v16  ;;  %v5692_v12 = vpop.f32.mrf.mxu0 }
 0x63a   : > { %v5693_v23 = vadd.f32 %v5692_v12, %v10051_v21  ;;  %v5794_v10 = vpop.f32.mrf.mxu1 }
 0x63b   : > { %v5795_v36 = vadd.f32 %v5794_v10, %v5688_v8  ;;  %v5927_v29 = vpop.f32.mrf.mxu2 }
 0x63d   : > { %v5928_v31 = vadd.f32 %v5927_v29, %v5795_v36 }
 0x63f   : > { %v6017_v34 = vadd.f32 %v6016_v39, %v5928_v31 }
 0x640   : > { %v6020_v17 = vpop.f32.mrf.mxu3 }
 0x641   : > { %v6082_v41 = vmul.f32 %v6017_v34, %v11134_v63  ;;  %v5697_v61 = vpop.f32.mrf.mxu0 }
 0x642   : > { %v5698_v0 = vadd.f32 %v5697_v61, %v10061_v54  ;;  %v5800_v25 = vpop.f32.mrf.mxu1  ;;  %v11136_v54 = vld [vmem:[#allocation153_spill] sm:$0xff] }
 0x643   : > { %v6202_v9 = vadd.f32 %v6082_v41, %v6078_v3  ;;  %v5801_v46 = vadd.f32 %v5800_v25, %v5693_v23  ;;  %v5931_v11 = vpop.f32.mrf.mxu2  ;;  %v11138_v23 = vld [vmem:[#allocation159_spill] sm:$0xff] }
 0x645   : > { %v5932_v2 = vadd.f32 %v5931_v11, %v5801_v46 }
 0x647   : > { %v6021_v58 = vadd.f32 %v6020_v17, %v5932_v2 }
 0x648   : > { %v6024_v57 = vpop.f32.mrf.mxu3 }
 0x649   : > { %v6086_v21 = vmul.f32 %v6021_v58, %v11135_v5  ;;  %v5702_v13 = vpop.f32.mrf.mxu0 }
 0x64a   : > { %v5703_v60 = vadd.f32 %v5702_v13, %v10071_v18  ;;  %v5806_v20 = vpop.f32.mrf.mxu1  ;;  %v11137_v18 = vld [vmem:[#allocation156_spill] sm:$0xff]  ;;  %v11140_v13 = vld [vmem:[#allocation165_spill] sm:$0xff] }
 0x64b   : > { %v6203_v30 = vadd.f32 %v6202_v9, %v6086_v21  ;;  %v5807_v33 = vadd.f32 %v5806_v20, %v5698_v0  ;;  %v5935_v32 = vpop.f32.mrf.mxu2  ;;  %v11139_v0 = vld [vmem:[#allocation162_spill] sm:$0xff] }
 0x64d   : > { %v5936_v28 = vadd.f32 %v5935_v32, %v5807_v33 }
 0x64f   : > { %v6025_v51 = vadd.f32 %v6024_v57, %v5936_v28 }
 0x650   : > { %v6028_v24 = vpop.f32.mrf.mxu3 }
 0x651   : > { %v6090_v6 = vmul.f32 %v6025_v51, %v11136_v54  ;;  %v5707_v19 = vpop.f32.mrf.mxu0 }
 0x652   : > { %v5812_v4 = vpop.f32.mrf.mxu1  ;;  %v5708_v14 = vadd.f32 %v5707_v19, %v10081_v55 }
 0x653   : > { %v6204_v47 = vadd.f32 %v6203_v30, %v6090_v6  ;;  %v5813_v26 = vadd.f32 %v5812_v4, %v5703_v60  ;;  %v5939_v44 = vpop.f32.mrf.mxu2  ;;  %v11141_v6 = vld [vmem:[#allocation168_spill] sm:$0xff] }
 0x655   : > { %v5940_v1 = vadd.f32 %v5939_v44, %v5813_v26 }
 0x657   : > { %v6029_v56 = vadd.f32 %v6028_v24, %v5940_v1 }
 0x658   : > { %v6032_v27 = vpop.f32.mrf.mxu3 }
 0x659   : > { %v6094_v8 = vmul.f32 %v6029_v56, %v11137_v18  ;;  %v5712_v7 = vpop.f32.mrf.mxu0  ;;  %v11142_v18 = vld [vmem:[#allocation186_spill] sm:$0xff] }
 0x65a   : > { %v5818_v62 = vpop.f32.mrf.mxu1  ;;  %v5713_v12 = vadd.f32 %v5712_v7, %v10091_v49 }
 0x65b   : > { %v6205_v15 = vadd.f32 %v6204_v47, %v6094_v8  ;;  %v5819_v59 = vadd.f32 %v5818_v62, %v5708_v14  ;;  %v5943_v52 = vpop.f32.mrf.mxu2 }
 0x65d   : > { %v5944_v39 = vadd.f32 %v5943_v52, %v5819_v59 }
 0x65f   : > { %v6033_v16 = vadd.f32 %v6032_v27, %v5944_v39 }
 0x660   : > { %v6036_v3 = vpop.f32.mrf.mxu3 }
 0x661   : > { %v6098_v10 = vmul.f32 %v6033_v16, %v11138_v23  ;;  %v5717_v36 = vpop.f32.mrf.mxu0 }
 0x662   : > { %v5824_v29 = vpop.f32.mrf.mxu1  ;;  %v5718_v61 = vadd.f32 %v5717_v36, %v10102_v40 }
 0x663   : > { %v6206_v31 = vadd.f32 %v6205_v15, %v6098_v10  ;;  %v5825_v34 = vadd.f32 %v5824_v29, %v5713_v12  ;;  %v5947_v17 = vpop.f32.mrf.mxu2  ;;  %v11143_v12 = vld [vmem:[#allocation173_spill] sm:$0xff] }
 0x665   : > { %v5948_v55 = vadd.f32 %v5947_v17, %v5825_v34 }
 0x667   : > { %v6037_v63 = vadd.f32 %v6036_v3, %v5948_v55 }
 0x668   : > { %v6040_v41 = vpop.f32.mrf.mxu3 }
 0x669   : > { %v6102_v25 = vmul.f32 %v6037_v63, %v11139_v0  ;;  %v5722_v9 = vpop.f32.mrf.mxu0 }
 0x66a   : > { %v5830_v46 = vpop.f32.mrf.mxu1  ;;  %v5723_v21 = vadd.f32 %v5722_v9, %v10112_v45 }
 0x66b   : > { %v6207_v11 = vadd.f32 %v6206_v31, %v6102_v25  ;;  %v5831_v2 = vadd.f32 %v5830_v46, %v5718_v61  ;;  %v5951_v58 = vpop.f32.mrf.mxu2 }
 0x66d   : > { %v5952_v49 = vadd.f32 %v5951_v58, %v5831_v2 }
 0x66f   : > { %v6041_v57 = vadd.f32 %v6040_v41, %v5952_v49  ;;  %v11144_v41 = vld [vmem:[#allocation44_spill] sm:$0xff] }
 0x670   : > { %v6044_v5 = vpop.f32.mrf.mxu3 }
 0x671   : > { %v6106_v60 = vmul.f32 %v6041_v57, %v11140_v13  ;;  %v5727_v20 = vpop.f32.mrf.mxu0  ;;  %v11145_v57 = vld [vmem:[#allocation187_spill] sm:$0xff] }
 0x672   : > { %v5836_v30 = vpop.f32.mrf.mxu1  ;;  %v5728_v54 = vadd.f32 %v5727_v20, %v10122_v53 }
 0x673   : > { %v6208_v33 = vadd.f32 %v6207_v11, %v6106_v60  ;;  %v5837_v32 = vadd.f32 %v5836_v30, %v5723_v21  ;;  %v5955_v28 = vpop.f32.mrf.mxu2 }
 0x675   : > { %v5956_v40 = vadd.f32 %v5955_v28, %v5837_v32  ;;  %v11146_v28 = vld [vmem:[#allocation188_spill] sm:$0xff] }
 0x677   : > { %v6045_v51 = vadd.f32 %v6044_v5, %v5956_v40 }
 0x678   : > { %v6048_v24 = vpop.f32.mrf.mxu3 }
 0x679   : > { %v6110_v19 = vmul.f32 %v6045_v51, %v11141_v6  ;;  %v5732_v4 = vpop.f32.mrf.mxu0 }
 0x67a   : > { %v5842_v47 = vpop.f32.mrf.mxu1  ;;  %v5733_v14 = vadd.f32 %v5732_v4, %v10132_v42 }
 0x67b   : > { %v6209_v26 = vadd.f32 %v6208_v33, %v6110_v19  ;;  %v5843_v44 = vadd.f32 %v5842_v47, %v5728_v54  ;;  %v5959_v1 = vpop.f32.mrf.mxu2 }
 0x67d   : > { %v5960_v45 = vadd.f32 %v5959_v1, %v5843_v44  ;;  %v11147_v1 = vld [vmem:[#allocation189_spill] sm:$0xff] }
 0x67f   : > { %v6049_v56 = vadd.f32 %v6048_v24, %v5960_v45 }
 0x680   : > { %v6052_v27 = vpop.f32.mrf.mxu3 }
 0x681   : > { %v6114_v8 = vmul.f32 %v6049_v56, %v11142_v18  ;;  %v5737_v7 = vpop.f32.mrf.mxu0 }
 0x682   : > { %v5848_v62 = vpop.f32.mrf.mxu1  ;;  %v5738_v3 = vadd.f32 %v5737_v7, %v10142_v50 }
 0x683   : > { %v6210_v15 = vadd.f32 %v6209_v26, %v6114_v8  ;;  %v5849_v59 = vadd.f32 %v5848_v62, %v5733_v14  ;;  %v5963_v52 = vpop.f32.mrf.mxu2  ;;  %v6196_v26 = vrot.slane %v10185_v43, 4 }
 0x685   : > { %v5964_v53 = vadd.f32 %v5963_v52, %v5849_v59  ;;  %v6197_v8 = vadd.f32 %v6196_v26, %v10185_v43  ;;  %v11148_v59 = vld [vmem:[#allocation190_spill] sm:$0xff] }
 0x687   : > { %v6053_v39 = vadd.f32 %v6052_v27, %v5964_v53 }
 0x688   : > { %v6056_v16 = vpop.f32.mrf.mxu3 }
 0x689   : > { %v6118_v23 = vmul.f32 %v6053_v39, %v11143_v12  ;;  %v5742_v10 = vpop.f32.mrf.mxu0 }
 0x68a   : > { %v5854_v36 = vpop.f32.mrf.mxu1  ;;  %v5743_v63 = vadd.f32 %v5742_v10, %v10152_v48 }
 0x68b   : > { %v6211_v29 = vadd.f32 %v6210_v15, %v6118_v23  ;;  %v5855_v31 = vadd.f32 %v5854_v36, %v5738_v3  ;;  %v5967_v34 = vpop.f32.mrf.mxu2  ;;  %v6198_v15 = vrot.slane %v6197_v8, 2 }
 0x68d   : > { %v5968_v42 = vadd.f32 %v5967_v34, %v5855_v31  ;;  %v6199_v39 = vadd.f32 %v6198_v15, %v6197_v8  ;;  %v11149_v34 = vlaneseq }
 0x68f   : > { %v6057_v17 = vadd.f32 %v6056_v16, %v5968_v42  ;;  %v6200_v3 = vrot.slane %v6199_v39, 1  ;;  %vm6239_vm4 = vcmp.lt.s32.totalorder %v11149_v34, 512 }
 0x690   : > { %v6060_v55 = vpop.f32.mrf.mxu3 }
 0x691   : > { %v6122_v61 = vmul.f32 %v6057_v17, %v11144_v41  ;;  %v5747_v0 = vpop.f32.mrf.mxu0  ;;  %v6201_v10 = vadd.f32 %v6200_v3, %v6199_v39 }
 0x692   : > { %v5860_v25 = vpop.f32.mrf.mxu1  ;;  %v5748_v49 = vadd.f32 %v5747_v0, %v10162_v35 }
 0x693   : > { %v6212_v9 = vadd.f32 %v6211_v29, %v6122_v61  ;;  %v5861_v46 = vadd.f32 %v5860_v25, %v5743_v63  ;;  %v5971_v11 = vpop.f32.mrf.mxu2  ;;  %v6228_v29 = vrot.slane %v6201_v10, 6 }
 0x695   : > { %v5972_v50 = vadd.f32 %v5971_v11, %v5861_v46 }
 0x697   : > { %v6061_v2 = vadd.f32 %v6060_v55, %v5972_v50 }
 0x698   : > { %v6064_v58 = vpop.f32.mrf.mxu3 }
 0x699   : > { %v6126_v5 = vmul.f32 %v6061_v2, %v11145_v57  ;;  %v5752_v30 = vpop.f32.mrf.mxu0 }
 0x69a   : > { %v5866_v21 = vpop.f32.mrf.mxu1  ;;  %v5753_v32 = vadd.f32 %v5752_v30, %v10172_v37 }
 0x69b   : > { %v6213_v13 = vadd.f32 %v6212_v9, %v6126_v5  ;;  %v5867_v60 = vadd.f32 %v5866_v21, %v5748_v49  ;;  %v5975_v20 = vpop.f32.mrf.mxu2 }
 0x69d   : > { %v5976_v48 = vadd.f32 %v5975_v20, %v5867_v60 }
 0x69f   : > { %v6065_v33 = vadd.f32 %v6064_v58, %v5976_v48 }
 0x6a0   : > { %v6068_v24 = vpop.f32.mrf.mxu3 }
 0x6a1   : > { %v6130_v40 = vmul.f32 %v6065_v33, %v11146_v28  ;;  %v5757_v35 = vpop.f32.mrf.mxu0 }
 0x6a2   : > { %v5872_v51 = vpop.f32.mrf.mxu1  ;;  %v5758_v44 = vadd.f32 %v5757_v35, %v10182_v22 }
 0x6a3   : > { %v6214_v54 = vadd.f32 %v6213_v13, %v6130_v40  ;;  %v5873_v6 = vadd.f32 %v5872_v51, %v5753_v32  ;;  %v5979_v19 = vpop.f32.mrf.mxu2 }
 0x6a5   : > { %v5980_v4 = vadd.f32 %v5979_v19, %v5873_v6 }
 0x6a7   : > { %v6069_v47 = vadd.f32 %v6068_v24, %v5980_v4 }
 0x6a8   : > { %v6072_v18 = vpop.f32.mrf.mxu3 }
 0x6a9   : > { %v6134_v45 = vmul.f32 %v6069_v47, %v11147_v1 }
 0x6aa   : > { %v5878_v56 = vpop.f32.mrf.mxu1 }
 0x6ab   : > { %v6215_v27 = vadd.f32 %v6214_v54, %v6134_v45  ;;  %v5879_v37 = vadd.f32 %v5878_v56, %v5758_v44  ;;  %v5983_v14 = vpop.f32.mrf.mxu2 }
 0x6ad   : > { %v5984_v7 = vadd.f32 %v5983_v14, %v5879_v37 }
 0x6af   : > { %v6073_v62 = vadd.f32 %v6072_v18, %v5984_v7 }
 0x6b1   : > { %v6138_v52 = vmul.f32 %v6073_v62, %v11148_v59 }
 0x6b3   : > { %v6216_v53 = vadd.f32 %v6215_v27, %v6138_v52 }
 0x6b5   : > { %v6217_v16 = vrot.slane %v6216_v53, 4 }
 0x6b7   : > { %v6218_v22 = vadd.f32 %v6217_v16, %v6216_v53 }
 0x6b9   : > { %v6219_v12 = vrot.slane %v6218_v22, 2 }
 0x6bb   : > { %v6220_v23 = vadd.f32 %v6219_v12, %v6218_v22 }
 0x6bd   : > { %v6221_v36 = vrot.slane %v6220_v23, 1 }
 0x6bf   : > { %v6222_v43 = vadd.f32 %v6221_v36, %v6220_v23 }
 0x6c1   : > { %v6229_v31 = vrot.slane %v6222_v43, 5 }
 0x6c3   : > { %v6233_v42 = vsel %vm6232_vm2, %v6228_v29, %v6229_v31 }
 0x6c4   : > { %v6235_v17 = vsel %vm6234_vm3, %v9941_v38, %v6233_v42 }
 0x6c5   : > { %6241 = vst.msk [vmem:[%s174_s10] sm:$0xf] %vm6239_vm4, %v6235_v17 }
 0x6c6   : > { %6666 = shalt.err (!%p6663_p3)
}
 0x6c7   : > { %6596 = dma.vmem_to_hbm [thread:$0]  (%p6763_p5), %s6256_s11, 64, %s6258_s17, %s6243_s16  }
 0x6c8 PF: > { %p6602_p4 = scmp.ge.s32.totalorder %s6701_s15, 2  ;;  %s6269_s30 = sand.u32 1, %s6689_s12  }
 0x6c9   : > { %s6270_s4 = scalar_lea.sflag [#allocation3], %s6269_s30 }
 0x6ca   : > { %p6599_p7 = pnand %p6602_p4, %p6767_p6 }
 0x6cc   : > { %p6600_p8 = pneg %p6599_p7 }
 0x6ce   : > { %6684 = dma.done.wait (%p6600_p8), %s6270_s4, 64  }
 0x6cf   : > { %6686 = vsyncadd (%p6600_p8), %s6270_s4, 4294967232  ;;  %p13_p9 = scmp.ge.s32.totalorder %s6750_s18, 5   ;;  %s11150_s12 = smov %s6693_s13 }
 0x6d0   : > { %s11151_s13 = smov %s6697_s14  ;;  %s11152_s14 = smov %s6761_s21 }
 0x6d1   : > { %s11153_s15 = smov %s6750_s18  ;;  %15 = sbr.rel (!%p13_p9) target bundleno = 3 (0x3), region = 70 }
 0x6d6   :  { %6276 = vsyncpa [#allocation3], 1 }
 0x6d7   :  { %6278 = vsyncpa [#allocation3 + $0x1], 1 }

</bundles_post_ra>
